<compile_context>
chip_gen: v7x
topology: tpu7x:2x2x1
jax: 0.10.0
libtpu: 0.0.40
codegen_flags: <defaults>
</compile_context>

<pallas_src>
import functools

import jax
import jax.numpy as jnp
from jax.experimental import pallas as pl
from jax.experimental.pallas import tpu as pltpu


def _adap_filter_kernel(x_ref, f_ref, o_ref, acc_ref, *,
                        kernel_size, dilation, pads, residual):
    """Blocks seen per grid step (b, cf, i_d, i_kd):

      x_ref  : (grp, Dp, Hp, Wp)  padded input, all channels of one filter group
      f_ref  : (h*w, Dt, H, W)    adaptive weights of one kd-plane of taps, one D tile
      o_ref  : (grp, Dt, H, W)    output tile (resident across the kd reduction axis)
      acc_ref: (grp, Dt, H, W)    f32 VMEM accumulator scratch
    """
    d, h, w = kernel_size
    dil_d, dil_h, dil_w = dilation
    pd, ph, pw = pads
    grp, Dt, H, W = o_ref.shape

    i_d = pl.program_id(2)    # D tile index
    i_kd = pl.program_id(3)   # kd-plane of taps (reduction axis)

    @pl.when(i_kd == 0)
    def _init():
        acc_ref[...] = jnp.zeros_like(acc_ref)

    z_out0 = i_d * Dt                 # first output depth row of this tile
    z0 = z_out0 + i_kd * dil_d        # matching depth offset into the padded input (kd == i_kd)

    for kh in range(h):
        for g in range(grp):
            # One aligned load per (g, kd, kh): full padded W row (lane dim taken whole);
            # the kw taps below come from in-register lane shifts instead of unaligned
            # ref slices.  D is a major dim, so the dynamic z0 offset is plain addressing.
            base = x_ref[g, pl.ds(z0, Dt), pl.ds(kh * dil_h, H), :].astype(jnp.float32)
            for kw in range(w):
                tap = base[:, :, kw * dil_w: kw * dil_w + W]          # XLU lane shift
                fw = f_ref[kh * w + kw].astype(jnp.float32)
                acc_ref[g] += tap * fw                                # bounded live ranges

    @pl.when(i_kd == pl.num_programs(3) - 1)
    def _finalize():
        res = acc_ref[...]
        if residual:
            # Fused epilogue: add the original (unpadded) input, read from the padded block.
            res = res + x_ref[:, pl.ds(z_out0 + pd, Dt),
                              pl.ds(ph, H), pl.ds(pw, W)].astype(jnp.float32)
        o_ref[...] = res.astype(o_ref.dtype)


def adap_filter_3d(x, F, kernel_size=(3, 3, 3), dilation=(1, 1, 1),
                   norm=None, act=None, residual=False,
                   block_d=None, f_block_bytes=6 * 1024 * 1024,
                   vmem_limit_bytes=64 * 1024 * 1024):
    """Pallas implementation of AdapFilter3d.forward.

    x: (B, C, D, H, W)
    F: preferred tap-major layout (B, C_F, N, D, H, W) with n = kd*h*w + kh*w + kw
       (no relayout before the kernel), or the module's native (B, C_F, D, H, W, d, h, w)
       which takes a one-time compatibility transpose.
    returns (B, C, D, H, W)
    """
    if isinstance(kernel_size, int):
        kernel_size = (kernel_size,) * 3
    if isinstance(dilation, int):
        dilation = (dilation,) * 3
    d, h, w = kernel_size
    dil_d, dil_h, dil_w = dilation
    N = d * h * w

    B, C, D, H, W = x.shape
    C_F = F.shape[1]

    if F.ndim == 8:
        # Compatibility path for the module-native layout: one HBM relayout of F.
        # TODO(synk): fuse this permute into the producer of F and pass tap-major directly.
        assert F.shape == (B, C_F, D, H, W, d, h, w), "input and filtering kernel do not match"
        F = F.reshape(B, C_F, D, H, W, N).transpose(0, 1, 5, 2, 3, 4)
    assert F.shape == (B, C_F, N, D, H, W), "input and filtering kernel do not match"
    if C != C_F:
        assert C > C_F and C % C_F == 0, "computed filters do not match features"
    grp = C // C_F

    d_dil = (d - 1) * dil_d + 1
    h_dil = (h - 1) * dil_h + 1
    w_dil = (w - 1) * dil_w + 1
    assert d_dil % 2 == 1 and h_dil % 2 == 1 and w_dil % 2 == 1, \
        "even effective kernel extents are not supported (asymmetric padding)"
    pd, ph, pw = (d_dil - 1) // 2, (h_dil - 1) // 2, (w_dil - 1) // 2

    # Pick the D tile so one F block (h*w taps of one D tile) stays a few MiB
    # (Pallas double-buffers it); biggest tile that fits the budget and divides D.
    if block_d is None:
        itemsize = jnp.dtype(F.dtype).itemsize
        block_d = 1
        for cand in range(D, 0, -1):
            if D % cand == 0 and h * w * cand * H * W * itemsize <= f_block_bytes:
                block_d = cand
                break
    assert D % block_d == 0, "block_d must divide D"
    Dt = block_d

    # Group the grp channels sharing one filter into one block axis, then zero pad.
    x6 = x.reshape(B, C_F, grp, D, H, W)
    x_pad = jnp.pad(x6, ((0, 0), (0, 0), (0, 0), (pd, pd), (ph, ph), (pw, pw)))
    Dp, Hp, Wp = D + 2 * pd, H + 2 * ph, W + 2 * pw

    # residual may only be fused if it does not have to come after norm/act.
    fuse_residual = residual and (norm is None) and (act is None)

    kernel = functools.partial(
        _adap_filter_kernel,
        kernel_size=(d, h, w),
        dilation=(dil_d, dil_h, dil_w),
        pads=(pd, ph, pw),
        residual=fuse_residual,
    )

    out6 = pl.pallas_call(
        kernel,
        out_shape=jax.ShapeDtypeStruct((B, C_F, grp, D, H, W), x.dtype),
        grid=(B, C_F, D // Dt, d),
        in_specs=[
            # Padded input: full per-group volume; block index constant across the D tile
            # and kd axes -> DMA'd once per (b, cf) and reused from VMEM.
            pl.BlockSpec((None, None, grp, Dp, Hp, Wp),
                         lambda b, cf, i_d, i_kd: (b, cf, 0, 0, 0, 0)),
            # Adaptive weights, tap-major: one kd-plane (h*w taps) of one D tile per step.
            pl.BlockSpec((None, None, h * w, Dt, H, W),
                         lambda b, cf, i_d, i_kd: (b, cf, i_kd, i_d, 0, 0)),
        ],
        out_specs=pl.BlockSpec((None, None, grp, Dt, H, W),
                               lambda b, cf, i_d, i_kd: (b, cf, 0, i_d, 0, 0)),
        scratch_shapes=[pltpu.VMEM((grp, Dt, H, W), jnp.float32)],
        compiler_params=pltpu.CompilerParams(
            dimension_semantics=("parallel", "parallel", "arbitrary", "arbitrary"),
            vmem_limit_bytes=vmem_limit_bytes),
    )(x_pad, F)

    out = out6.reshape(B, C, D, H, W)

    if norm is not None:
        out = norm(out)
    if act is not None:
        out = act(out)
    if residual and not fuse_residual:
        out = x + out
    return out


def _reference(x, F_native, kernel_size, dilation):
    """Pure-JAX reference with identical semantics (module-native F layout)."""
    B, C, D, H, W = x.shape
    d, h, w = kernel_size
    dil_d, dil_h, dil_w = dilation
    C_F = F_native.shape[1]
    grp = C // C_F
    F_full = jnp.repeat(F_native, grp, axis=1)       # (B, C, D, H, W, d, h, w)
    pd = ((d - 1) * dil_d) // 2
    ph = ((h - 1) * dil_h) // 2
    pw = ((w - 1) * dil_w) // 2
    x_pad = jnp.pad(x, ((0, 0), (0, 0), (pd, pd), (ph, ph), (pw, pw)))
    out = jnp.zeros((B, C, D, H, W), jnp.float32)
    for kd in range(d):
        for kh in range(h):
            for kw in range(w):
                patch = x_pad[:, :,
                              kd * dil_d: kd * dil_d + D,
                              kh * dil_h: kh * dil_h + H,
                              kw * dil_w: kw * dil_w + W]
                out = out + patch.astype(jnp.float32) \
                          * F_full[..., kd, kh, kw].astype(jnp.float32)
    return out.astype(x.dtype)


if __name__ == "__main__":
    # Small deterministic example (module defaults: kernel=[3,3,3], dilation=[1,1,1]).
    B, C, C_F, D, H, W = 2, 4, 2, 8, 16, 16
    kernel_size = (3, 3, 3)
    dilation = (1, 1, 1)
    d, h, w = kernel_size
    N = d * h * w

    key = jax.random.PRNGKey(0)
    kx, kf = jax.random.split(key)
    x = jax.random.normal(kx, (B, C, D, H, W), dtype=jnp.float32)
    # Preferred path: the producer of the adaptive kernel emits it tap-major
    # (B, C_F, N, D, H, W), n = kd*h*w + kh*w + kw  -> no relayout before the kernel.
    F_taps = jax.random.normal(kf, (B, C_F, N, D, H, W), dtype=jnp.float32)
    # Module-native view of the same weights (used only by the reference / compat path).
    F_native = F_taps.transpose(0, 1, 3, 4, 5, 2).reshape(B, C_F, D, H, W, d, h, w)

    ref = _reference(x, F_native, kernel_size, dilation)

    # Fast path: tap-major F, D tiled (2 tiles) + kd reduction axis, no residual.
    out = adap_filter_3d(x, F_taps, kernel_size=kernel_size, dilation=dilation, block_d=4)
    out = jax.block_until_ready(out)
    assert out.shape == (B, C, D, H, W)
    assert jnp.allclose(out, ref, atol=1e-4, rtol=1e-4), "Pallas output mismatch vs reference"

    # Compatibility path: module-native 8-D F layout + fused residual epilogue.
    out_res = adap_filter_3d(x, F_native, kernel_size=kernel_size, dilation=dilation,
                             residual=True)
    out_res = jax.block_until_ready(out_res)
    assert jnp.allclose(out_res, ref + x, atol=1e-4, rtol=1e-4), \
        "Pallas residual output mismatch vs reference"

    print("KERNEL_OK")
</pallas_src>

<mosaic_0001>
module attributes {stable_mosaic.version = 11 : i64} {
  func.func @_adap_filter_kernel(%arg0: i32, %arg1: i32, %arg2: i32, %arg3: i32, %arg4: memref<1x1x2x10x18x18xf32, #tpu.memory_space<vmem>>, %arg5: memref<1x1x9x4x16x16xf32, #tpu.memory_space<vmem>>, %arg6: memref<1x1x2x4x16x16xf32, #tpu.memory_space<vmem>>, %arg7: memref<2x4x16x16xf32, #tpu.memory_space<vmem>>) attributes {dimension_semantics = [#tpu.dimension_semantics<parallel>, #tpu.dimension_semantics<parallel>, #tpu.dimension_semantics<arbitrary>, #tpu.dimension_semantics<arbitrary>], iteration_bounds = array<i64: 2, 2, 2, 3>, scalar_prefetch = 0 : i64, scratch_operands = 1 : i64, tpu.core_type = #tpu.core_type<tc>, window_params = [{transform_indices = @transform_0, window_bounds = array<i64: 1, 1, 2, 10, 18, 18>}, {transform_indices = @transform_1, window_bounds = array<i64: 1, 1, 9, 4, 16, 16>}, {transform_indices = @transform_2, window_bounds = array<i64: 1, 1, 2, 4, 16, 16>}]} {
    %c0_i32 = arith.constant 0 : i32
    %0 = arith.cmpi eq, %arg3, %c0_i32 : i32
    %1 = arith.extui %0 : i1 to i32
    %c0_i32_0 = arith.constant 0 : i32
    %2 = arith.cmpi ne, %1, %c0_i32_0 : i32
    scf.if %2 {
      %cst = arith.constant 0.000000e+00 : f32
      %207 = vector.broadcast %cst : f32 to vector<2x4x16x16xf32>
      %c0_275 = arith.constant 0 : index
      %c0_276 = arith.constant 0 : index
      %c0_277 = arith.constant 0 : index
      %c0_278 = arith.constant 0 : index
      %208 = vector.load %arg7[%c0_275, %c0_276, %c0_277, %c0_278] : memref<2x4x16x16xf32, #tpu.memory_space<vmem>>, vector<2x4x16x16xf32>
      tpu.vector_store %arg7[%c0_275, %c0_276, %c0_277, %c0_278], %207 {strides = array<i32>} : memref<2x4x16x16xf32, #tpu.memory_space<vmem>>, vector<2x4x16x16xf32>,
    } else {
    }
    %c4_i32 = arith.constant 4 : i32
    %3 = arith.muli %arg2, %c4_i32 : i32
    %c1_i32 = arith.constant 1 : i32
    %4 = arith.muli %arg3, %c1_i32 : i32
    %5 = arith.addi %3, %4 : i32
    %c0 = arith.constant 0 : index
    %c0_1 = arith.constant 0 : index
    %c0_2 = arith.constant 0 : index
    %6 = arith.index_cast %5 : i32 to index
    %c0_3 = arith.constant 0 : index
    %c0_4 = arith.constant 0 : index
    %7 = vector.load %arg4[%c0, %c0_1, %c0_2, %6, %c0_3, %c0_4] : memref<1x1x2x10x18x18xf32, #tpu.memory_space<vmem>>, vector<1x1x1x4x16x18xf32>
    %8 = vector.shape_cast %7 : vector<1x1x1x4x16x18xf32> to vector<4x16x18xf32>
    %9 = vector.extract_strided_slice %8 {offsets = [0, 0, 0], sizes = [4, 16, 16], strides = [1, 1, 1]} : vector<4x16x18xf32> to vector<4x16x16xf32>
    %c0_5 = arith.constant 0 : index
    %c0_6 = arith.constant 0 : index
    %c0_7 = arith.constant 0 : index
    %c0_8 = arith.constant 0 : index
    %c0_9 = arith.constant 0 : index
    %c0_10 = arith.constant 0 : index
    %10 = vector.load %arg5[%c0_5, %c0_6, %c0_7, %c0_8, %c0_9, %c0_10] : memref<1x1x9x4x16x16xf32, #tpu.memory_space<vmem>>, vector<1x1x1x4x16x16xf32>
    %11 = vector.shape_cast %10 : vector<1x1x1x4x16x16xf32> to vector<4x16x16xf32>
    %c0_11 = arith.constant 0 : index
    %c0_12 = arith.constant 0 : index
    %c0_13 = arith.constant 0 : index
    %c0_14 = arith.constant 0 : index
    %12 = vector.load %arg7[%c0_11, %c0_12, %c0_13, %c0_14] : memref<2x4x16x16xf32, #tpu.memory_space<vmem>>, vector<1x4x16x16xf32>
    %13 = vector.shape_cast %12 : vector<1x4x16x16xf32> to vector<4x16x16xf32>
    %14 = arith.mulf %9, %11 : vector<4x16x16xf32>
    %15 = arith.addf %13, %14 : vector<4x16x16xf32>
    %c0_15 = arith.constant 0 : index
    %c0_16 = arith.constant 0 : index
    %c0_17 = arith.constant 0 : index
    %c0_18 = arith.constant 0 : index
    %16 = vector.load %arg7[%c0_15, %c0_16, %c0_17, %c0_18] : memref<2x4x16x16xf32, #tpu.memory_space<vmem>>, vector<1x4x16x16xf32>
    %17 = vector.shape_cast %16 : vector<1x4x16x16xf32> to vector<4x16x16xf32>
    %18 = vector.shape_cast %15 : vector<4x16x16xf32> to vector<1x4x16x16xf32>
    tpu.vector_store %arg7[%c0_15, %c0_16, %c0_17, %c0_18], %18 {strides = array<i32>} : memref<2x4x16x16xf32, #tpu.memory_space<vmem>>, vector<1x4x16x16xf32>,
    %19 = vector.extract_strided_slice %8 {offsets = [0, 0, 1], sizes = [4, 16, 16], strides = [1, 1, 1]} : vector<4x16x18xf32> to vector<4x16x16xf32>
    %c0_19 = arith.constant 0 : index
    %c0_20 = arith.constant 0 : index
    %c1 = arith.constant 1 : index
    %c0_21 = arith.constant 0 : index
    %c0_22 = arith.constant 0 : index
    %c0_23 = arith.constant 0 : index
    %20 = vector.load %arg5[%c0_19, %c0_20, %c1, %c0_21, %c0_22, %c0_23] : memref<1x1x9x4x16x16xf32, #tpu.memory_space<vmem>>, vector<1x1x1x4x16x16xf32>
    %21 = vector.shape_cast %20 : vector<1x1x1x4x16x16xf32> to vector<4x16x16xf32>
    %c0_24 = arith.constant 0 : index
    %c0_25 = arith.constant 0 : index
    %c0_26 = arith.constant 0 : index
    %c0_27 = arith.constant 0 : index
    %22 = vector.load %arg7[%c0_24, %c0_25, %c0_26, %c0_27] : memref<2x4x16x16xf32, #tpu.memory_space<vmem>>, vector<1x4x16x16xf32>
    %23 = vector.shape_cast %22 : vector<1x4x16x16xf32> to vector<4x16x16xf32>
    %24 = arith.mulf %19, %21 : vector<4x16x16xf32>
    %25 = arith.addf %23, %24 : vector<4x16x16xf32>
    %c0_28 = arith.constant 0 : index
    %c0_29 = arith.constant 0 : index
    %c0_30 = arith.constant 0 : index
    %c0_31 = arith.constant 0 : index
    %26 = vector.load %arg7[%c0_28, %c0_29, %c0_30, %c0_31] : memref<2x4x16x16xf32, #tpu.memory_space<vmem>>, vector<1x4x16x16xf32>
    %27 = vector.shape_cast %26 : vector<1x4x16x16xf32> to vector<4x16x16xf32>
    %28 = vector.shape_cast %25 : vector<4x16x16xf32> to vector<1x4x16x16xf32>
    tpu.vector_store %arg7[%c0_28, %c0_29, %c0_30, %c0_31], %28 {strides = array<i32>} : memref<2x4x16x16xf32, #tpu.memory_space<vmem>>, vector<1x4x16x16xf32>,
    %29 = vector.extract_strided_slice %8 {offsets = [0, 0, 2], sizes = [4, 16, 16], strides = [1, 1, 1]} : vector<4x16x18xf32> to vector<4x16x16xf32>
    %c0_32 = arith.constant 0 : index
    %c0_33 = arith.constant 0 : index
    %c2 = arith.constant 2 : index
    %c0_34 = arith.constant 0 : index
    %c0_35 = arith.constant 0 : index
    %c0_36 = arith.constant 0 : index
    %30 = vector.load %arg5[%c0_32, %c0_33, %c2, %c0_34, %c0_35, %c0_36] : memref<1x1x9x4x16x16xf32, #tpu.memory_space<vmem>>, vector<1x1x1x4x16x16xf32>
    %31 = vector.shape_cast %30 : vector<1x1x1x4x16x16xf32> to vector<4x16x16xf32>
    %c0_37 = arith.constant 0 : index
    %c0_38 = arith.constant 0 : index
    %c0_39 = arith.constant 0 : index
    %c0_40 = arith.constant 0 : index
    %32 = vector.load %arg7[%c0_37, %c0_38, %c0_39, %c0_40] : memref<2x4x16x16xf32, #tpu.memory_space<vmem>>, vector<1x4x16x16xf32>
    %33 = vector.shape_cast %32 : vector<1x4x16x16xf32> to vector<4x16x16xf32>
    %34 = arith.mulf %29, %31 : vector<4x16x16xf32>
    %35 = arith.addf %33, %34 : vector<4x16x16xf32>
    %c0_41 = arith.constant 0 : index
    %c0_42 = arith.constant 0 : index
    %c0_43 = arith.constant 0 : index
    %c0_44 = arith.constant 0 : index
    %36 = vector.load %arg7[%c0_41, %c0_42, %c0_43, %c0_44] : memref<2x4x16x16xf32, #tpu.memory_space<vmem>>, vector<1x4x16x16xf32>
    %37 = vector.shape_cast %36 : vector<1x4x16x16xf32> to vector<4x16x16xf32>
    %38 = vector.shape_cast %35 : vector<4x16x16xf32> to vector<1x4x16x16xf32>
    tpu.vector_store %arg7[%c0_41, %c0_42, %c0_43, %c0_44], %38 {strides = array<i32>} : memref<2x4x16x16xf32, #tpu.memory_space<vmem>>, vector<1x4x16x16xf32>,
    %c0_45 = arith.constant 0 : index
    %c0_46 = arith.constant 0 : index
    %c1_47 = arith.constant 1 : index
    %39 = arith.index_cast %5 : i32 to index
    %c0_48 = arith.constant 0 : index
    %c0_49 = arith.constant 0 : index
    %40 = vector.load %arg4[%c0_45, %c0_46, %c1_47, %39, %c0_48, %c0_49] : memref<1x1x2x10x18x18xf32, #tpu.memory_space<vmem>>, vector<1x1x1x4x16x18xf32>
    %41 = vector.shape_cast %40 : vector<1x1x1x4x16x18xf32> to vector<4x16x18xf32>
    %42 = vector.extract_strided_slice %41 {offsets = [0, 0, 0], sizes = [4, 16, 16], strides = [1, 1, 1]} : vector<4x16x18xf32> to vector<4x16x16xf32>
    %c0_50 = arith.constant 0 : index
    %c0_51 = arith.constant 0 : index
    %c0_52 = arith.constant 0 : index
    %c0_53 = arith.constant 0 : index
    %c0_54 = arith.constant 0 : index
    %c0_55 = arith.constant 0 : index
    %43 = vector.load %arg5[%c0_50, %c0_51, %c0_52, %c0_53, %c0_54, %c0_55] : memref<1x1x9x4x16x16xf32, #tpu.memory_space<vmem>>, vector<1x1x1x4x16x16xf32>
    %44 = vector.shape_cast %43 : vector<1x1x1x4x16x16xf32> to vector<4x16x16xf32>
    %c1_56 = arith.constant 1 : index
    %c0_57 = arith.constant 0 : index
    %c0_58 = arith.constant 0 : index
    %c0_59 = arith.constant 0 : index
    %45 = vector.load %arg7[%c1_56, %c0_57, %c0_58, %c0_59] : memref<2x4x16x16xf32, #tpu.memory_space<vmem>>, vector<1x4x16x16xf32>
    %46 = vector.shape_cast %45 : vector<1x4x16x16xf32> to vector<4x16x16xf32>
    %47 = arith.mulf %42, %44 : vector<4x16x16xf32>
    %48 = arith.addf %46, %47 : vector<4x16x16xf32>
    %c1_60 = arith.constant 1 : index
    %c0_61 = arith.constant 0 : index
    %c0_62 = arith.constant 0 : index
    %c0_63 = arith.constant 0 : index
    %49 = vector.load %arg7[%c1_60, %c0_61, %c0_62, %c0_63] : memref<2x4x16x16xf32, #tpu.memory_space<vmem>>, vector<1x4x16x16xf32>
    %50 = vector.shape_cast %49 : vector<1x4x16x16xf32> to vector<4x16x16xf32>
    %51 = vector.shape_cast %48 : vector<4x16x16xf32> to vector<1x4x16x16xf32>
    tpu.vector_store %arg7[%c1_60, %c0_61, %c0_62, %c0_63], %51 {strides = array<i32>} : memref<2x4x16x16xf32, #tpu.memory_space<vmem>>, vector<1x4x16x16xf32>,
    %52 = vector.extract_strided_slice %41 {offsets = [0, 0, 1], sizes = [4, 16, 16], strides = [1, 1, 1]} : vector<4x16x18xf32> to vector<4x16x16xf32>
    %c0_64 = arith.constant 0 : index
    %c0_65 = arith.constant 0 : index
    %c1_66 = arith.constant 1 : index
    %c0_67 = arith.constant 0 : index
    %c0_68 = arith.constant 0 : index
    %c0_69 = arith.constant 0 : index
    %53 = vector.load %arg5[%c0_64, %c0_65, %c1_66, %c0_67, %c0_68, %c0_69] : memref<1x1x9x4x16x16xf32, #tpu.memory_space<vmem>>, vector<1x1x1x4x16x16xf32>
    %54 = vector.shape_cast %53 : vector<1x1x1x4x16x16xf32> to vector<4x16x16xf32>
    %c1_70 = arith.constant 1 : index
    %c0_71 = arith.constant 0 : index
    %c0_72 = arith.constant 0 : index
    %c0_73 = arith.constant 0 : index
    %55 = vector.load %arg7[%c1_70, %c0_71, %c0_72, %c0_73] : memref<2x4x16x16xf32, #tpu.memory_space<vmem>>, vector<1x4x16x16xf32>
    %56 = vector.shape_cast %55 : vector<1x4x16x16xf32> to vector<4x16x16xf32>
    %57 = arith.mulf %52, %54 : vector<4x16x16xf32>
    %58 = arith.addf %56, %57 : vector<4x16x16xf32>
    %c1_74 = arith.constant 1 : index
    %c0_75 = arith.constant 0 : index
    %c0_76 = arith.constant 0 : index
    %c0_77 = arith.constant 0 : index
    %59 = vector.load %arg7[%c1_74, %c0_75, %c0_76, %c0_77] : memref<2x4x16x16xf32, #tpu.memory_space<vmem>>, vector<1x4x16x16xf32>
    %60 = vector.shape_cast %59 : vector<1x4x16x16xf32> to vector<4x16x16xf32>
    %61 = vector.shape_cast %58 : vector<4x16x16xf32> to vector<1x4x16x16xf32>
    tpu.vector_store %arg7[%c1_74, %c0_75, %c0_76, %c0_77], %61 {strides = array<i32>} : memref<2x4x16x16xf32, #tpu.memory_space<vmem>>, vector<1x4x16x16xf32>,
    %62 = vector.extract_strided_slice %41 {offsets = [0, 0, 2], sizes = [4, 16, 16], strides = [1, 1, 1]} : vector<4x16x18xf32> to vector<4x16x16xf32>
    %c0_78 = arith.constant 0 : index
    %c0_79 = arith.constant 0 : index
    %c2_80 = arith.constant 2 : index
    %c0_81 = arith.constant 0 : index
    %c0_82 = arith.constant 0 : index
    %c0_83 = arith.constant 0 : index
    %63 = vector.load %arg5[%c0_78, %c0_79, %c2_80, %c0_81, %c0_82, %c0_83] : memref<1x1x9x4x16x16xf32, #tpu.memory_space<vmem>>, vector<1x1x1x4x16x16xf32>
    %64 = vector.shape_cast %63 : vector<1x1x1x4x16x16xf32> to vector<4x16x16xf32>
    %c1_84 = arith.constant 1 : index
    %c0_85 = arith.constant 0 : index
    %c0_86 = arith.constant 0 : index
    %c0_87 = arith.constant 0 : index
    %65 = vector.load %arg7[%c1_84, %c0_85, %c0_86, %c0_87] : memref<2x4x16x16xf32, #tpu.memory_space<vmem>>, vector<1x4x16x16xf32>
    %66 = vector.shape_cast %65 : vector<1x4x16x16xf32> to vector<4x16x16xf32>
    %67 = arith.mulf %62, %64 : vector<4x16x16xf32>
    %68 = arith.addf %66, %67 : vector<4x16x16xf32>
    %c1_88 = arith.constant 1 : index
    %c0_89 = arith.constant 0 : index
    %c0_90 = arith.constant 0 : index
    %c0_91 = arith.constant 0 : index
    %69 = vector.load %arg7[%c1_88, %c0_89, %c0_90, %c0_91] : memref<2x4x16x16xf32, #tpu.memory_space<vmem>>, vector<1x4x16x16xf32>
    %70 = vector.shape_cast %69 : vector<1x4x16x16xf32> to vector<4x16x16xf32>
    %71 = vector.shape_cast %68 : vector<4x16x16xf32> to vector<1x4x16x16xf32>
    tpu.vector_store %arg7[%c1_88, %c0_89, %c0_90, %c0_91], %71 {strides = array<i32>} : memref<2x4x16x16xf32, #tpu.memory_space<vmem>>, vector<1x4x16x16xf32>,
    %c0_92 = arith.constant 0 : index
    %c0_93 = arith.constant 0 : index
    %c0_94 = arith.constant 0 : index
    %72 = arith.index_cast %5 : i32 to index
    %c1_95 = arith.constant 1 : index
    %c0_96 = arith.constant 0 : index
    %73 = vector.load %arg4[%c0_92, %c0_93, %c0_94, %72, %c1_95, %c0_96] : memref<1x1x2x10x18x18xf32, #tpu.memory_space<vmem>>, vector<1x1x1x4x16x18xf32>
    %74 = vector.shape_cast %73 : vector<1x1x1x4x16x18xf32> to vector<4x16x18xf32>
    %75 = vector.extract_strided_slice %74 {offsets = [0, 0, 0], sizes = [4, 16, 16], strides = [1, 1, 1]} : vector<4x16x18xf32> to vector<4x16x16xf32>
    %c0_97 = arith.constant 0 : index
    %c0_98 = arith.constant 0 : index
    %c3 = arith.constant 3 : index
    %c0_99 = arith.constant 0 : index
    %c0_100 = arith.constant 0 : index
    %c0_101 = arith.constant 0 : index
    %76 = vector.load %arg5[%c0_97, %c0_98, %c3, %c0_99, %c0_100, %c0_101] : memref<1x1x9x4x16x16xf32, #tpu.memory_space<vmem>>, vector<1x1x1x4x16x16xf32>
    %77 = vector.shape_cast %76 : vector<1x1x1x4x16x16xf32> to vector<4x16x16xf32>
    %c0_102 = arith.constant 0 : index
    %c0_103 = arith.constant 0 : index
    %c0_104 = arith.constant 0 : index
    %c0_105 = arith.constant 0 : index
    %78 = vector.load %arg7[%c0_102, %c0_103, %c0_104, %c0_105] : memref<2x4x16x16xf32, #tpu.memory_space<vmem>>, vector<1x4x16x16xf32>
    %79 = vector.shape_cast %78 : vector<1x4x16x16xf32> to vector<4x16x16xf32>
    %80 = arith.mulf %75, %77 : vector<4x16x16xf32>
    %81 = arith.addf %79, %80 : vector<4x16x16xf32>
    %c0_106 = arith.constant 0 : index
    %c0_107 = arith.constant 0 : index
    %c0_108 = arith.constant 0 : index
    %c0_109 = arith.constant 0 : index
    %82 = vector.load %arg7[%c0_106, %c0_107, %c0_108, %c0_109] : memref<2x4x16x16xf32, #tpu.memory_space<vmem>>, vector<1x4x16x16xf32>
    %83 = vector.shape_cast %82 : vector<1x4x16x16xf32> to vector<4x16x16xf32>
    %84 = vector.shape_cast %81 : vector<4x16x16xf32> to vector<1x4x16x16xf32>
    tpu.vector_store %arg7[%c0_106, %c0_107, %c0_108, %c0_109], %84 {strides = array<i32>} : memref<2x4x16x16xf32, #tpu.memory_space<vmem>>, vector<1x4x16x16xf32>,
    %85 = vector.extract_strided_slice %74 {offsets = [0, 0, 1], sizes = [4, 16, 16], strides = [1, 1, 1]} : vector<4x16x18xf32> to vector<4x16x16xf32>
    %c0_110 = arith.constant 0 : index
    %c0_111 = arith.constant 0 : index
    %c4 = arith.constant 4 : index
    %c0_112 = arith.constant 0 : index
    %c0_113 = arith.constant 0 : index
    %c0_114 = arith.constant 0 : index
    %86 = vector.load %arg5[%c0_110, %c0_111, %c4, %c0_112, %c0_113, %c0_114] : memref<1x1x9x4x16x16xf32, #tpu.memory_space<vmem>>, vector<1x1x1x4x16x16xf32>
    %87 = vector.shape_cast %86 : vector<1x1x1x4x16x16xf32> to vector<4x16x16xf32>
    %c0_115 = arith.constant 0 : index
    %c0_116 = arith.constant 0 : index
    %c0_117 = arith.constant 0 : index
    %c0_118 = arith.constant 0 : index
    %88 = vector.load %arg7[%c0_115, %c0_116, %c0_117, %c0_118] : memref<2x4x16x16xf32, #tpu.memory_space<vmem>>, vector<1x4x16x16xf32>
    %89 = vector.shape_cast %88 : vector<1x4x16x16xf32> to vector<4x16x16xf32>
    %90 = arith.mulf %85, %87 : vector<4x16x16xf32>
    %91 = arith.addf %89, %90 : vector<4x16x16xf32>
    %c0_119 = arith.constant 0 : index
    %c0_120 = arith.constant 0 : index
    %c0_121 = arith.constant 0 : index
    %c0_122 = arith.constant 0 : index
    %92 = vector.load %arg7[%c0_119, %c0_120, %c0_121, %c0_122] : memref<2x4x16x16xf32, #tpu.memory_space<vmem>>, vector<1x4x16x16xf32>
    %93 = vector.shape_cast %92 : vector<1x4x16x16xf32> to vector<4x16x16xf32>
    %94 = vector.shape_cast %91 : vector<4x16x16xf32> to vector<1x4x16x16xf32>
    tpu.vector_store %arg7[%c0_119, %c0_120, %c0_121, %c0_122], %94 {strides = array<i32>} : memref<2x4x16x16xf32, #tpu.memory_space<vmem>>, vector<1x4x16x16xf32>,
    %95 = vector.extract_strided_slice %74 {offsets = [0, 0, 2], sizes = [4, 16, 16], strides = [1, 1, 1]} : vector<4x16x18xf32> to vector<4x16x16xf32>
    %c0_123 = arith.constant 0 : index
    %c0_124 = arith.constant 0 : index
    %c5 = arith.constant 5 : index
    %c0_125 = arith.constant 0 : index
    %c0_126 = arith.constant 0 : index
    %c0_127 = arith.constant 0 : index
    %96 = vector.load %arg5[%c0_123, %c0_124, %c5, %c0_125, %c0_126, %c0_127] : memref<1x1x9x4x16x16xf32, #tpu.memory_space<vmem>>, vector<1x1x1x4x16x16xf32>
    %97 = vector.shape_cast %96 : vector<1x1x1x4x16x16xf32> to vector<4x16x16xf32>
    %c0_128 = arith.constant 0 : index
    %c0_129 = arith.constant 0 : index
    %c0_130 = arith.constant 0 : index
    %c0_131 = arith.constant 0 : index
    %98 = vector.load %arg7[%c0_128, %c0_129, %c0_130, %c0_131] : memref<2x4x16x16xf32, #tpu.memory_space<vmem>>, vector<1x4x16x16xf32>
    %99 = vector.shape_cast %98 : vector<1x4x16x16xf32> to vector<4x16x16xf32>
    %100 = arith.mulf %95, %97 : vector<4x16x16xf32>
    %101 = arith.addf %99, %100 : vector<4x16x16xf32>
    %c0_132 = arith.constant 0 : index
    %c0_133 = arith.constant 0 : index
    %c0_134 = arith.constant 0 : index
    %c0_135 = arith.constant 0 : index
    %102 = vector.load %arg7[%c0_132, %c0_133, %c0_134, %c0_135] : memref<2x4x16x16xf32, #tpu.memory_space<vmem>>, vector<1x4x16x16xf32>
    %103 = vector.shape_cast %102 : vector<1x4x16x16xf32> to vector<4x16x16xf32>
    %104 = vector.shape_cast %101 : vector<4x16x16xf32> to vector<1x4x16x16xf32>
    tpu.vector_store %arg7[%c0_132, %c0_133, %c0_134, %c0_135], %104 {strides = array<i32>} : memref<2x4x16x16xf32, #tpu.memory_space<vmem>>, vector<1x4x16x16xf32>,
    %c0_136 = arith.constant 0 : index
    %c0_137 = arith.constant 0 : index
    %c1_138 = arith.constant 1 : index
    %105 = arith.index_cast %5 : i32 to index
    %c1_139 = arith.constant 1 : index
    %c0_140 = arith.constant 0 : index
    %106 = vector.load %arg4[%c0_136, %c0_137, %c1_138, %105, %c1_139, %c0_140] : memref<1x1x2x10x18x18xf32, #tpu.memory_space<vmem>>, vector<1x1x1x4x16x18xf32>
    %107 = vector.shape_cast %106 : vector<1x1x1x4x16x18xf32> to vector<4x16x18xf32>
    %108 = vector.extract_strided_slice %107 {offsets = [0, 0, 0], sizes = [4, 16, 16], strides = [1, 1, 1]} : vector<4x16x18xf32> to vector<4x16x16xf32>
    %c0_141 = arith.constant 0 : index
    %c0_142 = arith.constant 0 : index
    %c3_143 = arith.constant 3 : index
    %c0_144 = arith.constant 0 : index
    %c0_145 = arith.constant 0 : index
    %c0_146 = arith.constant 0 : index
    %109 = vector.load %arg5[%c0_141, %c0_142, %c3_143, %c0_144, %c0_145, %c0_146] : memref<1x1x9x4x16x16xf32, #tpu.memory_space<vmem>>, vector<1x1x1x4x16x16xf32>
    %110 = vector.shape_cast %109 : vector<1x1x1x4x16x16xf32> to vector<4x16x16xf32>
    %c1_147 = arith.constant 1 : index
    %c0_148 = arith.constant 0 : index
    %c0_149 = arith.constant 0 : index
    %c0_150 = arith.constant 0 : index
    %111 = vector.load %arg7[%c1_147, %c0_148, %c0_149, %c0_150] : memref<2x4x16x16xf32, #tpu.memory_space<vmem>>, vector<1x4x16x16xf32>
    %112 = vector.shape_cast %111 : vector<1x4x16x16xf32> to vector<4x16x16xf32>
    %113 = arith.mulf %108, %110 : vector<4x16x16xf32>
    %114 = arith.addf %112, %113 : vector<4x16x16xf32>
    %c1_151 = arith.constant 1 : index
    %c0_152 = arith.constant 0 : index
    %c0_153 = arith.constant 0 : index
    %c0_154 = arith.constant 0 : index
    %115 = vector.load %arg7[%c1_151, %c0_152, %c0_153, %c0_154] : memref<2x4x16x16xf32, #tpu.memory_space<vmem>>, vector<1x4x16x16xf32>
    %116 = vector.shape_cast %115 : vector<1x4x16x16xf32> to vector<4x16x16xf32>
    %117 = vector.shape_cast %114 : vector<4x16x16xf32> to vector<1x4x16x16xf32>
    tpu.vector_store %arg7[%c1_151, %c0_152, %c0_153, %c0_154], %117 {strides = array<i32>} : memref<2x4x16x16xf32, #tpu.memory_space<vmem>>, vector<1x4x16x16xf32>,
    %118 = vector.extract_strided_slice %107 {offsets = [0, 0, 1], sizes = [4, 16, 16], strides = [1, 1, 1]} : vector<4x16x18xf32> to vector<4x16x16xf32>
    %c0_155 = arith.constant 0 : index
    %c0_156 = arith.constant 0 : index
    %c4_157 = arith.constant 4 : index
    %c0_158 = arith.constant 0 : index
    %c0_159 = arith.constant 0 : index
    %c0_160 = arith.constant 0 : index
    %119 = vector.load %arg5[%c0_155, %c0_156, %c4_157, %c0_158, %c0_159, %c0_160] : memref<1x1x9x4x16x16xf32, #tpu.memory_space<vmem>>, vector<1x1x1x4x16x16xf32>
    %120 = vector.shape_cast %119 : vector<1x1x1x4x16x16xf32> to vector<4x16x16xf32>
    %c1_161 = arith.constant 1 : index
    %c0_162 = arith.constant 0 : index
    %c0_163 = arith.constant 0 : index
    %c0_164 = arith.constant 0 : index
    %121 = vector.load %arg7[%c1_161, %c0_162, %c0_163, %c0_164] : memref<2x4x16x16xf32, #tpu.memory_space<vmem>>, vector<1x4x16x16xf32>
    %122 = vector.shape_cast %121 : vector<1x4x16x16xf32> to vector<4x16x16xf32>
    %123 = arith.mulf %118, %120 : vector<4x16x16xf32>
    %124 = arith.addf %122, %123 : vector<4x16x16xf32>
    %c1_165 = arith.constant 1 : index
    %c0_166 = arith.constant 0 : index
    %c0_167 = arith.constant 0 : index
    %c0_168 = arith.constant 0 : index
    %125 = vector.load %arg7[%c1_165, %c0_166, %c0_167, %c0_168] : memref<2x4x16x16xf32, #tpu.memory_space<vmem>>, vector<1x4x16x16xf32>
    %126 = vector.shape_cast %125 : vector<1x4x16x16xf32> to vector<4x16x16xf32>
    %127 = vector.shape_cast %124 : vector<4x16x16xf32> to vector<1x4x16x16xf32>
    tpu.vector_store %arg7[%c1_165, %c0_166, %c0_167, %c0_168], %127 {strides = array<i32>} : memref<2x4x16x16xf32, #tpu.memory_space<vmem>>, vector<1x4x16x16xf32>,
    %128 = vector.extract_strided_slice %107 {offsets = [0, 0, 2], sizes = [4, 16, 16], strides = [1, 1, 1]} : vector<4x16x18xf32> to vector<4x16x16xf32>
    %c0_169 = arith.constant 0 : index
    %c0_170 = arith.constant 0 : index
    %c5_171 = arith.constant 5 : index
    %c0_172 = arith.constant 0 : index
    %c0_173 = arith.constant 0 : index
    %c0_174 = arith.constant 0 : index
    %129 = vector.load %arg5[%c0_169, %c0_170, %c5_171, %c0_172, %c0_173, %c0_174] : memref<1x1x9x4x16x16xf32, #tpu.memory_space<vmem>>, vector<1x1x1x4x16x16xf32>
    %130 = vector.shape_cast %129 : vector<1x1x1x4x16x16xf32> to vector<4x16x16xf32>
    %c1_175 = arith.constant 1 : index
    %c0_176 = arith.constant 0 : index
    %c0_177 = arith.constant 0 : index
    %c0_178 = arith.constant 0 : index
    %131 = vector.load %arg7[%c1_175, %c0_176, %c0_177, %c0_178] : memref<2x4x16x16xf32, #tpu.memory_space<vmem>>, vector<1x4x16x16xf32>
    %132 = vector.shape_cast %131 : vector<1x4x16x16xf32> to vector<4x16x16xf32>
    %133 = arith.mulf %128, %130 : vector<4x16x16xf32>
    %134 = arith.addf %132, %133 : vector<4x16x16xf32>
    %c1_179 = arith.constant 1 : index
    %c0_180 = arith.constant 0 : index
    %c0_181 = arith.constant 0 : index
    %c0_182 = arith.constant 0 : index
    %135 = vector.load %arg7[%c1_179, %c0_180, %c0_181, %c0_182] : memref<2x4x16x16xf32, #tpu.memory_space<vmem>>, vector<1x4x16x16xf32>
    %136 = vector.shape_cast %135 : vector<1x4x16x16xf32> to vector<4x16x16xf32>
    %137 = vector.shape_cast %134 : vector<4x16x16xf32> to vector<1x4x16x16xf32>
    tpu.vector_store %arg7[%c1_179, %c0_180, %c0_181, %c0_182], %137 {strides = array<i32>} : memref<2x4x16x16xf32, #tpu.memory_space<vmem>>, vector<1x4x16x16xf32>,
    %c0_183 = arith.constant 0 : index
    %c0_184 = arith.constant 0 : index
    %c0_185 = arith.constant 0 : index
    %138 = arith.index_cast %5 : i32 to index
    %c2_186 = arith.constant 2 : index
    %c0_187 = arith.constant 0 : index
    %139 = vector.load %arg4[%c0_183, %c0_184, %c0_185, %138, %c2_186, %c0_187] : memref<1x1x2x10x18x18xf32, #tpu.memory_space<vmem>>, vector<1x1x1x4x16x18xf32>
    %140 = vector.shape_cast %139 : vector<1x1x1x4x16x18xf32> to vector<4x16x18xf32>
    %141 = vector.extract_strided_slice %140 {offsets = [0, 0, 0], sizes = [4, 16, 16], strides = [1, 1, 1]} : vector<4x16x18xf32> to vector<4x16x16xf32>
    %c0_188 = arith.constant 0 : index
    %c0_189 = arith.constant 0 : index
    %c6 = arith.constant 6 : index
    %c0_190 = arith.constant 0 : index
    %c0_191 = arith.constant 0 : index
    %c0_192 = arith.constant 0 : index
    %142 = vector.load %arg5[%c0_188, %c0_189, %c6, %c0_190, %c0_191, %c0_192] : memref<1x1x9x4x16x16xf32, #tpu.memory_space<vmem>>, vector<1x1x1x4x16x16xf32>
    %143 = vector.shape_cast %142 : vector<1x1x1x4x16x16xf32> to vector<4x16x16xf32>
    %c0_193 = arith.constant 0 : index
    %c0_194 = arith.constant 0 : index
    %c0_195 = arith.constant 0 : index
    %c0_196 = arith.constant 0 : index
    %144 = vector.load %arg7[%c0_193, %c0_194, %c0_195, %c0_196] : memref<2x4x16x16xf32, #tpu.memory_space<vmem>>, vector<1x4x16x16xf32>
    %145 = vector.shape_cast %144 : vector<1x4x16x16xf32> to vector<4x16x16xf32>
    %146 = arith.mulf %141, %143 : vector<4x16x16xf32>
    %147 = arith.addf %145, %146 : vector<4x16x16xf32>
    %c0_197 = arith.constant 0 : index
    %c0_198 = arith.constant 0 : index
    %c0_199 = arith.constant 0 : index
    %c0_200 = arith.constant 0 : index
    %148 = vector.load %arg7[%c0_197, %c0_198, %c0_199, %c0_200] : memref<2x4x16x16xf32, #tpu.memory_space<vmem>>, vector<1x4x16x16xf32>
    %149 = vector.shape_cast %148 : vector<1x4x16x16xf32> to vector<4x16x16xf32>
    %150 = vector.shape_cast %147 : vector<4x16x16xf32> to vector<1x4x16x16xf32>
    tpu.vector_store %arg7[%c0_197, %c0_198, %c0_199, %c0_200], %150 {strides = array<i32>} : memref<2x4x16x16xf32, #tpu.memory_space<vmem>>, vector<1x4x16x16xf32>,
    %151 = vector.extract_strided_slice %140 {offsets = [0, 0, 1], sizes = [4, 16, 16], strides = [1, 1, 1]} : vector<4x16x18xf32> to vector<4x16x16xf32>
    %c0_201 = arith.constant 0 : index
    %c0_202 = arith.constant 0 : index
    %c7 = arith.constant 7 : index
    %c0_203 = arith.constant 0 : index
    %c0_204 = arith.constant 0 : index
    %c0_205 = arith.constant 0 : index
    %152 = vector.load %arg5[%c0_201, %c0_202, %c7, %c0_203, %c0_204, %c0_205] : memref<1x1x9x4x16x16xf32, #tpu.memory_space<vmem>>, vector<1x1x1x4x16x16xf32>
    %153 = vector.shape_cast %152 : vector<1x1x1x4x16x16xf32> to vector<4x16x16xf32>
    %c0_206 = arith.constant 0 : index
    %c0_207 = arith.constant 0 : index
    %c0_208 = arith.constant 0 : index
    %c0_209 = arith.constant 0 : index
    %154 = vector.load %arg7[%c0_206, %c0_207, %c0_208, %c0_209] : memref<2x4x16x16xf32, #tpu.memory_space<vmem>>, vector<1x4x16x16xf32>
    %155 = vector.shape_cast %154 : vector<1x4x16x16xf32> to vector<4x16x16xf32>
    %156 = arith.mulf %151, %153 : vector<4x16x16xf32>
    %157 = arith.addf %155, %156 : vector<4x16x16xf32>
    %c0_210 = arith.constant 0 : index
    %c0_211 = arith.constant 0 : index
    %c0_212 = arith.constant 0 : index
    %c0_213 = arith.constant 0 : index
    %158 = vector.load %arg7[%c0_210, %c0_211, %c0_212, %c0_213] : memref<2x4x16x16xf32, #tpu.memory_space<vmem>>, vector<1x4x16x16xf32>
    %159 = vector.shape_cast %158 : vector<1x4x16x16xf32> to vector<4x16x16xf32>
    %160 = vector.shape_cast %157 : vector<4x16x16xf32> to vector<1x4x16x16xf32>
    tpu.vector_store %arg7[%c0_210, %c0_211, %c0_212, %c0_213], %160 {strides = array<i32>} : memref<2x4x16x16xf32, #tpu.memory_space<vmem>>, vector<1x4x16x16xf32>,
    %161 = vector.extract_strided_slice %140 {offsets = [0, 0, 2], sizes = [4, 16, 16], strides = [1, 1, 1]} : vector<4x16x18xf32> to vector<4x16x16xf32>
    %c0_214 = arith.constant 0 : index
    %c0_215 = arith.constant 0 : index
    %c8 = arith.constant 8 : index
    %c0_216 = arith.constant 0 : index
    %c0_217 = arith.constant 0 : index
    %c0_218 = arith.constant 0 : index
    %162 = vector.load %arg5[%c0_214, %c0_215, %c8, %c0_216, %c0_217, %c0_218] : memref<1x1x9x4x16x16xf32, #tpu.memory_space<vmem>>, vector<1x1x1x4x16x16xf32>
    %163 = vector.shape_cast %162 : vector<1x1x1x4x16x16xf32> to vector<4x16x16xf32>
    %c0_219 = arith.constant 0 : index
    %c0_220 = arith.constant 0 : index
    %c0_221 = arith.constant 0 : index
    %c0_222 = arith.constant 0 : index
    %164 = vector.load %arg7[%c0_219, %c0_220, %c0_221, %c0_222] : memref<2x4x16x16xf32, #tpu.memory_space<vmem>>, vector<1x4x16x16xf32>
    %165 = vector.shape_cast %164 : vector<1x4x16x16xf32> to vector<4x16x16xf32>
    %166 = arith.mulf %161, %163 : vector<4x16x16xf32>
    %167 = arith.addf %165, %166 : vector<4x16x16xf32>
    %c0_223 = arith.constant 0 : index
    %c0_224 = arith.constant 0 : index
    %c0_225 = arith.constant 0 : index
    %c0_226 = arith.constant 0 : index
    %168 = vector.load %arg7[%c0_223, %c0_224, %c0_225, %c0_226] : memref<2x4x16x16xf32, #tpu.memory_space<vmem>>, vector<1x4x16x16xf32>
    %169 = vector.shape_cast %168 : vector<1x4x16x16xf32> to vector<4x16x16xf32>
    %170 = vector.shape_cast %167 : vector<4x16x16xf32> to vector<1x4x16x16xf32>
    tpu.vector_store %arg7[%c0_223, %c0_224, %c0_225, %c0_226], %170 {strides = array<i32>} : memref<2x4x16x16xf32, #tpu.memory_space<vmem>>, vector<1x4x16x16xf32>,
    %c0_227 = arith.constant 0 : index
    %c0_228 = arith.constant 0 : index
    %c1_229 = arith.constant 1 : index
    %171 = arith.index_cast %5 : i32 to index
    %c2_230 = arith.constant 2 : index
    %c0_231 = arith.constant 0 : index
    %172 = vector.load %arg4[%c0_227, %c0_228, %c1_229, %171, %c2_230, %c0_231] : memref<1x1x2x10x18x18xf32, #tpu.memory_space<vmem>>, vector<1x1x1x4x16x18xf32>
    %173 = vector.shape_cast %172 : vector<1x1x1x4x16x18xf32> to vector<4x16x18xf32>
    %174 = vector.extract_strided_slice %173 {offsets = [0, 0, 0], sizes = [4, 16, 16], strides = [1, 1, 1]} : vector<4x16x18xf32> to vector<4x16x16xf32>
    %c0_232 = arith.constant 0 : index
    %c0_233 = arith.constant 0 : index
    %c6_234 = arith.constant 6 : index
    %c0_235 = arith.constant 0 : index
    %c0_236 = arith.constant 0 : index
    %c0_237 = arith.constant 0 : index
    %175 = vector.load %arg5[%c0_232, %c0_233, %c6_234, %c0_235, %c0_236, %c0_237] : memref<1x1x9x4x16x16xf32, #tpu.memory_space<vmem>>, vector<1x1x1x4x16x16xf32>
    %176 = vector.shape_cast %175 : vector<1x1x1x4x16x16xf32> to vector<4x16x16xf32>
    %c1_238 = arith.constant 1 : index
    %c0_239 = arith.constant 0 : index
    %c0_240 = arith.constant 0 : index
    %c0_241 = arith.constant 0 : index
    %177 = vector.load %arg7[%c1_238, %c0_239, %c0_240, %c0_241] : memref<2x4x16x16xf32, #tpu.memory_space<vmem>>, vector<1x4x16x16xf32>
    %178 = vector.shape_cast %177 : vector<1x4x16x16xf32> to vector<4x16x16xf32>
    %179 = arith.mulf %174, %176 : vector<4x16x16xf32>
    %180 = arith.addf %178, %179 : vector<4x16x16xf32>
    %c1_242 = arith.constant 1 : index
    %c0_243 = arith.constant 0 : index
    %c0_244 = arith.constant 0 : index
    %c0_245 = arith.constant 0 : index
    %181 = vector.load %arg7[%c1_242, %c0_243, %c0_244, %c0_245] : memref<2x4x16x16xf32, #tpu.memory_space<vmem>>, vector<1x4x16x16xf32>
    %182 = vector.shape_cast %181 : vector<1x4x16x16xf32> to vector<4x16x16xf32>
    %183 = vector.shape_cast %180 : vector<4x16x16xf32> to vector<1x4x16x16xf32>
    tpu.vector_store %arg7[%c1_242, %c0_243, %c0_244, %c0_245], %183 {strides = array<i32>} : memref<2x4x16x16xf32, #tpu.memory_space<vmem>>, vector<1x4x16x16xf32>,
    %184 = vector.extract_strided_slice %173 {offsets = [0, 0, 1], sizes = [4, 16, 16], strides = [1, 1, 1]} : vector<4x16x18xf32> to vector<4x16x16xf32>
    %c0_246 = arith.constant 0 : index
    %c0_247 = arith.constant 0 : index
    %c7_248 = arith.constant 7 : index
    %c0_249 = arith.constant 0 : index
    %c0_250 = arith.constant 0 : index
    %c0_251 = arith.constant 0 : index
    %185 = vector.load %arg5[%c0_246, %c0_247, %c7_248, %c0_249, %c0_250, %c0_251] : memref<1x1x9x4x16x16xf32, #tpu.memory_space<vmem>>, vector<1x1x1x4x16x16xf32>
    %186 = vector.shape_cast %185 : vector<1x1x1x4x16x16xf32> to vector<4x16x16xf32>
    %c1_252 = arith.constant 1 : index
    %c0_253 = arith.constant 0 : index
    %c0_254 = arith.constant 0 : index
    %c0_255 = arith.constant 0 : index
    %187 = vector.load %arg7[%c1_252, %c0_253, %c0_254, %c0_255] : memref<2x4x16x16xf32, #tpu.memory_space<vmem>>, vector<1x4x16x16xf32>
    %188 = vector.shape_cast %187 : vector<1x4x16x16xf32> to vector<4x16x16xf32>
    %189 = arith.mulf %184, %186 : vector<4x16x16xf32>
    %190 = arith.addf %188, %189 : vector<4x16x16xf32>
    %c1_256 = arith.constant 1 : index
    %c0_257 = arith.constant 0 : index
    %c0_258 = arith.constant 0 : index
    %c0_259 = arith.constant 0 : index
    %191 = vector.load %arg7[%c1_256, %c0_257, %c0_258, %c0_259] : memref<2x4x16x16xf32, #tpu.memory_space<vmem>>, vector<1x4x16x16xf32>
    %192 = vector.shape_cast %191 : vector<1x4x16x16xf32> to vector<4x16x16xf32>
    %193 = vector.shape_cast %190 : vector<4x16x16xf32> to vector<1x4x16x16xf32>
    tpu.vector_store %arg7[%c1_256, %c0_257, %c0_258, %c0_259], %193 {strides = array<i32>} : memref<2x4x16x16xf32, #tpu.memory_space<vmem>>, vector<1x4x16x16xf32>,
    %194 = vector.extract_strided_slice %173 {offsets = [0, 0, 2], sizes = [4, 16, 16], strides = [1, 1, 1]} : vector<4x16x18xf32> to vector<4x16x16xf32>
    %c0_260 = arith.constant 0 : index
    %c0_261 = arith.constant 0 : index
    %c8_262 = arith.constant 8 : index
    %c0_263 = arith.constant 0 : index
    %c0_264 = arith.constant 0 : index
    %c0_265 = arith.constant 0 : index
    %195 = vector.load %arg5[%c0_260, %c0_261, %c8_262, %c0_263, %c0_264, %c0_265] : memref<1x1x9x4x16x16xf32, #tpu.memory_space<vmem>>, vector<1x1x1x4x16x16xf32>
    %196 = vector.shape_cast %195 : vector<1x1x1x4x16x16xf32> to vector<4x16x16xf32>
    %c1_266 = arith.constant 1 : index
    %c0_267 = arith.constant 0 : index
    %c0_268 = arith.constant 0 : index
    %c0_269 = arith.constant 0 : index
    %197 = vector.load %arg7[%c1_266, %c0_267, %c0_268, %c0_269] : memref<2x4x16x16xf32, #tpu.memory_space<vmem>>, vector<1x4x16x16xf32>
    %198 = vector.shape_cast %197 : vector<1x4x16x16xf32> to vector<4x16x16xf32>
    %199 = arith.mulf %194, %196 : vector<4x16x16xf32>
    %200 = arith.addf %198, %199 : vector<4x16x16xf32>
    %c1_270 = arith.constant 1 : index
    %c0_271 = arith.constant 0 : index
    %c0_272 = arith.constant 0 : index
    %c0_273 = arith.constant 0 : index
    %201 = vector.load %arg7[%c1_270, %c0_271, %c0_272, %c0_273] : memref<2x4x16x16xf32, #tpu.memory_space<vmem>>, vector<1x4x16x16xf32>
    %202 = vector.shape_cast %201 : vector<1x4x16x16xf32> to vector<4x16x16xf32>
    %203 = vector.shape_cast %200 : vector<4x16x16xf32> to vector<1x4x16x16xf32>
    tpu.vector_store %arg7[%c1_270, %c0_271, %c0_272, %c0_273], %203 {strides = array<i32>} : memref<2x4x16x16xf32, #tpu.memory_space<vmem>>, vector<1x4x16x16xf32>,
    %c2_i32 = arith.constant 2 : i32
    %204 = arith.cmpi eq, %arg3, %c2_i32 : i32
    %205 = arith.extui %204 : i1 to i32
    %c0_i32_274 = arith.constant 0 : i32
    %206 = arith.cmpi ne, %205, %c0_i32_274 : i32
    scf.if %206 {
      %c0_275 = arith.constant 0 : index
      %c0_276 = arith.constant 0 : index
      %c0_277 = arith.constant 0 : index
      %c0_278 = arith.constant 0 : index
      %207 = vector.load %arg7[%c0_275, %c0_276, %c0_277, %c0_278] : memref<2x4x16x16xf32, #tpu.memory_space<vmem>>, vector<2x4x16x16xf32>
      %c0_279 = arith.constant 0 : index
      %c0_280 = arith.constant 0 : index
      %c0_281 = arith.constant 0 : index
      %c0_282 = arith.constant 0 : index
      %c0_283 = arith.constant 0 : index
      %c0_284 = arith.constant 0 : index
      %208 = vector.load %arg6[%c0_279, %c0_280, %c0_281, %c0_282, %c0_283, %c0_284] : memref<1x1x2x4x16x16xf32, #tpu.memory_space<vmem>>, vector<1x1x2x4x16x16xf32>
      %209 = vector.shape_cast %208 : vector<1x1x2x4x16x16xf32> to vector<2x4x16x16xf32>
      %210 = vector.shape_cast %207 : vector<2x4x16x16xf32> to vector<1x1x2x4x16x16xf32>
      tpu.vector_store %arg6[%c0_279, %c0_280, %c0_281, %c0_282, %c0_283, %c0_284], %210 {strides = array<i32>} : memref<1x1x2x4x16x16xf32, #tpu.memory_space<vmem>>, vector<1x1x2x4x16x16xf32>,
    } else {
    }
    return
  }
  func.func @transform_0(%arg0: i32, %arg1: i32, %arg2: i32, %arg3: i32) -> (i32, i32, i32, i32, i32, i32) {
    %c0_i32 = arith.constant 0 : i32
    %c0_i32_0 = arith.constant 0 : i32
    %c0_i32_1 = arith.constant 0 : i32
    %c0_i32_2 = arith.constant 0 : i32
    %c0_i32_3 = arith.constant 0 : i32
    return %arg0, %arg1, %c0_i32, %c0_i32_0, %c0_i32_1, %c0_i32_2 : i32, i32, i32, i32, i32, i32
  }
  func.func @transform_1(%arg0: i32, %arg1: i32, %arg2: i32, %arg3: i32) -> (i32, i32, i32, i32, i32, i32) {
    %c0_i32 = arith.constant 0 : i32
    %c0_i32_0 = arith.constant 0 : i32
    %c0_i32_1 = arith.constant 0 : i32
    return %arg0, %arg1, %arg3, %arg2, %c0_i32, %c0_i32_0 : i32, i32, i32, i32, i32, i32
  }
  func.func @transform_2(%arg0: i32, %arg1: i32, %arg2: i32, %arg3: i32) -> (i32, i32, i32, i32, i32, i32) {
    %c0_i32 = arith.constant 0 : i32
    %c0_i32_0 = arith.constant 0 : i32
    %c0_i32_1 = arith.constant 0 : i32
    %c0_i32_2 = arith.constant 0 : i32
    return %arg0, %arg1, %c0_i32, %arg2, %c0_i32_0, %c0_i32_1 : i32, i32, i32, i32, i32, i32
  }
}

</mosaic_0001>

<bundles_post_ra>
// kernel: tpu_custom_call.1
= control target key start
LH: loop header
LB: loop body
LE: loop exit
PB: predicated region body
PF: predicated region fallthrough
CT: control target
= control target key end

     0   :  { %s3900_s0 = inlined_call_operand.hbm [shape: f32[2,2,2,10,18,18], index: 0, kind: input, shape index: {}]   ;;  %s3901_s1 = inlined_call_operand.hbm [shape: f32[2,2,27,8,16,16], index: 1, kind: input, shape index: {}]   ;;  %s3902_s2 = inlined_call_operand.hbm [shape: f32[2,2,2,8,16,16], index: 2, kind: output, shape index: {}]  }
   0x1   :  { %3921 = sst [smem:[#allocation32_spill]] %s3900_s0 }
   0x2   :  { %3922 = sst [smem:[#allocation33_spill]] %s3901_s1 }
   0x3   :  { %3923 = sst [smem:[#allocation34_spill]] %s3902_s2 }
   0x4   :  { %7 = vsyncpa [#allocation4], 0 }
   0x5   :  { %9 = vsyncpa [#allocation4 + $0x1], 0 }
   0x6   :  { %10 = vsyncpa [#allocation7], 0 }
   0x7   :  { %12 = vsyncpa [#allocation7 + $0x1], 0 }
   0x8   :  { %13 = vsyncpa [#allocation5], 0 }
   0x9   :  { %15 = vsyncpa [#allocation5 + $0x1], 0  ;;  %s2670_s9 = smov 0   ;;  %s2672_s10 = smov 0  }
   0xa   :  { %s2674_s11 = smov 0   ;;  %s2676_s12 = smov 0  }
   0xb   :  { %s2678_s13 = smov 0   ;;  %s2680_s14 = smov 0  }
   0xc   :  { %s2682_s15 = smov 0   ;;  %s2684_s16 = smov 0  }
   0xd   :  { %s2686_s17 = smov 0   ;;  %s2688_s18 = smov 0  }
   0xe   :  { %s2690_s19 = smov 0   ;;  %s2692_s20 = smov 0  }
   0xf   :  { %s2694_s21 = smov 0   ;;  %s2696_s22 = smov 0  }
  0x10   :  { %s2698_s23 = smov 0   ;;  %s2700_s24 = smov 0  }
  0x11   :  { %s2702_s25 = smov 0   ;;  %s2704_s26 = smov 0  }
  0x12 LB: > { %3924 = sst [smem:[#allocation17_spill]] %s2582_s13  ;;  %s3903_s27 = sadd.s32 4294967295, %s2634_s26   ;;  %s2634_s26 = sphi %s2704_s26, %s21_s26   ;;  %s2630_s25 = sphi %s2702_s25, %s3988_s25   ;;  %s2626_s24 = sphi %s2700_s24, %s3987_s24   ;;  %s2622_s23 = sphi %s2698_s23, %s3973_s23   ;;  %s2618_s22 = sphi %s2696_s22, %s3986_s22   ;;  %s2614_s21 = sphi %s2694_s21, %s3985_s21   ;;  %s2610_s20 = sphi %s2692_s20, %s3984_s20   ;;  %s2606_s19 = sphi %s2690_s19, %s3971_s19   ;;  %s2602_s18 = sphi %s2688_s18, %s3983_s18   ;;  %s2598_s17 = sphi %s2686_s17, %s3982_s17   ;;  %s2594_s16 = sphi %s2684_s16, %s3981_s16   ;;  %s2590_s15 = sphi %s2682_s15, %s3969_s15   ;;  %s2586_s14 = sphi %s2680_s14, %s3980_s14   ;;  %s2582_s13 = sphi %s2678_s13, %s3979_s13   ;;  %s2578_s12 = sphi %s2676_s12, %s3968_s12   ;;  %s2574_s11 = sphi %s2674_s11, %s3978_s11   ;;  %s2570_s10 = sphi %s2672_s10, %s3977_s10   ;;  %s2566_s9 = sphi %s2670_s9, %s3975_s9  }
  0x13   : > { %3925 = sst [smem:[#allocation18_spill]] %s2594_s16  ;;  %s36_s29 = sadd.s32 1, %s2618_s22 }
  0x14   : > { %3926 = sst [smem:[#allocation19_spill]] %s2602_s18  ;;  %s39_s30 = sadd.s32 1, %s2622_s23 }
  0x15   : > { %3927 = sst [smem:[#allocation20_spill]] %s2606_s19  ;;  %p37_p0 = scmp.ge.s32.totalorder %s36_s29, 3 }
  0x16   : > { %3928 = sst [smem:[#allocation21_spill]] %s2610_s20  ;;  %s43_s3 = sadd.s32 1, %s2626_s24 }
  0x17   : > { %3929 = sst [smem:[#allocation22_spill]] %s2614_s21  ;;  %s47_s4 = sadd.s32 1, %s2630_s25 }
  0x18   : > { %3930 = sst [smem:[#allocation23_spill]] %s2622_s23  ;;  %s3990_s29 = smov (%p37_p0, %s36_s29), 0 }
  0x19   : > { %3931 = sst [smem:[#allocation24_spill]] %s3990_s29  ;;  %s3992_s30 = smov (!%p37_p0, %s39_s30), %s2622_s23 }
  0x1a   : > { %p63_p1 = scmp.ne.s32.totalorder %s2598_s17, %s2594_s16  ;;  %p64_p2 = scmp.eq.s32.totalorder %s2634_s26, 0 }
  0x1b   : > { %p41_p3 = scmp.ge.s32.totalorder %s3992_s30, 2  ;;  %p69_p4 = scmp.ne.s32.totalorder %s2594_s16, %s2590_s15 }
  0x1c   : > { %p2777_p5 = por %p64_p2, %p63_p1  ;;  %p2783_p6 = scmp.eq.s32.totalorder %s3903_s27, 0 }
  0x1d   : > { %s3994_s30 = smov (%p41_p3, %s3992_s30), 0  ;;  %s3996_s3 = smov (!%p41_p3, %s43_s3), %s2626_s24 }
  0x1e   : > { %3934 = sst [smem:[#allocation25_spill]] %s3994_s30  ;;  %p2792_p7 = por %p2783_p6, %p69_p4 }
  0x1f   : > { %s82_s15 = ssub.s32 %s2618_s22, %s3990_s29  ;;  %p45_p8 = scmp.ge.s32.totalorder %s3996_s3, 2 }
  0x20   : > { %s3935_s8 = scalar_select %p2792_p7, 1, 0 }
  0x21   : > { %s84_s28 = ssub.s32 %s2622_s23, %s3994_s30  ;;  %s88_s5 = sadd.s32 1, %s2586_s14 }
  0x22   : > { %3936 = sst [smem:[#allocation26_spill]] %s3935_s8  ;;  %p95_p9 = scmp.ne.s32.totalorder %s2586_s14, %s2582_s13 }
  0x23   : > { %s3998_s3 = smov (%p45_p8, %s3996_s3), 0  ;;  %s4000_s4 = smov (!%p45_p8, %s47_s4), %s2630_s25 }
  0x24   : > { %3937 = sst [smem:[#allocation27_spill]] %s3998_s3  ;;  %s52_s27 = ssub.s32 %s2626_s24, %s3998_s3 }
  0x25   : > { %p2810_p10 = por %p95_p9, %p64_p2  ;;  %p49_p11 = scmp.ge.s32.totalorder %s4000_s4, 2 }
  0x26   : > { %p101_p12 = scmp.ne.s32.totalorder %s2582_s13, %s2578_s12  ;;  %s118_s29 = sadd.s32 1, %s2574_s11 }
  0x27   : > { %p128_p13 = scmp.ne.s32.totalorder %s2574_s11, %s2570_s10  ;;  %s4002_s4 = smov (%p49_p11, %s4000_s4), 0 }
  0x28   : > { %3939 = sst [smem:[#allocation28_spill]] %s4002_s4  ;;  %p2823_p0 = por %p101_p12, %p2783_p6 }
  0x29   : > { %s3942_s30 = sadd.s32 4294967295, %s2634_s26   ;;  %s51_s21 = ssub.s32 %s2630_s25, %s4002_s4 }
  0x2a   : > { %s3940_s3 = scalar_select %p2823_p0, 1, 0 }
  0x2b   : > { %p129_p1 = scmp.eq.s32.totalorder %s3942_s30, 23  ;;  %p134_p2 = scmp.ne.s32.totalorder %s2570_s10, %s2566_s9 }
  0x2c   : > { %3941 = sst [smem:[#allocation29_spill]] %s3940_s3  ;;  %s53_s12 = sor.u32 %s52_s27, %s51_s21 }
  0x2d   : > { %p2833_p3 = por %p129_p1, %p128_p13  ;;  %p54_p4 = scmp.eq.s32.totalorder %s53_s12, 0 }
  0x2e   : > { %s83_s19 = sor.u32 %s82_s15, %s53_s12  ;;  %s115_s18 = sor.u32 %s84_s28, %s53_s12 }
  0x2f   : > { %s3943_s20 = scalar_select %p2833_p3, 1, 0 }
  0x30   : > { %s85_s7 = sor.u32 %s84_s28, %s83_s19  ;;  %s3944_s13 = sadd.s32 1, %s2598_s17 }
  0x31   : > { %s2840_s8 = scalar_select %p54_p4, %s2598_s17, %s3944_s13  }
  0x32   : > { %p86_p6 = scmp.eq.s32.totalorder %s85_s7, 0  ;;  %p116_p8 = scmp.eq.s32.totalorder %s115_s18, 0 }
  0x33   : > { %3945 = sst [smem:[#allocation30_spill]] %s2840_s8  ;;  %s3946_s3 = sadd.s32 4294967294, %s2634_s26  }
  0x34   : > { %p135_p9 = scmp.eq.s32.totalorder %s3946_s3, 23  ;;  %p2081_p12 = scmp.ge.s32.totalorder %s2634_s26, 24 }
  0x35   : > { %s2845_s16 = scalar_select %p86_p6, %s2586_s14, %s88_s5  }
  0x36   : > { %s2848_s30 = scalar_select %p116_p8, %s2574_s11, %s118_s29  }
  0x37   : > { %p2853_p11 = por %p135_p9, %p134_p2  ;;  %151 = sbr.rel (%p2081_p12) target bundleno = 106 (0x6a), region = 16 }
  0x38   : > { %s155_s13 = sand.u32 (!%p2081_p12), 1, %s2598_s17   ;;  %s2259_s18 = smul.u32 (!%p2081_p12), 60, %s2626_s24 }
  0x39   : > { %s3947_s21 = scalar_select %p2853_p11, 1, 0 }
  0x3a   : > { %s2258_s19 = smul.u32 (!%p2081_p12), 480, %s155_s13  ;;  %s3948_s0 = sld [smem:[#allocation32_spill]] (!%p2081_p12) }
  0x3b   : > { %s2260_s27 = smul.u32 (!%p2081_p12), 120, %s2630_s25  ;;  %s2868_s4 = scalar_lea.sflag (!%p2081_p12), [#allocation4], %s155_s13 }
  0x3c   : > { %s159_s3 = scalar_lea.vmem (!%p2081_p12), [#allocation3], %s2258_s19 }
  0x3d   : > { %s165_s28 = sadd.s32 (!%p2081_p12), %s2260_s27, %s2259_s18  ;;  %s168_s29 = sshll.u32 (!%p2081_p12), %s159_s3, 4  ;;  %s2861_s29 = int_to_ptr.vmem [resolvable:$true] %s168_s29 }
  0x3e   : > { %s2082_s5 = sshll.u32 %s165_s28, 7 }
  0x40   : > { %s2866_s7 = scalar_lea.hbm %s3948_s0, %s2082_s5  ;;  %s2456_s27 = scalar_lea.hbm %s3948_s0, 30720 }
  0x41   : > { %s2452_s8 = scalar_lea.hbm %s2866_s7, 7680  ;;  %p2457_p4 = scmp.lt.u32.totalorder %s2866_s7, %s3948_s0 }
  0x42   : > { %p2453_p13 = scmp.ne.s32.totalorder %s2866_s7, %s2452_s8  ;;  %p2458_p6 = scmp.lt.u32.totalorder %s2456_s27, %s2452_s8 }
  0x43   : > { %p2460_p9 = scmp.lt.u32.totalorder %s2452_s8, %s2866_s7 }
  0x44   : > { %p2454_p1 = pnand %p2453_p13, %p2777_p5  ;;  %p2459_p8 = por %p2458_p6, %p2457_p4 }
  0x46   : > { %p2455_p2 = pneg %p2454_p1  ;;  %p2461_p12 = por %p2460_p9, %p2459_p8 }
  0x48   : > { %p2462_p11 = pnand %p2461_p12, %p2455_p2 }
  0x4a   : > { %2465 = shalt.err (!%p2462_p11)
}
  0x4b   : > { %s2466_s13 = scalar_lea.vmem %s2861_s29, 7680  ;;  %s2636_s5 = smov [#allocation3]  }
  0x4c   : > { %p2467_p13 = scmp.ne.s32.totalorder %s2861_s29, %s2466_s13  ;;  %s2470_s15 = sshll.u32 %s2636_s5, 4  ;;  %s2471_s15 = int_to_ptr.vmem [resolvable:$false] %s2470_s15 }
  0x4d   : > { %s2472_s12 = scalar_lea.vmem %s2471_s15, 15360  ;;  %p2473_p0 = scmp.lt.s32.totalorder %s2861_s29, %s2471_s15 }
  0x4e   : > { %p2468_p1 = pnand %p2467_p13, %p2777_p5  ;;  %p2474_p7 = scmp.lt.s32.totalorder %s2472_s12, %s2466_s13 }
  0x50   : > { %p2469_p3 = pneg %p2468_p1  ;;  %p2475_p4 = por %p2474_p7, %p2473_p0 }
  0x52   : > { %p2476_p6 = pnand %p2475_p4, %p2469_p3 }
  0x54   : > { %2479 = shalt.err (!%p2476_p6)
}
  0x55   : > { %s2637_s8 = smov 128   ;;  %s2638_s18 = smov 8  }
  0x56   : > { %2266 = dma.hbm_to_vmem [thread:$0]  (%p2777_p5), %s2866_s7, 7680, %s2861_s29, %s2868_s4, %s2637_s8, %s2637_s8, %s2638_s18  }
  0x57   : > { %s178_s19 = sand.u32 1, %s2586_s14   ;;  %s2255_s28 = sshll.u32 %s2622_s23, 3 }
  0x58   : > { %s2261_s27 = smul.u32 576, %s178_s19  ;;  %s2639_s7 = smov 2048  }
  0x59   : > { %s2256_s3 = smul.u32 144, %s2618_s22  ;;  %2268 = sst [smem:[#allocation10]] (%p2810_p10), %s2639_s7 }
  0x5a   : > { %s2262_s13 = smul.u32 432, %s2626_s24  ;;  %s182_s4 = scalar_lea.vmem [#allocation6], %s2261_s27 }
  0x5b   : > { %s190_s5 = sadd.s32 %s2256_s3, %s2255_s28  ;;  %s2263_s15 = smul.u32 864, %s2630_s25 }
  0x5c   : > { %s192_s6 = sadd.s32 %s2262_s13, %s190_s5  ;;  %s209_s29 = sshll.u32 %s182_s4, 4  ;;  %s210_s29 = int_to_ptr.vmem [resolvable:$true] %s209_s29 }
  0x5d   : > { %s194_s12 = sadd.s32 %s2263_s15, %s192_s6  ;;  %s2640_s18 = smov 1024  }
  0x5e   : > { %s2267_s8 = scalar_select %p2810_p10, [#allocation0], [#allocation13] }
  0x5f   : > { %2269 = sst [smem:[#allocation10 + $0x1]] (%p2810_p10), %s2640_s18  ;;  %s2641_s23 = smov 8  }
  0x60   : > { %s201_s0 = sld [smem:[%s2267_s8]]   ;;  %s2086_s28 = sshll.u32 %s194_s12, 7 }
  0x61   : > { %2270 = sst [smem:[#allocation10 + $0x2]] (%p2810_p10), %s2641_s23  ;;  %s2642_s3 = smov 128  }
  0x62   : > { %2273 = sst [smem:[#allocation10 + $0x5]] (%p2810_p10), %s2641_s23  ;;  %s3949_s1 = sld [smem:[#allocation33_spill]] }
  0x63   : > { %2271 = sst [smem:[#allocation10 + $0x3]] (%p2810_p10), %s2642_s3  ;;  %s179_s4 = scalar_lea.sflag [#allocation7], %s178_s19 }
  0x64   : > { %2272 = sst [smem:[#allocation10 + $0x4]] (%p2810_p10), %s2642_s3  ;;  %s2643_s7 = smov [#allocation9]  }
  0x66   : > { %s2087_s15 = sshll.u32 %s201_s0, 26 }
  0x67   : > { %s2088_s6 = sadd.s32 134217728, %s2087_s15 }
  0x68   : > { %s196_s5 = scalar_lea.hbm %s3949_s1, %s2086_s28 }
  0x69   : > { %2274 = dma.general (%p2810_p10), %s196_s5, 9216, %s210_s29, %s179_s4, %s2643_s7, [#allocation10], %s2088_s6, 0  }
  0x6a PF: > { %p2089_p5 = scmp.ge.s32.totalorder %s2634_s26, 1  ;;  %p230_p7 = scmp.lt.s32.totalorder %s2634_s26, 25 }
  0x6c   : > { %p231_p0 = pnand %p2089_p5, %p230_p7 }
  0x6e   : > { %234 = sbr.rel (%p231_p0) target bundleno = 1188 (0x4a4), region = 28 }
  0x75   : > { %s3950_s23 = sld [smem:[#allocation18_spill]]  ;;  %s3951_s12 = sld [smem:[#allocation26_spill]] }
  0x7b   : > { %s236_s8 = sand.u32 1, %s3950_s23   ;;  %p3952_p3 = scmp.ne.s32.totalorder %s3951_s12, 0 }
  0x7c   : > { %s2919_s18 = smul.u32 480, %s236_s8  ;;  %s237_s28 = scalar_lea.sflag [#allocation4], %s236_s8 }
  0x7e   : > { %s240_s0 = scalar_lea.vmem [#allocation3], %s2919_s18 }
  0x7f   : > { %2553 = dma.done.wait (%p3952_p3), %s237_s28, 7680  }
  0x80   : > { %2555 = vsyncadd (%p3952_p3), %s237_s28, 4294959616  ;;  %s3953_s2 = sld [smem:[#allocation17_spill]]  ;;  %s3954_s19 = sld [smem:[#allocation29_spill]] }
  0x86   : > { %s245_s29 = sand.u32 1, %s3953_s2   ;;  %p3955_p10 = scmp.ne.s32.totalorder %s3954_s19, 0 }
  0x87   : > { %s2265_s3 = smul.u32 576, %s245_s29  ;;  %s246_s27 = scalar_lea.sflag [#allocation7], %s245_s29 }
  0x89   : > { %s2927_s13 = scalar_lea.vmem [#allocation6], %s2265_s3 }
  0x8a   : > { %2557 = dma.done.wait (%p3955_p10), %s246_s27, 9216  }
  0x8b   : > { %2559 = vsyncadd (%p3955_p10), %s246_s27, 4294958080  ;;  %s272_s5 = sand.u32 1, %s2570_s10   ;;  %s3956_s4 = sld [smem:[#allocation19_spill]] }
  0x8c   : > { %s2090_s15 = sshll.u32 %s272_s5, 7 }
  0x8d   : > { %s2936_s6 = scalar_lea.vmem [#allocation8], %s2090_s15 }
  0x91   : > { %p2091_p11 = scmp.ne.s32.totalorder %s3956_s4, 0 }
  0x92   : > { %vm282_vm0 = vcmask (!%p2091_p11), 130048   ;;  %v2644_v0 = vmov (!%p2091_p11), 0.0  }
  0x93   : > { %281 = sbr.rel (%p2091_p11) target bundleno = 155 (0x9b), region = 40  ;;  %283 = vst.msk [vmem:[#allocation2] sm:$0xff] (!%p2091_p11), %vm282_vm0, %v2644_v0  ;;  %284 = vst.msk [vmem:[#allocation2 + $0x8] sm:$0xff] (!%p2091_p11), %vm282_vm0, %v2644_v0 }
  0x94   : > { %285 = vst.msk [vmem:[#allocation2 + $0x10] sm:$0xff] (!%p2091_p11), %vm282_vm0, %v2644_v0  ;;  %286 = vst.msk [vmem:[#allocation2 + $0x18] sm:$0xff] (!%p2091_p11), %vm282_vm0, %v2644_v0 }
  0x95   : > { %287 = vst.msk [vmem:[#allocation2 + $0x20] sm:$0xff] (!%p2091_p11), %vm282_vm0, %v2644_v0  ;;  %288 = vst.msk [vmem:[#allocation2 + $0x28] sm:$0xff] (!%p2091_p11), %vm282_vm0, %v2644_v0 }
  0x96   : > { %289 = vst.msk [vmem:[#allocation2 + $0x30] sm:$0xff] (!%p2091_p11), %vm282_vm0, %v2644_v0  ;;  %290 = vst.msk [vmem:[#allocation2 + $0x38] sm:$0xff] (!%p2091_p11), %vm282_vm0, %v2644_v0 }
  0x97   : > { %291 = vst.msk [vmem:[#allocation2 + $0x40] sm:$0xff] (!%p2091_p11), %vm282_vm0, %v2644_v0  ;;  %292 = vst.msk [vmem:[#allocation2 + $0x48] sm:$0xff] (!%p2091_p11), %vm282_vm0, %v2644_v0 }
  0x98   : > { %293 = vst.msk [vmem:[#allocation2 + $0x50] sm:$0xff] (!%p2091_p11), %vm282_vm0, %v2644_v0  ;;  %294 = vst.msk [vmem:[#allocation2 + $0x58] sm:$0xff] (!%p2091_p11), %vm282_vm0, %v2644_v0 }
  0x99   : > { %295 = vst.msk [vmem:[#allocation2 + $0x60] sm:$0xff] (!%p2091_p11), %vm282_vm0, %v2644_v0  ;;  %296 = vst.msk [vmem:[#allocation2 + $0x68] sm:$0xff] (!%p2091_p11), %vm282_vm0, %v2644_v0 }
  0x9a   : > { %297 = vst.msk [vmem:[#allocation2 + $0x70] sm:$0xff] %vm282_vm0, %v2644_v0  ;;  %298 = vst.msk [vmem:[#allocation2 + $0x78] sm:$0xff] %vm282_vm0, %v2644_v0 }
  0x9b PF: > { %v2093_v1 = vld [vmem:[%s2927_s13 + $0x40] sm:$0xff]  ;;  %v2095_v2 = vld [vmem:[%s2927_s13 + $0x50] sm:$0xff]  ;;  %s2645_s7 = smov 1   ;;  %v2094_v3 = vld [vmem:[%s2927_s13 + $0x48] sm:$0xff]  ;;  %s2646_s23 = smov 2   ;;  %vm343_vm1 = vcmask 130048  }
  0x9c   : > { %377 = vrot.lane.b32.xlu0 %v2093_v1, %s2645_s7  ;;  %381 = vrot.lane.b32.xlu1 %v2095_v2, %s2645_s7  ;;  %v2096_v4 = vld [vmem:[%s2927_s13 + $0x58] sm:$0xff]  ;;  %v2097_v5 = vld [vmem:[%s2927_s13 + $0x60] sm:$0xff]  ;;  %s3957_s12 = sld [smem:[#allocation20_spill]]  ;;  %s3958_s8 = sld [smem:[#allocation19_spill]]  ;;  %v321_v32 = vld [vmem:[#allocation2 + $0x10] sm:$0xff] }
  0x9d   : > { %v2098_v6 = vld [vmem:[%s2927_s13 + $0x68] sm:$0xff]  ;;  %v2099_v7 = vld [vmem:[%s2927_s13 + $0x70] sm:$0xff]  ;;  %v2100_v8 = vld [vmem:[%s2927_s13 + $0x78] sm:$0xff]  ;;  %s2647_s18 = smov 127  }
  0x9e   : > { %v2101_v9 = vld [vmem:[%s2927_s13 + $0x80] sm:$0xff]  ;;  %v2102_v10 = vld [vmem:[%s2927_s13 + $0x88] sm:$0xff]  ;;  %v2103_v11 = vld [vmem:[%s2927_s13 + $0x90] sm:$0xff] }
  0x9f   : > { %v2104_v12 = vld [vmem:[%s2927_s13 + $0x98] sm:$0xff]  ;;  %v2105_v13 = vld [vmem:[%s2927_s13 + $0xa0] sm:$0xff]  ;;  %v2106_v14 = vld [vmem:[%s2927_s13 + $0xa8] sm:$0xff] }
  0xa0   : > { %379 = vrot.lane.b32.xlu0 %v2094_v3, %s2645_s7  ;;  %383 = vrot.lane.b32.xlu1 %v2096_v4, %s2645_s7  ;;  %v2107_v15 = vld [vmem:[%s2927_s13 + $0xb0] sm:$0xff]  ;;  %v2108_v16 = vld [vmem:[%s2927_s13 + $0xb8] sm:$0xff]  ;;  %v319_v30 = vld [vmem:[#allocation2] sm:$0xff] }
  0xa1   : > { %v311_v17 = vld [vmem:[%s2927_s13] sm:$0xff]  ;;  %v313_v19 = vld [vmem:[%s2927_s13 + $0x10] sm:$0xff]  ;;  %v312_v20 = vld [vmem:[%s2927_s13 + $0x8] sm:$0xff] }
  0xa2   : > { %s2092_s28 = sshll.u32 %s3957_s12, 2  ;;  %v314_v21 = vld [vmem:[%s2927_s13 + $0x18] sm:$0xff]  ;;  %v315_v26 = vld [vmem:[%s2927_s13 + $0x20] sm:$0xff]  ;;  %v316_v27 = vld [vmem:[%s2927_s13 + $0x28] sm:$0xff]  ;;  %p2246_p2 = scmp.ne.s32.totalorder %s3958_s8, 2 }
  0xa3   : > { %s300_s2 = sadd.s32 %s3958_s8, %s2092_s28  ;;  %v317_v28 = vld [vmem:[%s2927_s13 + $0x30] sm:$0xff]  ;;  %v318_v29 = vld [vmem:[%s2927_s13 + $0x38] sm:$0xff]  ;;  %v320_v33 = vld [vmem:[#allocation2 + $0x8] sm:$0xff] }
  0xa4   : > { %385 = vrot.lane.b32.xlu0 %v2097_v5, %s2645_s7  ;;  %387 = vrot.lane.b32.xlu1 %v2098_v6, %s2645_s7  ;;  %s301_s19 = smul.u32 24, %s300_s2  ;;  %v322_v34 = vld [vmem:[#allocation2 + $0x18] sm:$0xff]  ;;  %v323_v41 = vld [vmem:[#allocation2 + $0x20] sm:$0xff]  ;;  %v324_v43 = vld [vmem:[#allocation2 + $0x28] sm:$0xff] }
  0xa5   : > { %v325_v44 = vld [vmem:[#allocation2 + $0x30] sm:$0xff]  ;;  %v326_v45 = vld [vmem:[#allocation2 + $0x38] sm:$0xff]  ;;  %v581_v52 = vld [vmem:[#allocation2 + $0x40] sm:$0xff] }
  0xa6   : > { %s3003_s29 = scalar_lea.vmem %s240_s0, %s301_s19 [#allocation3]  ;;  %v582_v53 = vld [vmem:[#allocation2 + $0x48] sm:$0xff]  ;;  %v583_v63 = vld [vmem:[#allocation2 + $0x50] sm:$0xff]  ;;  %v584_v0 = vld [vmem:[#allocation2 + $0x58] sm:$0xff]  ;;  %s2648_s0 = smov 126  }
  0xa7   : > { %v3007_v18 = vld [vmem:[%s3003_s29] sm:$0xff]  ;;  %v3015_v22 = vld [vmem:[%s3003_s29 + $0x18] sm:$0xff]  ;;  %v3018_v23 = vld [vmem:[%s3003_s29 + $0x8] sm:$0xff] }
  0xa8   : > { %389 = vrot.lane.b32.xlu0 %v2099_v7, %s2645_s7  ;;  %391 = vrot.lane.b32.xlu1 %v2100_v8, %s2645_s7  ;;  %v3021_v24 = vld [vmem:[%s3003_s29 + $0x20] sm:$0xff]  ;;  %v3024_v25 = vld [vmem:[%s3003_s29 + $0x30] sm:$0xff]  ;;  %v327_v31 = vmul.f32 %v311_v17, %v3007_v18  ;;  %v329_v38 = vmul.f32 %v313_v19, %v3015_v22  ;;  %v328_v39 = vmul.f32 %v312_v20, %v3018_v23 }
  0xa9   : > { %v3032_v35 = vld [vmem:[%s3003_s29 + $0x38] sm:$0xff]  ;;  %v3035_v36 = vld [vmem:[%s3003_s29 + $0x48] sm:$0xff]  ;;  %v3038_v37 = vld [vmem:[%s3003_s29 + $0x50] sm:$0xff]  ;;  %v330_v40 = vmul.f32 %v314_v21, %v3021_v24  ;;  %v331_v42 = vmul.f32 %v315_v26, %v3024_v25 }
  0xaa   : > { %v3045_v46 = vld [vmem:[%s3003_s29 + $0xf0] sm:$0xff]  ;;  %v3048_v47 = vld [vmem:[%s3003_s29 + $0xf8] sm:$0xff]  ;;  %v3051_v48 = vld [vmem:[%s3003_s29 + $0x108] sm:$0xff]  ;;  %v332_v49 = vmul.f32 %v316_v27, %v3032_v35  ;;  %v333_v50 = vmul.f32 %v317_v28, %v3035_v36  ;;  %v334_v51 = vmul.f32 %v318_v29, %v3038_v37 }
  0xab   : > { %v3059_v54 = vld [vmem:[%s3003_s29 + $0x110] sm:$0xff]  ;;  %v3062_v55 = vld [vmem:[%s3003_s29 + $0x120] sm:$0xff]  ;;  %v589_v56 = vmul.f32 %v3045_v46, %v311_v17  ;;  %v590_v57 = vmul.f32 %v3048_v47, %v312_v20  ;;  %v591_v58 = vmul.f32 %v3051_v48, %v313_v19  ;;  %v3069_v60 = vld [vmem:[%s3003_s29 + $0x128] sm:$0xff] }
  0xac   : > { %482 = vrot.lane.b32.xlu0 %v2101_v9, %s2646_s23  ;;  %484 = vrot.lane.b32.xlu1 %v2102_v10, %s2646_s23  ;;  %v592_v59 = vmul.f32 %v3059_v54, %v314_v21  ;;  %v3072_v61 = vld [vmem:[%s3003_s29 + $0x138] sm:$0xff]  ;;  %v3075_v62 = vld [vmem:[%s3003_s29 + $0x140] sm:$0xff] }
  0xad   : > { %3959 = vst [vmem:[#allocation31_spill] sm:$0xff] %v3072_v61  ;;  %v597_v17 = vadd.f32 %v589_v56, %v581_v52  ;;  %v598_v19 = vadd.f32 %v590_v57, %v582_v53  ;;  %v599_v20 = vadd.f32 %v591_v58, %v583_v63 }
  0xae   : > { %v600_v21 = vadd.f32 %v592_v59, %v584_v0 }
  0xaf   : > { %605 = vst.msk [vmem:[#allocation2 + $0x40] sm:$0xff] %vm343_vm1, %v597_v17  ;;  %606 = vst.msk [vmem:[#allocation2 + $0x48] sm:$0xff] %vm343_vm1, %v598_v19 }
  0xb0   : > { %486 = vrot.lane.b32.xlu0 %v2103_v11, %s2646_s23  ;;  %488 = vrot.lane.b32.xlu1 %v2104_v12, %s2646_s23  ;;  %607 = vst.msk [vmem:[#allocation2 + $0x50] sm:$0xff] %vm343_vm1, %v599_v20  ;;  %608 = vst.msk [vmem:[#allocation2 + $0x58] sm:$0xff] %vm343_vm1, %v600_v21 }
  0xb4   : > { %490 = vrot.lane.b32.xlu0 %v2105_v13, %s2646_s23  ;;  %492 = vrot.lane.b32.xlu1 %v2106_v14, %s2646_s23 }
  0xb8   : > { %494 = vrot.lane.b32.xlu0 %v2107_v15, %s2646_s23  ;;  %496 = vrot.lane.b32.xlu1 %v2108_v16, %s2646_s23 }
  0xbc   : > { %637 = vrot.lane.b32.xlu0 %v2093_v1, %s2645_s7  ;;  %639 = vrot.lane.b32.xlu1 %v2094_v3, %s2645_s7  ;;  %v585_v1 = vld [vmem:[#allocation2 + $0x60] sm:$0xff]  ;;  %v594_v3 = vmul.f32 %v3069_v60, %v316_v27 }
  0xc0   : > { %641 = vrot.lane.b32.xlu0 %v2095_v2, %s2645_s7  ;;  %643 = vrot.lane.b32.xlu1 %v2096_v4, %s2645_s7  ;;  %v593_v2 = vmul.f32 %v3062_v55, %v315_v26  ;;  %v595_v4 = vmul.f32 %v3072_v61, %v317_v28 }
  0xc2   : > { %v601_v26 = vadd.f32 %v593_v2, %v585_v1 }
  0xc4   : > { %645 = vrot.lane.b32.xlu0 %v2097_v5, %s2645_s7  ;;  %647 = vrot.lane.b32.xlu1 %v2098_v6, %s2645_s7  ;;  %v596_v5 = vmul.f32 %v3075_v62, %v318_v29  ;;  %v335_v6 = vadd.f32 %v327_v31, %v319_v30  ;;  %609 = vst.msk [vmem:[#allocation2 + $0x60] sm:$0xff] %vm343_vm1, %v601_v26 }
  0xc6   : > { %344 = vst.msk [vmem:[#allocation2] sm:$0xff] %vm343_vm1, %v335_v6 }
  0xc8   : > { %649 = vrot.lane.b32.xlu0 %v2099_v7, %s2645_s7  ;;  %651 = vrot.lane.b32.xlu1 %v2100_v8, %s2645_s7  ;;  %v337_v7 = vadd.f32 %v329_v38, %v321_v32  ;;  %v336_v8 = vadd.f32 %v328_v39, %v320_v33 }
  0xca   : > { %345 = vst.msk [vmem:[#allocation2 + $0x8] sm:$0xff] %vm343_vm1, %v336_v8  ;;  %346 = vst.msk [vmem:[#allocation2 + $0x10] sm:$0xff] %vm343_vm1, %v337_v7 }
  0xcc   : > { %741 = vrot.lane.b32.xlu0 %v2101_v9, %s2646_s23  ;;  %743 = vrot.lane.b32.xlu1 %v2102_v10, %s2646_s23  ;;  %v338_v9 = vadd.f32 %v330_v40, %v322_v34  ;;  %v586_v10 = vld [vmem:[#allocation2 + $0x68] sm:$0xff] }
  0xcd   : > { %v602_v27 = vadd.f32 %v594_v3, %v586_v10 }
  0xce   : > { %347 = vst.msk [vmem:[#allocation2 + $0x18] sm:$0xff] %vm343_vm1, %v338_v9 }
  0xcf   : > { %610 = vst.msk [vmem:[#allocation2 + $0x68] sm:$0xff] %vm343_vm1, %v602_v27 }
  0xd0   : > { %745 = vrot.lane.b32.xlu0 %v2103_v11, %s2646_s23  ;;  %747 = vrot.lane.b32.xlu1 %v2104_v12, %s2646_s23  ;;  %v587_v11 = vld [vmem:[#allocation2 + $0x70] sm:$0xff]  ;;  %v588_v12 = vld [vmem:[#allocation2 + $0x78] sm:$0xff] }
  0xd1   : > { %v603_v28 = vadd.f32 %v595_v4, %v587_v11  ;;  %v604_v61 = vadd.f32 %v596_v5, %v588_v12 }
  0xd3   : > { %611 = vst.msk [vmem:[#allocation2 + $0x70] sm:$0xff] %vm343_vm1, %v603_v28  ;;  %612 = vst.msk [vmem:[#allocation2 + $0x78] sm:$0xff] %vm343_vm1, %v604_v61 }
  0xd4   : > { %749 = vrot.lane.b32.xlu0 %v2105_v13, %s2646_s23  ;;  %751 = vrot.lane.b32.xlu1 %v2106_v14, %s2646_s23  ;;  %v339_v13 = vadd.f32 %v331_v42, %v323_v41  ;;  %v340_v14 = vadd.f32 %v332_v49, %v324_v43 }
  0xd6   : > { %348 = vst.msk [vmem:[#allocation2 + $0x20] sm:$0xff] %vm343_vm1, %v339_v13  ;;  %349 = vst.msk [vmem:[#allocation2 + $0x28] sm:$0xff] %vm343_vm1, %v340_v14  ;;  %v3960_v13 = vld [vmem:[#allocation31_spill] sm:$0xff] }
  0xd8   : > { %753 = vrot.lane.b32.xlu0 %v2107_v15, %s2646_s23  ;;  %755 = vrot.lane.b32.xlu1 %v2108_v16, %s2646_s23  ;;  %v341_v15 = vadd.f32 %v333_v50, %v325_v44  ;;  %v342_v16 = vadd.f32 %v334_v51, %v326_v45 }
  0xda   : > { %350 = vst.msk [vmem:[#allocation2 + $0x30] sm:$0xff] %vm343_vm1, %v341_v15  ;;  %351 = vst.msk [vmem:[#allocation2 + $0x38] sm:$0xff] %vm343_vm1, %v342_v16 }
 0x10e   : > { %v378_v29 = vpop.permute.xlu0 %377  ;;  %v382_v30 = vpop.permute.xlu1 %381 }
 0x10f   : > { %v401_v31 = vmul.f32 %v378_v29, %v3007_v18  ;;  %v403_v32 = vmul.f32 %v382_v30, %v3015_v22 }
 0x111   : > { %417 = vrot.lane.b32.xlu0 %v401_v31, %s2647_s18 }
 0x112   : > { %v380_v33 = vpop.permute.xlu0 %379  ;;  %v384_v34 = vpop.permute.xlu1 %383 }
 0x113   : > { %v402_v38 = vmul.f32 %v380_v33, %v3018_v23  ;;  %v404_v39 = vmul.f32 %v384_v34, %v3021_v24  ;;  %v3170_v33 = vld [vmem:[%s2927_s13 + $0x110] sm:$0xff]  ;;  %v3177_v34 = vld [vmem:[%s2927_s13 + $0x118] sm:$0xff] }
 0x115   : > { %419 = vrot.lane.b32.xlu1 %v402_v38, %s2647_s18  ;;  %421 = vrot.lane.b32.xlu0 %v403_v32, %s2647_s18  ;;  %v3187_v38 = vld [vmem:[%s2927_s13 + $0x128] sm:$0xff] }
 0x116   : > { %v386_v40 = vpop.permute.xlu0 %385  ;;  %v388_v41 = vpop.permute.xlu1 %387 }
 0x117   : > { %v405_v42 = vmul.f32 %v386_v40, %v3024_v25  ;;  %v406_v43 = vmul.f32 %v388_v41, %v3032_v35  ;;  %v3197_v40 = vld [vmem:[%s2927_s13 + $0x138] sm:$0xff]  ;;  %v361_v41 = vld [vmem:[#allocation2] sm:$0xff] }
 0x119   : > { %423 = vrot.lane.b32.xlu1 %v404_v39, %s2647_s18  ;;  %425 = vrot.lane.b32.xlu0 %v405_v42, %s2647_s18  ;;  %v3190_v39 = vld [vmem:[%s2927_s13 + $0x130] sm:$0xff] }
 0x11a   : > { %v390_v44 = vpop.permute.xlu0 %389  ;;  %v392_v45 = vpop.permute.xlu1 %391 }
 0x11b   : > { %v407_v49 = vmul.f32 %v390_v44, %v3035_v36  ;;  %v408_v50 = vmul.f32 %v392_v45, %v3038_v37  ;;  %v362_v44 = vld [vmem:[#allocation2 + $0x8] sm:$0xff]  ;;  %v363_v45 = vld [vmem:[#allocation2 + $0x10] sm:$0xff] }
 0x11d   : > { %427 = vrot.lane.b32.xlu1 %v406_v43, %s2647_s18  ;;  %429 = vrot.lane.b32.xlu0 %v407_v49, %s2647_s18 }
 0x11e   : > { %v483_v51 = vpop.permute.xlu0 %482  ;;  %v485_v52 = vpop.permute.xlu1 %484 }
 0x11f   : > { %v506_v53 = vmul.f32 %v483_v51, %v3007_v18  ;;  %v507_v56 = vmul.f32 %v485_v52, %v3018_v23 }
 0x121   : > { %431 = vrot.lane.b32.xlu1 %v408_v50, %s2647_s18  ;;  %522 = vrot.lane.b32.xlu0 %v506_v53, %s2648_s0  ;;  %v364_v53 = vld [vmem:[#allocation2 + $0x18] sm:$0xff] }
 0x122   : > { %v487_v57 = vpop.permute.xlu0 %486  ;;  %v489_v58 = vpop.permute.xlu1 %488 }
 0x123   : > { %v508_v59 = vmul.f32 %v487_v57, %v3015_v22  ;;  %v509_v61 = vmul.f32 %v489_v58, %v3021_v24 }
 0x125   : > { %524 = vrot.lane.b32.xlu1 %v507_v56, %s2648_s0  ;;  %526 = vrot.lane.b32.xlu0 %v508_v59, %s2648_s0  ;;  %v365_v56 = vld [vmem:[#allocation2 + $0x20] sm:$0xff] }
 0x126   : > { %v491_v63 = vpop.permute.xlu0 %490  ;;  %v493_v0 = vpop.permute.xlu1 %492 }
 0x127   : > { %v510_v18 = vmul.f32 %v491_v63, %v3024_v25  ;;  %v511_v23 = vmul.f32 %v493_v0, %v3032_v35  ;;  %v366_v63 = vld [vmem:[#allocation2 + $0x28] sm:$0xff]  ;;  %v367_v0 = vld [vmem:[#allocation2 + $0x30] sm:$0xff] }
 0x129   : > { %528 = vrot.lane.b32.xlu1 %v509_v61, %s2648_s0  ;;  %530 = vrot.lane.b32.xlu0 %v510_v18, %s2648_s0 }
 0x12a   : > { %v495_v1 = vpop.permute.xlu0 %494  ;;  %v497_v2 = vpop.permute.xlu1 %496 }
 0x12b   : > { %v512_v22 = vmul.f32 %v495_v1, %v3035_v36  ;;  %v513_v24 = vmul.f32 %v497_v2, %v3038_v37 }
 0x12d   : > { %532 = vrot.lane.b32.xlu1 %v511_v23, %s2648_s0  ;;  %534 = vrot.lane.b32.xlu0 %v512_v22, %s2648_s0  ;;  %v368_v22 = vld [vmem:[#allocation2 + $0x38] sm:$0xff] }
 0x12e   : > { %v638_v3 = vpop.permute.xlu0 %637  ;;  %v640_v4 = vpop.permute.xlu1 %639 }
 0x12f   : > { %v661_v25 = vmul.f32 %v3045_v46, %v638_v3  ;;  %v662_v35 = vmul.f32 %v3048_v47, %v640_v4 }
 0x131   : > { %536 = vrot.lane.b32.xlu1 %v513_v24, %s2648_s0  ;;  %677 = vrot.lane.b32.xlu0 %v661_v25, %s2647_s18 }
 0x132   : > { %v642_v5 = vpop.permute.xlu0 %641  ;;  %v644_v6 = vpop.permute.xlu1 %643 }
 0x133   : > { %v663_v36 = vmul.f32 %v3051_v48, %v642_v5  ;;  %v664_v37 = vmul.f32 %v3059_v54, %v644_v6  ;;  %v3211_v5 = vld [vmem:[%s3003_s29 + $0x1] sm:$0xff] }
 0x135   : > { %679 = vrot.lane.b32.xlu1 %v662_v35, %s2647_s18  ;;  %681 = vrot.lane.b32.xlu0 %v663_v36, %s2647_s18 }
 0x136   : > { %v646_v7 = vpop.permute.xlu0 %645  ;;  %v648_v8 = vpop.permute.xlu1 %647 }
 0x137   : > { %v665_v9 = vmul.f32 %v3062_v55, %v646_v7  ;;  %v666_v10 = vmul.f32 %v3069_v60, %v648_v8  ;;  %v3214_v8 = vld [vmem:[%s2927_s13 + $0xc0] sm:$0xff] }
 0x139   : > { %683 = vrot.lane.b32.xlu1 %v664_v37, %s2647_s18  ;;  %685 = vrot.lane.b32.xlu0 %v665_v9, %s2647_s18 }
 0x13a   : > { %v650_v11 = vpop.permute.xlu0 %649  ;;  %v652_v12 = vpop.permute.xlu1 %651 }
 0x13b   : > { %v667_v14 = vmul.f32 %v3960_v13, %v650_v11  ;;  %v668_v15 = vmul.f32 %v3075_v62, %v652_v12  ;;  %v846_v11 = vmul.f32 %v3214_v8, %v3211_v5  ;;  %v3221_v12 = vld [vmem:[%s3003_s29 + $0x9] sm:$0xff] }
 0x13d   : > { %687 = vrot.lane.b32.xlu1 %v666_v10, %s2647_s18  ;;  %689 = vrot.lane.b32.xlu0 %v667_v14, %s2647_s18  ;;  %v3227_v14 = vld [vmem:[%s3003_s29 + $0x19] sm:$0xff] }
 0x13e   : > { %v742_v16 = vpop.permute.xlu0 %741  ;;  %v744_v17 = vpop.permute.xlu1 %743 }
 0x13f   : > { %v765_v19 = vmul.f32 %v3045_v46, %v742_v16  ;;  %v766_v20 = vmul.f32 %v3048_v47, %v744_v17 }
 0x141   : > { %691 = vrot.lane.b32.xlu1 %v668_v15, %s2647_s18  ;;  %781 = vrot.lane.b32.xlu0 %v765_v19, %s2648_s0 }
 0x142   : > { %v746_v21 = vpop.permute.xlu0 %745  ;;  %v748_v26 = vpop.permute.xlu1 %747 }
 0x143   : > { %v767_v27 = vmul.f32 %v3051_v48, %v746_v21  ;;  %v768_v28 = vmul.f32 %v3059_v54, %v748_v26 }
 0x145   : > { %783 = vrot.lane.b32.xlu1 %v766_v20, %s2648_s0  ;;  %785 = vrot.lane.b32.xlu0 %v767_v27, %s2648_s0  ;;  %v3230_v20 = vld [vmem:[%s2927_s13 + $0xd0] sm:$0xff] }
 0x146   : > { %v750_v29 = vpop.permute.xlu0 %749  ;;  %v752_v46 = vpop.permute.xlu1 %751 }
 0x147   : > { %v769_v30 = vmul.f32 %v3062_v55, %v750_v29  ;;  %v770_v47 = vmul.f32 %v3069_v60, %v752_v46  ;;  %v3161_v55 = vld [vmem:[%s2927_s13 + $0x100] sm:$0xff]  ;;  %v3167_v60 = vld [vmem:[%s2927_s13 + $0x108] sm:$0xff]  ;;  %v848_v46 = vmul.f32 %v3230_v20, %v3227_v14 }
 0x149   : > { %787 = vrot.lane.b32.xlu1 %v768_v28, %s2648_s0  ;;  %789 = vrot.lane.b32.xlu0 %v769_v30, %s2648_s0  ;;  %v3239_v30 = vld [vmem:[%s3003_s29 + $0x21] sm:$0xff] }
 0x14a   : > { %v754_v48 = vpop.permute.xlu0 %753  ;;  %v756_v31 = vpop.permute.xlu1 %755 }
 0x14b   : > { %v771_v32 = vmul.f32 %v3960_v13, %v754_v48  ;;  %v772_v54 = vmul.f32 %v3075_v62, %v756_v31  ;;  %v3180_v62 = vld [vmem:[%s2927_s13 + $0x120] sm:$0xff]  ;;  %v3224_v13 = vld [vmem:[%s2927_s13 + $0xc8] sm:$0xff]  ;;  %v3245_v48 = vld [vmem:[%s3003_s29 + $0x31] sm:$0xff] }
 0x14c   : > { %v847_v29 = vmul.f32 %v3224_v13, %v3221_v12 }
 0x14d   : > { %791 = vrot.lane.b32.xlu1 %v770_v47, %s2648_s0  ;;  %793 = vrot.lane.b32.xlu0 %v771_v32, %s2648_s0  ;;  %v3242_v47 = vld [vmem:[%s2927_s13 + $0xd8] sm:$0xff] }
 0x151   : > { %795 = vrot.lane.b32.xlu1 %v772_v54, %s2648_s0  ;;  %895 = vrot.lane.b32.xlu0 %v3161_v55, %s2645_s7 }
 0x155   : > { %897 = vrot.lane.b32.xlu1 %v3167_v60, %s2645_s7  ;;  %899 = vrot.lane.b32.xlu0 %v3170_v33, %s2645_s7 }
 0x159   : > { %901 = vrot.lane.b32.xlu1 %v3177_v34, %s2645_s7  ;;  %903 = vrot.lane.b32.xlu0 %v3180_v62, %s2645_s7 }
 0x15d   : > { %905 = vrot.lane.b32.xlu1 %v3187_v38, %s2645_s7  ;;  %907 = vrot.lane.b32.xlu0 %v3190_v39, %s2645_s7 }
 0x161   : > { %909 = vrot.lane.b32.xlu1 %v3197_v40, %s2645_s7 }
 0x183   : > { %v418_v42 = vpop.permute.xlu0 %417 }
 0x184   : > { %v441_v43 = vadd.f32 %v418_v42, %v361_v41  ;;  %v3248_v42 = vld [vmem:[%s2927_s13 + $0xe0] sm:$0xff] }
 0x186   : > { %449 = vst.msk [vmem:[#allocation2] sm:$0xff] %vm343_vm1, %v441_v43 }
 0x187   : > { %v420_v49 = vpop.permute.xlu1 %419  ;;  %v422_v50 = vpop.permute.xlu0 %421 }
 0x188   : > { %v442_v51 = vadd.f32 %v420_v49, %v362_v44  ;;  %v443_v52 = vadd.f32 %v422_v50, %v363_v45  ;;  %v621_v45 = vld [vmem:[#allocation2 + $0x40] sm:$0xff] }
 0x18a   : > { %450 = vst.msk [vmem:[#allocation2 + $0x8] sm:$0xff] %vm343_vm1, %v442_v51  ;;  %451 = vst.msk [vmem:[#allocation2 + $0x10] sm:$0xff] %vm343_vm1, %v443_v52 }
 0x18b   : > { %v424_v57 = vpop.permute.xlu1 %423  ;;  %v426_v58 = vpop.permute.xlu0 %425 }
 0x18c   : > { %v444_v59 = vadd.f32 %v424_v57, %v364_v53  ;;  %v445_v61 = vadd.f32 %v426_v58, %v365_v56  ;;  %v849_v53 = vmul.f32 %v3242_v47, %v3239_v30  ;;  %v850_v56 = vmul.f32 %v3248_v42, %v3245_v48  ;;  %v3258_v57 = vld [vmem:[%s3003_s29 + $0x39] sm:$0xff]  ;;  %v3261_v58 = vld [vmem:[%s2927_s13 + $0xe8] sm:$0xff] }
 0x18d   : > { %v466_v4 = vld [vmem:[#allocation2] sm:$0xff] }
 0x18e   : > { %452 = vst.msk [vmem:[#allocation2 + $0x18] sm:$0xff] %vm343_vm1, %v444_v59  ;;  %453 = vst.msk [vmem:[#allocation2 + $0x20] sm:$0xff] %vm343_vm1, %v445_v61 }
 0x18f   : > { %v428_v18 = vpop.permute.xlu1 %427  ;;  %v430_v23 = vpop.permute.xlu0 %429 }
 0x190   : > { %v446_v1 = vadd.f32 %v428_v18, %v366_v63  ;;  %v447_v2 = vadd.f32 %v430_v23, %v367_v0  ;;  %v3264_v0 = vld [vmem:[%s3003_s29 + $0x49] sm:$0xff] }
 0x191   : > { %v467_v36 = vld [vmem:[#allocation2 + $0x8] sm:$0xff]  ;;  %v468_v37 = vld [vmem:[#allocation2 + $0x10] sm:$0xff] }
 0x192   : > { %454 = vst.msk [vmem:[#allocation2 + $0x28] sm:$0xff] %vm343_vm1, %v446_v1  ;;  %455 = vst.msk [vmem:[#allocation2 + $0x30] sm:$0xff] %vm343_vm1, %v447_v2  ;;  %v3267_v18 = vld [vmem:[%s2927_s13 + $0xf0] sm:$0xff]  ;;  %v622_v2 = vld [vmem:[#allocation2 + $0x48] sm:$0xff] }
 0x193   : > { %v432_v24 = vpop.permute.xlu1 %431  ;;  %v523_v3 = vpop.permute.xlu0 %522 }
 0x194   : > { %v448_v25 = vadd.f32 %v432_v24, %v368_v22  ;;  %v546_v35 = vadd.f32 %v523_v3, %v466_v4  ;;  %v623_v22 = vld [vmem:[#allocation2 + $0x50] sm:$0xff] }
 0x195   : > { %v469_v15 = vld [vmem:[#allocation2 + $0x18] sm:$0xff]  ;;  %v470_v17 = vld [vmem:[#allocation2 + $0x20] sm:$0xff] }
 0x196   : > { %456 = vst.msk [vmem:[#allocation2 + $0x38] sm:$0xff] %vm343_vm1, %v448_v25  ;;  %554 = vst.msk [vmem:[#allocation2] sm:$0xff] %vm343_vm1, %v546_v35  ;;  %v851_v35 = vmul.f32 %v3261_v58, %v3258_v57 }
 0x197   : > { %v525_v6 = vpop.permute.xlu1 %524  ;;  %v527_v7 = vpop.permute.xlu0 %526 }
 0x198   : > { %v547_v9 = vadd.f32 %v525_v6, %v467_v36  ;;  %v548_v10 = vadd.f32 %v527_v7, %v468_v37  ;;  %v852_v6 = vmul.f32 %v3267_v18, %v3264_v0  ;;  %v3278_v7 = vld [vmem:[%s3003_s29 + $0x51] sm:$0xff] }
 0x199   : > { %v471_v31 = vld [vmem:[#allocation2 + $0x28] sm:$0xff]  ;;  %v472_v54 = vld [vmem:[#allocation2 + $0x30] sm:$0xff] }
 0x19a   : > { %555 = vst.msk [vmem:[#allocation2 + $0x8] sm:$0xff] %vm343_vm1, %v547_v9  ;;  %556 = vst.msk [vmem:[#allocation2 + $0x10] sm:$0xff] %vm343_vm1, %v548_v10  ;;  %v3281_v9 = vld [vmem:[%s2927_s13 + $0xf8] sm:$0xff] }
 0x19b   : > { %v529_v16 = vpop.permute.xlu1 %528  ;;  %v531_v19 = vpop.permute.xlu0 %530 }
 0x19c   : > { %v549_v21 = vadd.f32 %v529_v16, %v469_v15  ;;  %v550_v26 = vadd.f32 %v531_v19, %v470_v17  ;;  %v624_v15 = vld [vmem:[#allocation2 + $0x58] sm:$0xff]  ;;  %v625_v16 = vld [vmem:[#allocation2 + $0x60] sm:$0xff] }
 0x19d   : > { %v838_v27 = vld [vmem:[#allocation2] sm:$0xff]  ;;  %v473_v59 = vld [vmem:[#allocation2 + $0x38] sm:$0xff] }
 0x19e   : > { %557 = vst.msk [vmem:[#allocation2 + $0x18] sm:$0xff] %vm343_vm1, %v549_v21  ;;  %558 = vst.msk [vmem:[#allocation2 + $0x20] sm:$0xff] %vm343_vm1, %v550_v26  ;;  %v854_v28 = vadd.f32 %v846_v11, %v838_v27  ;;  %v853_v27 = vmul.f32 %v3281_v9, %v3278_v7 }
 0x19f   : > { %v533_v32 = vpop.permute.xlu1 %532  ;;  %v535_v41 = vpop.permute.xlu0 %534 }
 0x1a0   : > { %v551_v43 = vadd.f32 %v533_v32, %v471_v31  ;;  %v552_v44 = vadd.f32 %v535_v41, %v472_v54  ;;  %862 = vst.msk [vmem:[#allocation2] sm:$0xff] %vm343_vm1, %v854_v28  ;;  %v626_v32 = vld [vmem:[#allocation2 + $0x68] sm:$0xff]  ;;  %v627_v54 = vld [vmem:[#allocation2 + $0x70] sm:$0xff] }
 0x1a1   : > { %v839_v49 = vld [vmem:[#allocation2 + $0x8] sm:$0xff]  ;;  %v840_v50 = vld [vmem:[#allocation2 + $0x10] sm:$0xff] }
 0x1a2   : > { %559 = vst.msk [vmem:[#allocation2 + $0x28] sm:$0xff] %vm343_vm1, %v551_v43  ;;  %560 = vst.msk [vmem:[#allocation2 + $0x30] sm:$0xff] %vm343_vm1, %v552_v44  ;;  %v855_v51 = vadd.f32 %v847_v29, %v839_v49  ;;  %v856_v52 = vadd.f32 %v848_v46, %v840_v50 }
 0x1a3   : > { %v537_v61 = vpop.permute.xlu1 %536  ;;  %v678_v63 = vpop.permute.xlu0 %677 }
 0x1a4   : > { %v553_v23 = vadd.f32 %v537_v61, %v473_v59  ;;  %v701_v1 = vadd.f32 %v678_v63, %v621_v45  ;;  %863 = vst.msk [vmem:[#allocation2 + $0x8] sm:$0xff] %vm343_vm1, %v855_v51  ;;  %864 = vst.msk [vmem:[#allocation2 + $0x10] sm:$0xff] %vm343_vm1, %v856_v52  ;;  %v628_v51 = vld [vmem:[#allocation2 + $0x78] sm:$0xff] }
 0x1a5   : > { %v841_v24 = vld [vmem:[#allocation2 + $0x18] sm:$0xff]  ;;  %v842_v3 = vld [vmem:[#allocation2 + $0x20] sm:$0xff] }
 0x1a6   : > { %561 = vst.msk [vmem:[#allocation2 + $0x38] sm:$0xff] %vm343_vm1, %v553_v23  ;;  %709 = vst.msk [vmem:[#allocation2 + $0x40] sm:$0xff] %vm343_vm1, %v701_v1  ;;  %v857_v4 = vadd.f32 %v849_v53, %v841_v24  ;;  %v858_v25 = vadd.f32 %v850_v56, %v842_v3 }
 0x1a7   : > { %v680_v36 = vpop.permute.xlu1 %679  ;;  %v682_v37 = vpop.permute.xlu0 %681 }
 0x1a8   : > { %v702_v10 = vadd.f32 %v680_v36, %v622_v2  ;;  %v703_v11 = vadd.f32 %v682_v37, %v623_v22  ;;  %865 = vst.msk [vmem:[#allocation2 + $0x18] sm:$0xff] %vm343_vm1, %v857_v4  ;;  %866 = vst.msk [vmem:[#allocation2 + $0x20] sm:$0xff] %vm343_vm1, %v858_v25  ;;  %v3299_v22 = vld [vmem:[%s3003_s29 + $0xf1] sm:$0xff]  ;;  %v3306_v25 = vld [vmem:[%s3003_s29 + $0xf9] sm:$0xff] }
 0x1a9   : > { %v843_v17 = vld [vmem:[#allocation2 + $0x28] sm:$0xff]  ;;  %v844_v19 = vld [vmem:[#allocation2 + $0x30] sm:$0xff]  ;;  %v1104_v4 = vmul.f32 %v3299_v22, %v3214_v8  ;;  %v1105_v8 = vmul.f32 %v3306_v25, %v3224_v13 }
 0x1aa   : > { %710 = vst.msk [vmem:[#allocation2 + $0x48] sm:$0xff] %vm343_vm1, %v702_v10  ;;  %711 = vst.msk [vmem:[#allocation2 + $0x50] sm:$0xff] %vm343_vm1, %v703_v11  ;;  %v859_v21 = vadd.f32 %v851_v35, %v843_v17  ;;  %v860_v26 = vadd.f32 %v852_v6, %v844_v19  ;;  %v3309_v10 = vld [vmem:[%s3003_s29 + $0x109] sm:$0xff] }
 0x1ab   : > { %v684_v28 = vpop.permute.xlu1 %683  ;;  %v686_v29 = vpop.permute.xlu0 %685  ;;  %v1106_v19 = vmul.f32 %v3309_v10, %v3230_v20 }
 0x1ac   : > { %v704_v46 = vadd.f32 %v684_v28, %v624_v15  ;;  %v705_v31 = vadd.f32 %v686_v29, %v625_v16  ;;  %867 = vst.msk [vmem:[#allocation2 + $0x28] sm:$0xff] %vm343_vm1, %v859_v21  ;;  %868 = vst.msk [vmem:[#allocation2 + $0x30] sm:$0xff] %vm343_vm1, %v860_v26  ;;  %v3318_v21 = vld [vmem:[%s3003_s29 + $0x111] sm:$0xff] }
 0x1ad   : > { %v845_v41 = vld [vmem:[#allocation2 + $0x38] sm:$0xff]  ;;  %v725_v53 = vld [vmem:[#allocation2 + $0x40] sm:$0xff] }
 0x1ae   : > { %712 = vst.msk [vmem:[#allocation2 + $0x58] sm:$0xff] %vm343_vm1, %v704_v46  ;;  %713 = vst.msk [vmem:[#allocation2 + $0x60] sm:$0xff] %vm343_vm1, %v705_v31  ;;  %v861_v43 = vadd.f32 %v853_v27, %v845_v41  ;;  %v3321_v46 = vld [vmem:[%s3003_s29 + $0x121] sm:$0xff] }
 0x1af   : > { %v688_v44 = vpop.permute.xlu1 %687  ;;  %v690_v45 = vpop.permute.xlu0 %689 }
 0x1b0   : > { %v706_v49 = vadd.f32 %v688_v44, %v626_v32  ;;  %v707_v50 = vadd.f32 %v690_v45, %v627_v54  ;;  %869 = vst.msk [vmem:[#allocation2 + $0x38] sm:$0xff] %vm343_vm1, %v861_v43  ;;  %v1107_v43 = vmul.f32 %v3318_v21, %v3242_v47  ;;  %v1108_v44 = vmul.f32 %v3321_v46, %v3248_v42 }
 0x1b1   : > { %v726_v63 = vld [vmem:[#allocation2 + $0x48] sm:$0xff]  ;;  %v727_v1 = vld [vmem:[#allocation2 + $0x50] sm:$0xff] }
 0x1b2   : > { %714 = vst.msk [vmem:[#allocation2 + $0x68] sm:$0xff] %vm343_vm1, %v706_v49  ;;  %715 = vst.msk [vmem:[#allocation2 + $0x70] sm:$0xff] %vm343_vm1, %v707_v50 }
 0x1b3   : > { %v692_v52 = vpop.permute.xlu1 %691  ;;  %v782_v56 = vpop.permute.xlu0 %781 }
 0x1b4   : > { %v708_v59 = vadd.f32 %v692_v52, %v628_v51  ;;  %v805_v61 = vadd.f32 %v782_v56, %v725_v53  ;;  %v3331_v51 = vld [vmem:[%s3003_s29 + $0x129] sm:$0xff]  ;;  %v3334_v52 = vld [vmem:[%s3003_s29 + $0x139] sm:$0xff] }
 0x1b5   : > { %v728_v35 = vld [vmem:[#allocation2 + $0x58] sm:$0xff]  ;;  %v729_v36 = vld [vmem:[#allocation2 + $0x60] sm:$0xff] }
 0x1b6   : > { %716 = vst.msk [vmem:[#allocation2 + $0x78] sm:$0xff] %vm343_vm1, %v708_v59  ;;  %813 = vst.msk [vmem:[#allocation2 + $0x40] sm:$0xff] %vm343_vm1, %v805_v61 }
 0x1b7   : > { %v784_v23 = vpop.permute.xlu1 %783  ;;  %v786_v2 = vpop.permute.xlu0 %785 }
 0x1b8   : > { %v806_v24 = vadd.f32 %v784_v23, %v726_v63  ;;  %v807_v3 = vadd.f32 %v786_v2, %v727_v1  ;;  %v1109_v63 = vmul.f32 %v3331_v51, %v3261_v58  ;;  %v1110_v23 = vmul.f32 %v3334_v52, %v3267_v18 }
 0x1b9   : > { %v730_v26 = vld [vmem:[#allocation2 + $0x68] sm:$0xff]  ;;  %v731_v28 = vld [vmem:[#allocation2 + $0x70] sm:$0xff] }
 0x1ba   : > { %814 = vst.msk [vmem:[#allocation2 + $0x48] sm:$0xff] %vm343_vm1, %v806_v24  ;;  %815 = vst.msk [vmem:[#allocation2 + $0x50] sm:$0xff] %vm343_vm1, %v807_v3  ;;  %v3346_v24 = vld [vmem:[%s3003_s29 + $0x141] sm:$0xff] }
 0x1bb   : > { %v788_v6 = vpop.permute.xlu1 %787  ;;  %v790_v37 = vpop.permute.xlu0 %789 }
 0x1bc   : > { %v808_v11 = vadd.f32 %v788_v6, %v728_v35  ;;  %v809_v15 = vadd.f32 %v790_v37, %v729_v36  ;;  %v1111_v36 = vmul.f32 %v3346_v24, %v3281_v9 }
 0x1bd   : > { %v1096_v16 = vld [vmem:[#allocation2 + $0x40] sm:$0xff]  ;;  %v732_v45 = vld [vmem:[#allocation2 + $0x78] sm:$0xff] }
 0x1be   : > { %816 = vst.msk [vmem:[#allocation2 + $0x58] sm:$0xff] %vm343_vm1, %v808_v11  ;;  %817 = vst.msk [vmem:[#allocation2 + $0x60] sm:$0xff] %vm343_vm1, %v809_v15  ;;  %v1112_v17 = vadd.f32 %v1104_v4, %v1096_v16 }
 0x1bf   : > { %v792_v27 = vpop.permute.xlu1 %791  ;;  %v794_v29 = vpop.permute.xlu0 %793 }
 0x1c0   : > { %v810_v31 = vadd.f32 %v792_v27, %v730_v26  ;;  %v811_v32 = vadd.f32 %v794_v29, %v731_v28  ;;  %1120 = vst.msk [vmem:[#allocation2 + $0x40] sm:$0xff] %vm343_vm1, %v1112_v17  ;;  %v3368_v29 = vld [vmem:[%s2927_s13 + $0x140] sm:$0xff] }
 0x1c1   : > { %v1097_v54 = vld [vmem:[#allocation2 + $0x48] sm:$0xff]  ;;  %v1098_v41 = vld [vmem:[#allocation2 + $0x50] sm:$0xff] }
 0x1c2   : > { %818 = vst.msk [vmem:[#allocation2 + $0x68] sm:$0xff] %vm343_vm1, %v810_v31  ;;  %819 = vst.msk [vmem:[#allocation2 + $0x70] sm:$0xff] %vm343_vm1, %v811_v32  ;;  %v1113_v13 = vadd.f32 %v1105_v8, %v1097_v54  ;;  %v1114_v20 = vadd.f32 %v1106_v19, %v1098_v41  ;;  %v3375_v32 = vld [vmem:[%s2927_s13 + $0x148] sm:$0xff]  ;;  %v3378_v54 = vld [vmem:[%s2927_s13 + $0x150] sm:$0xff] }
 0x1c3   : > { %v796_v49 = vpop.permute.xlu1 %795  ;;  %v896_v50 = vpop.permute.xlu0 %895  ;;  %v3385_v41 = vld [vmem:[%s2927_s13 + $0x158] sm:$0xff] }
 0x1c4   : > { %v812_v53 = vadd.f32 %v796_v49, %v732_v45  ;;  %v919_v56 = vmul.f32 %v896_v50, %v3211_v5  ;;  %1121 = vst.msk [vmem:[#allocation2 + $0x48] sm:$0xff] %vm343_vm1, %v1113_v13  ;;  %1122 = vst.msk [vmem:[#allocation2 + $0x50] sm:$0xff] %vm343_vm1, %v1114_v20  ;;  %v3388_v13 = vld [vmem:[%s2927_s13 + $0x160] sm:$0xff]  ;;  %v3395_v20 = vld [vmem:[%s2927_s13 + $0x168] sm:$0xff] }
 0x1c5   : > { %v1099_v59 = vld [vmem:[#allocation2 + $0x58] sm:$0xff]  ;;  %v1100_v47 = vld [vmem:[#allocation2 + $0x60] sm:$0xff] }
 0x1c6   : > { %820 = vst.msk [vmem:[#allocation2 + $0x78] sm:$0xff] %vm343_vm1, %v812_v53  ;;  %935 = vrot.lane.b32.xlu0 %v919_v56, %s2647_s18  ;;  %v1115_v42 = vadd.f32 %v1107_v43, %v1099_v59  ;;  %v1116_v61 = vadd.f32 %v1108_v44, %v1100_v47  ;;  %v3398_v43 = vld [vmem:[%s2927_s13 + $0x170] sm:$0xff]  ;;  %v3405_v44 = vld [vmem:[%s2927_s13 + $0x178] sm:$0xff]  ;;  %v879_v49 = vld [vmem:[#allocation2] sm:$0xff] }
 0x1c7   : > { %v898_v1 = vpop.permute.xlu1 %897  ;;  %v900_v2 = vpop.permute.xlu0 %899  ;;  %v880_v56 = vld [vmem:[#allocation2 + $0x8] sm:$0xff]  ;;  %v881_v59 = vld [vmem:[#allocation2 + $0x10] sm:$0xff] }
 0x1c8   : > { %v920_v3 = vmul.f32 %v898_v1, %v3221_v12  ;;  %v921_v4 = vmul.f32 %v900_v2, %v3227_v14  ;;  %1123 = vst.msk [vmem:[#allocation2 + $0x58] sm:$0xff] %vm343_vm1, %v1115_v42  ;;  %1124 = vst.msk [vmem:[#allocation2 + $0x60] sm:$0xff] %vm343_vm1, %v1116_v61  ;;  %v883_v1 = vld [vmem:[#allocation2 + $0x20] sm:$0xff] }
 0x1c9   : > { %v1101_v35 = vld [vmem:[#allocation2 + $0x68] sm:$0xff]  ;;  %v1102_v6 = vld [vmem:[#allocation2 + $0x70] sm:$0xff] }
 0x1ca   : > { %937 = vrot.lane.b32.xlu1 %v920_v3, %s2647_s18  ;;  %939 = vrot.lane.b32.xlu0 %v921_v4, %s2647_s18  ;;  %v1117_v58 = vadd.f32 %v1109_v63, %v1101_v35  ;;  %v1118_v18 = vadd.f32 %v1110_v23, %v1102_v6  ;;  %v882_v63 = vld [vmem:[#allocation2 + $0x18] sm:$0xff]  ;;  %v884_v35 = vld [vmem:[#allocation2 + $0x28] sm:$0xff] }
 0x1cb   : > { %v902_v37 = vpop.permute.xlu1 %901  ;;  %v904_v11 = vpop.permute.xlu0 %903 }
 0x1cc   : > { %v922_v15 = vmul.f32 %v902_v37, %v3239_v30  ;;  %v923_v16 = vmul.f32 %v904_v11, %v3245_v48  ;;  %1125 = vst.msk [vmem:[#allocation2 + $0x68] sm:$0xff] %vm343_vm1, %v1117_v58  ;;  %1126 = vst.msk [vmem:[#allocation2 + $0x70] sm:$0xff] %vm343_vm1, %v1118_v18  ;;  %v885_v58 = vld [vmem:[#allocation2 + $0x30] sm:$0xff]  ;;  %v886_v11 = vld [vmem:[#allocation2 + $0x38] sm:$0xff] }
 0x1cd   : > { %v1103_v17 = vld [vmem:[#allocation2 + $0x78] sm:$0xff] }
 0x1ce   : > { %941 = vrot.lane.b32.xlu1 %v922_v15, %s2647_s18  ;;  %943 = vrot.lane.b32.xlu0 %v923_v16, %s2647_s18  ;;  %v1119_v8 = vadd.f32 %v1111_v36, %v1103_v17 }
 0x1cf   : > { %v906_v9 = vpop.permute.xlu1 %905  ;;  %v908_v19 = vpop.permute.xlu0 %907 }
 0x1d0   : > { %v924_v26 = vmul.f32 %v906_v9, %v3258_v57  ;;  %v925_v27 = vmul.f32 %v908_v19, %v3264_v0  ;;  %1127 = vst.msk [vmem:[#allocation2 + $0x78] sm:$0xff] %vm343_vm1, %v1119_v8 }
 0x1d2   : > { %945 = vrot.lane.b32.xlu1 %v924_v26, %s2647_s18  ;;  %947 = vrot.lane.b32.xlu0 %v925_v27, %s2647_s18 }
 0x1d3   : > { %v910_v28 = vpop.permute.xlu1 %909 }
 0x1d4   : > { %v926_v31 = vmul.f32 %v910_v28, %v3278_v7 }
 0x1d6   : > { %949 = vrot.lane.b32.xlu1 %v926_v31, %s2647_s18  ;;  %1000 = vrot.lane.b32.xlu0 %v3368_v29, %s2646_s23 }
 0x1da   : > { %1002 = vrot.lane.b32.xlu1 %v3375_v32, %s2646_s23  ;;  %1004 = vrot.lane.b32.xlu0 %v3378_v54, %s2646_s23 }
 0x1de   : > { %1006 = vrot.lane.b32.xlu1 %v3385_v41, %s2646_s23  ;;  %1008 = vrot.lane.b32.xlu0 %v3388_v13, %s2646_s23 }
 0x1e2   : > { %1010 = vrot.lane.b32.xlu1 %v3395_v20, %s2646_s23  ;;  %1012 = vrot.lane.b32.xlu0 %v3398_v43, %s2646_s23 }
 0x1e6   : > { %1014 = vrot.lane.b32.xlu1 %v3405_v44, %s2646_s23 }
 0x238   : > { %v936_v45 = vpop.permute.xlu0 %935 }
 0x239   : > { %v959_v50 = vadd.f32 %v936_v45, %v879_v49 }
 0x23b   : > { %967 = vst.msk [vmem:[#allocation2] sm:$0xff] %vm343_vm1, %v959_v50 }
 0x23c   : > { %v938_v53 = vpop.permute.xlu1 %937  ;;  %v940_v47 = vpop.permute.xlu0 %939 }
 0x23d   : > { %v960_v42 = vadd.f32 %v938_v53, %v880_v56  ;;  %v961_v61 = vadd.f32 %v940_v47, %v881_v59  ;;  %v3461_v56 = vld [vmem:[%s3003_s29 + $0xa] sm:$0xff]  ;;  %v3467_v47 = vld [vmem:[%s3003_s29 + $0x1a] sm:$0xff] }
 0x23e   : > { %v3464_v59 = vld [vmem:[%s2927_s13 + $0x188] sm:$0xff] }
 0x23f   : > { %968 = vst.msk [vmem:[#allocation2 + $0x8] sm:$0xff] %vm343_vm1, %v960_v42  ;;  %969 = vst.msk [vmem:[#allocation2 + $0x10] sm:$0xff] %vm343_vm1, %v961_v61 }
 0x240   : > { %v942_v23 = vpop.permute.xlu1 %941  ;;  %v944_v2 = vpop.permute.xlu0 %943 }
 0x241   : > { %v962_v3 = vadd.f32 %v942_v23, %v882_v63  ;;  %v963_v4 = vadd.f32 %v944_v2, %v883_v1  ;;  %v3470_v1 = vld [vmem:[%s2927_s13 + $0x190] sm:$0xff] }
 0x243   : > { %970 = vst.msk [vmem:[#allocation2 + $0x18] sm:$0xff] %vm343_vm1, %v962_v3  ;;  %971 = vst.msk [vmem:[#allocation2 + $0x20] sm:$0xff] %vm343_vm1, %v963_v4 }
 0x244   : > { %v946_v6 = vpop.permute.xlu1 %945  ;;  %v948_v18 = vpop.permute.xlu0 %947 }
 0x245   : > { %v964_v36 = vadd.f32 %v946_v6, %v884_v35  ;;  %v965_v37 = vadd.f32 %v948_v18, %v885_v58  ;;  %v1362_v6 = vmul.f32 %v3464_v59, %v3461_v56  ;;  %v1363_v58 = vmul.f32 %v3470_v1, %v3467_v47  ;;  %v3479_v18 = vld [vmem:[%s3003_s29 + $0x22] sm:$0xff] }
 0x247   : > { %972 = vst.msk [vmem:[#allocation2 + $0x28] sm:$0xff] %vm343_vm1, %v964_v36  ;;  %973 = vst.msk [vmem:[#allocation2 + $0x30] sm:$0xff] %vm343_vm1, %v965_v37  ;;  %v3482_v36 = vld [vmem:[%s2927_s13 + $0x198] sm:$0xff] }
 0x248   : > { %v950_v15 = vpop.permute.xlu1 %949  ;;  %v1001_v16 = vpop.permute.xlu0 %1000  ;;  %v3485_v37 = vld [vmem:[%s3003_s29 + $0x32] sm:$0xff] }
 0x249   : > { %v966_v17 = vadd.f32 %v950_v15, %v886_v11  ;;  %v1024_v8 = vmul.f32 %v1001_v16, %v3211_v5 }
 0x24a   : > { %v987_v42 = vld [vmem:[#allocation2 + $0x18] sm:$0xff]  ;;  %v988_v63 = vld [vmem:[#allocation2 + $0x20] sm:$0xff] }
 0x24b   : > { %974 = vst.msk [vmem:[#allocation2 + $0x38] sm:$0xff] %vm343_vm1, %v966_v17  ;;  %1040 = vrot.lane.b32.xlu0 %v1024_v8, %s2648_s0  ;;  %v3488_v8 = vld [vmem:[%s2927_s13 + $0x1a0] sm:$0xff] }
 0x24c   : > { %v1003_v9 = vpop.permute.xlu1 %1002  ;;  %v1005_v19 = vpop.permute.xlu0 %1004 }
 0x24d   : > { %v1025_v26 = vmul.f32 %v1003_v9, %v3221_v12  ;;  %v1026_v27 = vmul.f32 %v1005_v19, %v3227_v14 }
 0x24e   : > { %v989_v11 = vld [vmem:[#allocation2 + $0x28] sm:$0xff]  ;;  %v990_v16 = vld [vmem:[#allocation2 + $0x30] sm:$0xff] }
 0x24f   : > { %1042 = vrot.lane.b32.xlu1 %v1025_v26, %s2648_s0  ;;  %1044 = vrot.lane.b32.xlu0 %v1026_v27, %s2648_s0 }
 0x250   : > { %v1007_v28 = vpop.permute.xlu1 %1006  ;;  %v1009_v31 = vpop.permute.xlu0 %1008 }
 0x251   : > { %v1027_v45 = vmul.f32 %v1007_v28, %v3239_v30  ;;  %v1028_v5 = vmul.f32 %v1009_v31, %v3245_v48  ;;  %v985_v48 = vld [vmem:[#allocation2 + $0x8] sm:$0xff] }
 0x253   : > { %1046 = vrot.lane.b32.xlu1 %v1027_v45, %s2648_s0  ;;  %1048 = vrot.lane.b32.xlu0 %v1028_v5, %s2648_s0  ;;  %v1364_v45 = vmul.f32 %v3482_v36, %v3479_v18  ;;  %v1365_v5 = vmul.f32 %v3488_v8, %v3485_v37 }
 0x254   : > { %v1011_v49 = vpop.permute.xlu1 %1010  ;;  %v1013_v50 = vpop.permute.xlu0 %1012 }
 0x255   : > { %v1029_v12 = vmul.f32 %v1011_v49, %v3258_v57  ;;  %v1030_v14 = vmul.f32 %v1013_v50, %v3264_v0  ;;  %v3454_v0 = vld [vmem:[%s2927_s13 + $0x180] sm:$0xff]  ;;  %v3501_v50 = vld [vmem:[%s2927_s13 + $0x1a8] sm:$0xff] }
 0x256   : > { %v3498_v49 = vld [vmem:[%s3003_s29 + $0x3a] sm:$0xff] }
 0x257   : > { %1050 = vrot.lane.b32.xlu1 %v1029_v12, %s2648_s0  ;;  %1052 = vrot.lane.b32.xlu0 %v1030_v14, %s2648_s0  ;;  %v991_v12 = vld [vmem:[#allocation2 + $0x38] sm:$0xff] }
 0x258   : > { %v1015_v53 = vpop.permute.xlu1 %1014 }
 0x259   : > { %v1031_v30 = vmul.f32 %v1015_v53, %v3278_v7 }
 0x25b   : > { %1054 = vrot.lane.b32.xlu1 %v1031_v30, %s2648_s0  ;;  %1152 = vrot.lane.b32.xlu0 %v3161_v55, %s2645_s7  ;;  %v3504_v30 = vld [vmem:[%s3003_s29 + $0x4a] sm:$0xff] }
 0x25f   : > { %1154 = vrot.lane.b32.xlu1 %v3167_v60, %s2645_s7  ;;  %1156 = vrot.lane.b32.xlu0 %v3170_v33, %s2645_s7  ;;  %v984_v60 = vld [vmem:[#allocation2] sm:$0xff] }
 0x263   : > { %1158 = vrot.lane.b32.xlu1 %v3177_v34, %s2645_s7  ;;  %1160 = vrot.lane.b32.xlu0 %v3180_v62, %s2645_s7  ;;  %v3451_v34 = vld [vmem:[%s3003_s29 + $0x2] sm:$0xff] }
 0x267   : > { %1162 = vrot.lane.b32.xlu1 %v3187_v38, %s2645_s7  ;;  %1164 = vrot.lane.b32.xlu0 %v3190_v39, %s2645_s7  ;;  %v986_v38 = vld [vmem:[#allocation2 + $0x10] sm:$0xff] }
 0x26b   : > { %1166 = vrot.lane.b32.xlu1 %v3197_v40, %s2645_s7  ;;  %v1361_v40 = vmul.f32 %v3454_v0, %v3451_v34 }
 0x2bd   : > { %v1041_v55 = vpop.permute.xlu0 %1040 }
 0x2be   : > { %v1064_v33 = vadd.f32 %v1041_v55, %v984_v60  ;;  %v3507_v55 = vld [vmem:[%s2927_s13 + $0x1b0] sm:$0xff] }
 0x2c0   : > { %1072 = vst.msk [vmem:[#allocation2] sm:$0xff] %vm343_vm1, %v1064_v33 }
 0x2c1   : > { %v1043_v62 = vpop.permute.xlu1 %1042  ;;  %v1045_v57 = vpop.permute.xlu0 %1044 }
 0x2c2   : > { %v1065_v39 = vadd.f32 %v1043_v62, %v985_v48  ;;  %v1066_v7 = vadd.f32 %v1045_v57, %v986_v38 }
 0x2c4   : > { %1073 = vst.msk [vmem:[#allocation2 + $0x8] sm:$0xff] %vm343_vm1, %v1065_v39  ;;  %1074 = vst.msk [vmem:[#allocation2 + $0x10] sm:$0xff] %vm343_vm1, %v1066_v7  ;;  %v1366_v39 = vmul.f32 %v3501_v50, %v3498_v49  ;;  %v1367_v7 = vmul.f32 %v3507_v55, %v3504_v30 }
 0x2c5   : > { %v1047_v61 = vpop.permute.xlu1 %1046  ;;  %v1049_v23 = vpop.permute.xlu0 %1048 }
 0x2c6   : > { %v1067_v2 = vadd.f32 %v1047_v61, %v987_v42  ;;  %v1068_v3 = vadd.f32 %v1049_v23, %v988_v63  ;;  %v3519_v61 = vld [vmem:[%s3003_s29 + $0x52] sm:$0xff] }
 0x2c7   : > { %v1353_v4 = vld [vmem:[#allocation2] sm:$0xff]  ;;  %v3522_v63 = vld [vmem:[%s2927_s13 + $0x1b8] sm:$0xff] }
 0x2c8   : > { %1075 = vst.msk [vmem:[#allocation2 + $0x18] sm:$0xff] %vm343_vm1, %v1067_v2  ;;  %1076 = vst.msk [vmem:[#allocation2 + $0x20] sm:$0xff] %vm343_vm1, %v1068_v3  ;;  %v1369_v35 = vadd.f32 %v1361_v40, %v1353_v4 }
 0x2c9   : > { %v1051_v15 = vpop.permute.xlu1 %1050  ;;  %v1053_v17 = vpop.permute.xlu0 %1052 }
 0x2ca   : > { %v1069_v9 = vadd.f32 %v1051_v15, %v989_v11  ;;  %v1070_v19 = vadd.f32 %v1053_v17, %v990_v16  ;;  %1377 = vst.msk [vmem:[#allocation2] sm:$0xff] %vm343_vm1, %v1369_v35 }
 0x2cb   : > { %v1354_v26 = vld [vmem:[#allocation2 + $0x8] sm:$0xff]  ;;  %v1355_v27 = vld [vmem:[#allocation2 + $0x10] sm:$0xff] }
 0x2cc   : > { %1077 = vst.msk [vmem:[#allocation2 + $0x28] sm:$0xff] %vm343_vm1, %v1069_v9  ;;  %1078 = vst.msk [vmem:[#allocation2 + $0x30] sm:$0xff] %vm343_vm1, %v1070_v19  ;;  %v1370_v28 = vadd.f32 %v1362_v6, %v1354_v26  ;;  %v1371_v31 = vadd.f32 %v1363_v58, %v1355_v27  ;;  %v1368_v58 = vmul.f32 %v3522_v63, %v3519_v61 }
 0x2cd   : > { %v1055_v14 = vpop.permute.xlu1 %1054  ;;  %v1153_v53 = vpop.permute.xlu0 %1152 }
 0x2ce   : > { %v1071_v60 = vadd.f32 %v1055_v14, %v991_v12  ;;  %v1176_v33 = vmul.f32 %v3299_v22, %v1153_v53  ;;  %1378 = vst.msk [vmem:[#allocation2 + $0x8] sm:$0xff] %vm343_vm1, %v1370_v28  ;;  %1379 = vst.msk [vmem:[#allocation2 + $0x10] sm:$0xff] %vm343_vm1, %v1371_v31 }
 0x2cf   : > { %v1356_v62 = vld [vmem:[#allocation2 + $0x18] sm:$0xff]  ;;  %v1357_v48 = vld [vmem:[#allocation2 + $0x20] sm:$0xff] }
 0x2d0   : > { %1079 = vst.msk [vmem:[#allocation2 + $0x38] sm:$0xff] %vm343_vm1, %v1071_v60  ;;  %1192 = vrot.lane.b32.xlu0 %v1176_v33, %s2647_s18  ;;  %v1372_v38 = vadd.f32 %v1364_v45, %v1356_v62  ;;  %v1373_v57 = vadd.f32 %v1365_v5, %v1357_v48  ;;  %v1140_v33 = vld [vmem:[#allocation2 + $0x60] sm:$0xff] }
 0x2d1   : > { %v1155_v40 = vpop.permute.xlu1 %1154  ;;  %v1157_v42 = vpop.permute.xlu0 %1156 }
 0x2d2   : > { %v1177_v23 = vmul.f32 %v3306_v25, %v1155_v40  ;;  %v1178_v2 = vmul.f32 %v3309_v10, %v1157_v42  ;;  %1380 = vst.msk [vmem:[#allocation2 + $0x18] sm:$0xff] %vm343_vm1, %v1372_v38  ;;  %1381 = vst.msk [vmem:[#allocation2 + $0x20] sm:$0xff] %vm343_vm1, %v1373_v57  ;;  %v1141_v38 = vld [vmem:[#allocation2 + $0x68] sm:$0xff] }
 0x2d3   : > { %v1358_v3 = vld [vmem:[#allocation2 + $0x28] sm:$0xff]  ;;  %v1359_v4 = vld [vmem:[#allocation2 + $0x30] sm:$0xff] }
 0x2d4   : > { %1194 = vrot.lane.b32.xlu1 %v1177_v23, %s2647_s18  ;;  %1196 = vrot.lane.b32.xlu0 %v1178_v2, %s2647_s18  ;;  %v1374_v35 = vadd.f32 %v1366_v39, %v1358_v3  ;;  %v1375_v6 = vadd.f32 %v1367_v7, %v1359_v4  ;;  %v1142_v39 = vld [vmem:[#allocation2 + $0x70] sm:$0xff]  ;;  %v1143_v23 = vld [vmem:[#allocation2 + $0x78] sm:$0xff] }
 0x2d5   : > { %v1159_v11 = vpop.permute.xlu1 %1158  ;;  %v1161_v15 = vpop.permute.xlu0 %1160 }
 0x2d6   : > { %v1179_v16 = vmul.f32 %v3318_v21, %v1159_v11  ;;  %v1180_v17 = vmul.f32 %v3321_v46, %v1161_v15  ;;  %1382 = vst.msk [vmem:[#allocation2 + $0x28] sm:$0xff] %vm343_vm1, %v1374_v35  ;;  %1383 = vst.msk [vmem:[#allocation2 + $0x30] sm:$0xff] %vm343_vm1, %v1375_v6 }
 0x2d7   : > { %v1360_v9 = vld [vmem:[#allocation2 + $0x38] sm:$0xff] }
 0x2d8   : > { %1198 = vrot.lane.b32.xlu1 %v1179_v16, %s2647_s18  ;;  %1200 = vrot.lane.b32.xlu0 %v1180_v17, %s2647_s18  ;;  %v1376_v19 = vadd.f32 %v1368_v58, %v1360_v9 }
 0x2d9   : > { %v1163_v26 = vpop.permute.xlu1 %1162  ;;  %v1165_v27 = vpop.permute.xlu0 %1164 }
 0x2da   : > { %v1181_v28 = vmul.f32 %v3331_v51, %v1163_v26  ;;  %v1182_v31 = vmul.f32 %v3334_v52, %v1165_v27  ;;  %1384 = vst.msk [vmem:[#allocation2 + $0x38] sm:$0xff] %vm343_vm1, %v1376_v19  ;;  %v2200_v27 = vld [vmem:[%s2927_s13 + $0x1d0] sm:$0xff] }
 0x2dc   : > { %1202 = vrot.lane.b32.xlu1 %v1181_v28, %s2647_s18  ;;  %1204 = vrot.lane.b32.xlu0 %v1182_v31, %s2647_s18  ;;  %v2201_v28 = vld [vmem:[%s2927_s13 + $0x1d8] sm:$0xff]  ;;  %v2204_v31 = vld [vmem:[%s2927_s13 + $0x1f0] sm:$0xff] }
 0x2dd   : > { %v1167_v45 = vpop.permute.xlu1 %1166 }
 0x2de   : > { %v1183_v5 = vmul.f32 %v3346_v24, %v1167_v45  ;;  %v2205_v45 = vld [vmem:[%s2927_s13 + $0x1f8] sm:$0xff] }
 0x2e0   : > { %1206 = vrot.lane.b32.xlu1 %v1183_v5, %s2647_s18  ;;  %1256 = vrot.lane.b32.xlu0 %v3368_v29, %s2646_s23  ;;  %v1136_v29 = vld [vmem:[#allocation2 + $0x40] sm:$0xff] }
 0x2e1   : > { %v2206_v5 = vld [vmem:[%s2927_s13 + $0x200] sm:$0xff] }
 0x2e4   : > { %1258 = vrot.lane.b32.xlu1 %v3375_v32, %s2646_s23  ;;  %1260 = vrot.lane.b32.xlu0 %v3378_v54, %s2646_s23  ;;  %v1137_v54 = vld [vmem:[#allocation2 + $0x48] sm:$0xff] }
 0x2e8   : > { %1262 = vrot.lane.b32.xlu1 %v3385_v41, %s2646_s23  ;;  %1264 = vrot.lane.b32.xlu0 %v3388_v13, %s2646_s23  ;;  %v1138_v41 = vld [vmem:[#allocation2 + $0x50] sm:$0xff] }
 0x2ec   : > { %1266 = vrot.lane.b32.xlu1 %v3395_v20, %s2646_s23  ;;  %1268 = vrot.lane.b32.xlu0 %v3398_v43, %s2646_s23  ;;  %v1139_v20 = vld [vmem:[#allocation2 + $0x58] sm:$0xff] }
 0x2f0   : > { %1270 = vrot.lane.b32.xlu1 %v3405_v44, %s2646_s23 }
 0x342   : > { %v1193_v32 = vpop.permute.xlu0 %1192 }
 0x343   : > { %v1216_v12 = vadd.f32 %v1193_v32, %v1136_v29  ;;  %v2207_v29 = vld [vmem:[%s2927_s13 + $0x208] sm:$0xff]  ;;  %v2208_v32 = vld [vmem:[%s2927_s13 + $0x210] sm:$0xff] }
 0x345   : > { %1224 = vst.msk [vmem:[#allocation2 + $0x40] sm:$0xff] %vm343_vm1, %v1216_v12  ;;  %v2209_v12 = vld [vmem:[%s2927_s13 + $0x218] sm:$0xff] }
 0x346   : > { %v1195_v14 = vpop.permute.xlu1 %1194  ;;  %v1197_v53 = vpop.permute.xlu0 %1196 }
 0x347   : > { %v1217_v60 = vadd.f32 %v1195_v14, %v1137_v54  ;;  %v1218_v13 = vadd.f32 %v1197_v53, %v1138_v41  ;;  %v2210_v54 = vld [vmem:[%s2927_s13 + $0x220] sm:$0xff]  ;;  %v2211_v14 = vld [vmem:[%s2927_s13 + $0x228] sm:$0xff]  ;;  %v2212_v41 = vld [vmem:[%s2927_s13 + $0x230] sm:$0xff] }
 0x348   : > { %v2213_v53 = vld [vmem:[%s2927_s13 + $0x238] sm:$0xff] }
 0x349   : > { %1225 = vst.msk [vmem:[#allocation2 + $0x48] sm:$0xff] %vm343_vm1, %v1217_v60  ;;  %1226 = vst.msk [vmem:[#allocation2 + $0x50] sm:$0xff] %vm343_vm1, %v1218_v13 }
 0x34a   : > { %v1199_v43 = vpop.permute.xlu1 %1198  ;;  %v1201_v62 = vpop.permute.xlu0 %1200 }
 0x34b   : > { %v1219_v44 = vadd.f32 %v1199_v43, %v1139_v20  ;;  %v1220_v48 = vadd.f32 %v1201_v62, %v1140_v33 }
 0x34c   : > { %v1240_v20 = vld [vmem:[#allocation2 + $0x40] sm:$0xff] }
 0x34d   : > { %1227 = vst.msk [vmem:[#allocation2 + $0x58] sm:$0xff] %vm343_vm1, %v1219_v44  ;;  %1228 = vst.msk [vmem:[#allocation2 + $0x60] sm:$0xff] %vm343_vm1, %v1220_v48 }
 0x34e   : > { %v1203_v57 = vpop.permute.xlu1 %1202  ;;  %v1205_v7 = vpop.permute.xlu0 %1204 }
 0x34f   : > { %v1221_v40 = vadd.f32 %v1203_v57, %v1141_v38  ;;  %v1222_v42 = vadd.f32 %v1205_v7, %v1142_v39  ;;  %v3635_v57 = vld [vmem:[%s3003_s29 + $0xf2] sm:$0xff] }
 0x350   : > { %v1241_v62 = vld [vmem:[#allocation2 + $0x48] sm:$0xff]  ;;  %v1242_v48 = vld [vmem:[#allocation2 + $0x50] sm:$0xff] }
 0x351   : > { %1229 = vst.msk [vmem:[#allocation2 + $0x68] sm:$0xff] %vm343_vm1, %v1221_v40  ;;  %1230 = vst.msk [vmem:[#allocation2 + $0x70] sm:$0xff] %vm343_vm1, %v1222_v42  ;;  %v3642_v40 = vld [vmem:[%s3003_s29 + $0xfa] sm:$0xff] }
 0x352   : > { %v1207_v2 = vpop.permute.xlu1 %1206  ;;  %v1257_v3 = vpop.permute.xlu0 %1256 }
 0x353   : > { %v1223_v4 = vadd.f32 %v1207_v2, %v1143_v23  ;;  %v1280_v35 = vmul.f32 %v3299_v22, %v1257_v3 }
 0x354   : > { %v1243_v42 = vld [vmem:[#allocation2 + $0x58] sm:$0xff]  ;;  %v1244_v2 = vld [vmem:[#allocation2 + $0x60] sm:$0xff] }
 0x355   : > { %1231 = vst.msk [vmem:[#allocation2 + $0x78] sm:$0xff] %vm343_vm1, %v1223_v4  ;;  %1296 = vrot.lane.b32.xlu0 %v1280_v35, %s2648_s0  ;;  %v3645_v4 = vld [vmem:[%s3003_s29 + $0x10a] sm:$0xff] }
 0x356   : > { %v1259_v6 = vpop.permute.xlu1 %1258  ;;  %v1261_v58 = vpop.permute.xlu0 %1260 }
 0x357   : > { %v1281_v11 = vmul.f32 %v3306_v25, %v1259_v6  ;;  %v1282_v15 = vmul.f32 %v3309_v10, %v1261_v58 }
 0x359   : > { %1298 = vrot.lane.b32.xlu1 %v1281_v11, %s2648_s0  ;;  %1300 = vrot.lane.b32.xlu0 %v1282_v15, %s2648_s0  ;;  %v1621_v15 = vmul.f32 %v3645_v4, %v3470_v1 }
 0x35a   : > { %v1263_v16 = vpop.permute.xlu1 %1262  ;;  %v1265_v17 = vpop.permute.xlu0 %1264 }
 0x35b   : > { %v1283_v22 = vmul.f32 %v3318_v21, %v1263_v16  ;;  %v1284_v9 = vmul.f32 %v3321_v46, %v1265_v17  ;;  %v2198_v21 = vld [vmem:[%s2927_s13 + $0x1c0] sm:$0xff]  ;;  %v2199_v46 = vld [vmem:[%s2927_s13 + $0x1c8] sm:$0xff]  ;;  %v3654_v16 = vld [vmem:[%s3003_s29 + $0x112] sm:$0xff] }
 0x35c   : > { %v1245_v17 = vld [vmem:[#allocation2 + $0x68] sm:$0xff] }
 0x35d   : > { %1302 = vrot.lane.b32.xlu1 %v1283_v22, %s2648_s0  ;;  %1304 = vrot.lane.b32.xlu0 %v1284_v9, %s2648_s0  ;;  %v1246_v9 = vld [vmem:[#allocation2 + $0x70] sm:$0xff] }
 0x35e   : > { %v1267_v25 = vpop.permute.xlu1 %1266  ;;  %v1269_v10 = vpop.permute.xlu0 %1268 }
 0x35f   : > { %v1285_v19 = vmul.f32 %v3331_v51, %v1267_v25  ;;  %v1286_v26 = vmul.f32 %v3334_v52, %v1269_v10  ;;  %v2202_v51 = vld [vmem:[%s2927_s13 + $0x1e0] sm:$0xff]  ;;  %v2203_v52 = vld [vmem:[%s2927_s13 + $0x1e8] sm:$0xff] }
 0x360   : > { %v3657_v10 = vld [vmem:[%s3003_s29 + $0x122] sm:$0xff] }
 0x361   : > { %1306 = vrot.lane.b32.xlu1 %v1285_v19, %s2648_s0  ;;  %1308 = vrot.lane.b32.xlu0 %v1286_v26, %s2648_s0 }
 0x362   : > { %v1271_v60 = vpop.permute.xlu1 %1270 }
 0x363   : > { %v1287_v13 = vmul.f32 %v3346_v24, %v1271_v60  ;;  %v1619_v24 = vmul.f32 %v3635_v57, %v3454_v0  ;;  %v1620_v0 = vmul.f32 %v3642_v40, %v3464_v59 }
 0x365   : > { %1410 = vrot.lane.b32.xlu1 %v2198_v21, %s2645_s7  ;;  %1412 = vrot.lane.b32.xlu0 %v2199_v46, %s2645_s7 }
 0x369   : > { %1414 = vrot.lane.b32.xlu1 %v2200_v27, %s2645_s7  ;;  %1416 = vrot.lane.b32.xlu0 %v2201_v28, %s2645_s7 }
 0x36d   : > { %1418 = vrot.lane.b32.xlu1 %v2202_v51, %s2645_s7  ;;  %1420 = vrot.lane.b32.xlu0 %v2203_v52, %s2645_s7 }
 0x371   : > { %1422 = vrot.lane.b32.xlu1 %v2204_v31, %s2645_s7  ;;  %1424 = vrot.lane.b32.xlu0 %v2205_v45, %s2645_s7 }
 0x375   : > { %1667 = vrot.lane.b32.xlu1 %v2198_v21, %s2645_s7  ;;  %1669 = vrot.lane.b32.xlu0 %v2199_v46, %s2645_s7 }
 0x379   : > { %1671 = vrot.lane.b32.xlu1 %v2200_v27, %s2645_s7  ;;  %1673 = vrot.lane.b32.xlu0 %v2201_v28, %s2645_s7  ;;  %v1622_v27 = vmul.f32 %v3654_v16, %v3482_v36  ;;  %v1623_v28 = vmul.f32 %v3657_v10, %v3488_v8 }
 0x37d   : > { %1675 = vrot.lane.b32.xlu1 %v2202_v51, %s2645_s7  ;;  %1677 = vrot.lane.b32.xlu0 %v2203_v52, %s2645_s7  ;;  %v3667_v51 = vld [vmem:[%s3003_s29 + $0x12a] sm:$0xff] }
 0x37e   : > { %v1624_v36 = vmul.f32 %v3667_v51, %v3501_v50 }
 0x381   : > { %1679 = vrot.lane.b32.xlu1 %v2204_v31, %s2645_s7  ;;  %1681 = vrot.lane.b32.xlu0 %v2205_v45, %s2645_s7  ;;  %v3670_v45 = vld [vmem:[%s3003_s29 + $0x13a] sm:$0xff] }
 0x385   : > { %1515 = vrot.lane.b32.xlu1 %v2206_v5, %s2646_s23  ;;  %1517 = vrot.lane.b32.xlu0 %v2207_v29, %s2646_s23 }
 0x389   : > { %1519 = vrot.lane.b32.xlu1 %v2208_v32, %s2646_s23  ;;  %1521 = vrot.lane.b32.xlu0 %v2209_v12, %s2646_s23 }
 0x38d   : > { %1523 = vrot.lane.b32.xlu1 %v2210_v54, %s2646_s23  ;;  %1525 = vrot.lane.b32.xlu0 %v2211_v14, %s2646_s23 }
 0x391   : > { %1527 = vrot.lane.b32.xlu1 %v2212_v41, %s2646_s23  ;;  %1529 = vrot.lane.b32.xlu0 %v2213_v53, %s2646_s23 }
 0x395   : > { %1771 = vrot.lane.b32.xlu1 %v2206_v5, %s2646_s23  ;;  %1773 = vrot.lane.b32.xlu0 %v2207_v29, %s2646_s23 }
 0x399   : > { %1775 = vrot.lane.b32.xlu1 %v2208_v32, %s2646_s23  ;;  %1777 = vrot.lane.b32.xlu0 %v2209_v12, %s2646_s23 }
 0x39d   : > { %1779 = vrot.lane.b32.xlu1 %v2210_v54, %s2646_s23  ;;  %1781 = vrot.lane.b32.xlu0 %v2211_v14, %s2646_s23  ;;  %v1625_v14 = vmul.f32 %v3670_v45, %v3507_v55 }
 0x3a1   : > { %1783 = vrot.lane.b32.xlu1 %v2212_v41, %s2646_s23  ;;  %1785 = vrot.lane.b32.xlu0 %v2213_v53, %s2646_s23 }
 0x3a5   : > { %1310 = vrot.lane.b32.xlu1 %v1287_v13, %s2648_s0 }
 0x3c7   : > { %v1297_v43 = vpop.permute.xlu0 %1296 }
 0x3c8   : > { %v1320_v33 = vadd.f32 %v1297_v43, %v1240_v20 }
 0x3ca   : > { %1328 = vst.msk [vmem:[#allocation2 + $0x40] sm:$0xff] %vm343_vm1, %v1320_v33 }
 0x3cb   : > { %v1299_v44 = vpop.permute.xlu1 %1298  ;;  %v1301_v38 = vpop.permute.xlu0 %1300 }
 0x3cc   : > { %v1321_v39 = vadd.f32 %v1299_v44, %v1241_v62  ;;  %v1322_v7 = vadd.f32 %v1301_v38, %v1242_v48 }
 0x3ce   : > { %1329 = vst.msk [vmem:[#allocation2 + $0x48] sm:$0xff] %vm343_vm1, %v1321_v39  ;;  %1330 = vst.msk [vmem:[#allocation2 + $0x50] sm:$0xff] %vm343_vm1, %v1322_v7 }
 0x3cf   : > { %v1303_v23 = vpop.permute.xlu1 %1302  ;;  %v1305_v3 = vpop.permute.xlu0 %1304 }
 0x3d0   : > { %v1323_v35 = vadd.f32 %v1303_v23, %v1243_v42  ;;  %v1324_v6 = vadd.f32 %v1305_v3, %v1244_v2 }
 0x3d1   : > { %v1611_v58 = vld [vmem:[#allocation2 + $0x40] sm:$0xff] }
 0x3d2   : > { %1331 = vst.msk [vmem:[#allocation2 + $0x58] sm:$0xff] %vm343_vm1, %v1323_v35  ;;  %1332 = vst.msk [vmem:[#allocation2 + $0x60] sm:$0xff] %vm343_vm1, %v1324_v6  ;;  %v1627_v11 = vadd.f32 %v1619_v24, %v1611_v58 }
 0x3d3   : > { %v1307_v22 = vpop.permute.xlu1 %1306  ;;  %v1309_v25 = vpop.permute.xlu0 %1308 }
 0x3d4   : > { %v1325_v19 = vadd.f32 %v1307_v22, %v1245_v17  ;;  %v1326_v26 = vadd.f32 %v1309_v25, %v1246_v9  ;;  %1635 = vst.msk [vmem:[#allocation2 + $0x40] sm:$0xff] %vm343_vm1, %v1627_v11  ;;  %v2221_v9 = vld [vmem:[%s3003_s29 + $0x142] sm:$0xff] }
 0x3d5   : > { %v1612_v21 = vld [vmem:[#allocation2 + $0x48] sm:$0xff]  ;;  %v1613_v46 = vld [vmem:[#allocation2 + $0x50] sm:$0xff] }
 0x3d6   : > { %1333 = vst.msk [vmem:[#allocation2 + $0x68] sm:$0xff] %vm343_vm1, %v1325_v19  ;;  %1334 = vst.msk [vmem:[#allocation2 + $0x70] sm:$0xff] %vm343_vm1, %v1326_v26  ;;  %v1628_v59 = vadd.f32 %v1620_v0, %v1612_v21  ;;  %v1629_v1 = vadd.f32 %v1621_v15, %v1613_v46 }
 0x3d7   : > { %v1411_v52 = vpop.permute.xlu1 %1410  ;;  %v1413_v31 = vpop.permute.xlu0 %1412 }
 0x3d8   : > { %v1434_v5 = vmul.f32 %v1411_v52, %v3451_v34  ;;  %v1435_v29 = vmul.f32 %v1413_v31, %v3461_v56  ;;  %1636 = vst.msk [vmem:[#allocation2 + $0x48] sm:$0xff] %vm343_vm1, %v1628_v59  ;;  %1637 = vst.msk [vmem:[#allocation2 + $0x50] sm:$0xff] %vm343_vm1, %v1629_v1 }
 0x3d9   : > { %v1614_v32 = vld [vmem:[#allocation2 + $0x58] sm:$0xff]  ;;  %v1615_v12 = vld [vmem:[#allocation2 + $0x60] sm:$0xff] }
 0x3da   : > { %1450 = vrot.lane.b32.xlu0 %v1434_v5, %s2647_s18  ;;  %1452 = vrot.lane.b32.xlu1 %v1435_v29, %s2647_s18  ;;  %v1630_v8 = vadd.f32 %v1622_v27, %v1614_v32  ;;  %v1631_v54 = vadd.f32 %v1623_v28, %v1615_v12 }
 0x3db   : > { %v1415_v41 = vpop.permute.xlu1 %1414  ;;  %v1417_v53 = vpop.permute.xlu0 %1416 }
 0x3dc   : > { %v1436_v60 = vmul.f32 %v1415_v41, %v3467_v47  ;;  %v1437_v13 = vmul.f32 %v1417_v53, %v3479_v18  ;;  %1638 = vst.msk [vmem:[#allocation2 + $0x58] sm:$0xff] %vm343_vm1, %v1630_v8  ;;  %1639 = vst.msk [vmem:[#allocation2 + $0x60] sm:$0xff] %vm343_vm1, %v1631_v54 }
 0x3dd   : > { %v1616_v50 = vld [vmem:[#allocation2 + $0x68] sm:$0xff]  ;;  %v1617_v20 = vld [vmem:[#allocation2 + $0x70] sm:$0xff] }
 0x3de   : > { %1454 = vrot.lane.b32.xlu0 %v1436_v60, %s2647_s18  ;;  %1456 = vrot.lane.b32.xlu1 %v1437_v13, %s2647_s18  ;;  %v1632_v43 = vadd.f32 %v1624_v36, %v1616_v50  ;;  %v1633_v33 = vadd.f32 %v1625_v14, %v1617_v20 }
 0x3df   : > { %v1419_v62 = vpop.permute.xlu1 %1418  ;;  %v1421_v55 = vpop.permute.xlu0 %1420 }
 0x3e0   : > { %v1438_v44 = vmul.f32 %v1419_v62, %v3485_v37  ;;  %v1439_v48 = vmul.f32 %v1421_v55, %v3498_v49  ;;  %1640 = vst.msk [vmem:[#allocation2 + $0x68] sm:$0xff] %vm343_vm1, %v1632_v43  ;;  %1641 = vst.msk [vmem:[#allocation2 + $0x70] sm:$0xff] %vm343_vm1, %v1633_v33  ;;  %v1395_v55 = vld [vmem:[#allocation2 + $0x8] sm:$0xff] }
 0x3e2   : > { %1458 = vrot.lane.b32.xlu0 %v1438_v44, %s2647_s18  ;;  %1460 = vrot.lane.b32.xlu1 %v1439_v48, %s2647_s18 }
 0x3e3   : > { %v1423_v38 = vpop.permute.xlu1 %1422  ;;  %v1425_v39 = vpop.permute.xlu0 %1424 }
 0x3e4   : > { %v1440_v7 = vmul.f32 %v1423_v38, %v3504_v30  ;;  %v1441_v24 = vmul.f32 %v1425_v39, %v3519_v61 }
 0x3e6   : > { %1462 = vrot.lane.b32.xlu0 %v1440_v7, %s2647_s18  ;;  %1464 = vrot.lane.b32.xlu1 %v1441_v24, %s2647_s18  ;;  %v1397_v7 = vld [vmem:[#allocation2 + $0x18] sm:$0xff] }
 0x3e7   : > { %v1668_v42 = vpop.permute.xlu1 %1667  ;;  %v1670_v23 = vpop.permute.xlu0 %1669 }
 0x3e8   : > { %v1691_v2 = vmul.f32 %v3635_v57, %v1668_v42  ;;  %v1692_v3 = vmul.f32 %v3642_v40, %v1670_v23  ;;  %v1396_v42 = vld [vmem:[#allocation2 + $0x10] sm:$0xff] }
 0x3ea   : > { %1707 = vrot.lane.b32.xlu0 %v1691_v2, %s2647_s18  ;;  %1709 = vrot.lane.b32.xlu1 %v1692_v3, %s2647_s18  ;;  %v1399_v3 = vld [vmem:[#allocation2 + $0x28] sm:$0xff] }
 0x3eb   : > { %v1672_v35 = vpop.permute.xlu1 %1671  ;;  %v1674_v6 = vpop.permute.xlu0 %1673 }
 0x3ec   : > { %v1693_v58 = vmul.f32 %v3645_v4, %v1672_v35  ;;  %v1694_v11 = vmul.f32 %v3654_v16, %v1674_v6  ;;  %v1398_v6 = vld [vmem:[#allocation2 + $0x20] sm:$0xff] }
 0x3ee   : > { %1711 = vrot.lane.b32.xlu0 %v1693_v58, %s2647_s18  ;;  %1713 = vrot.lane.b32.xlu1 %v1694_v11, %s2647_s18 }
 0x3ef   : > { %v1676_v0 = vpop.permute.xlu1 %1675  ;;  %v1678_v15 = vpop.permute.xlu0 %1677 }
 0x3f0   : > { %v1695_v17 = vmul.f32 %v3657_v10, %v1676_v0  ;;  %v1696_v22 = vmul.f32 %v3667_v51, %v1678_v15  ;;  %v1401_v15 = vld [vmem:[#allocation2 + $0x38] sm:$0xff] }
 0x3f2   : > { %1715 = vrot.lane.b32.xlu0 %v1695_v17, %s2647_s18  ;;  %1717 = vrot.lane.b32.xlu1 %v1696_v22, %s2647_s18  ;;  %v1400_v22 = vld [vmem:[#allocation2 + $0x30] sm:$0xff] }
 0x3f3   : > { %v1680_v25 = vpop.permute.xlu1 %1679  ;;  %v1682_v19 = vpop.permute.xlu0 %1681 }
 0x3f4   : > { %v1697_v26 = vmul.f32 %v3670_v45, %v1680_v25  ;;  %v1698_v21 = vmul.f32 %v2221_v9, %v1682_v19 }
 0x3f6   : > { %1719 = vrot.lane.b32.xlu0 %v1697_v26, %s2647_s18  ;;  %1721 = vrot.lane.b32.xlu1 %v1698_v21, %s2647_s18  ;;  %v1652_v26 = vld [vmem:[#allocation2 + $0x48] sm:$0xff] }
 0x3f7   : > { %v1516_v46 = vpop.permute.xlu1 %1515  ;;  %v1518_v59 = vpop.permute.xlu0 %1517 }
 0x3f8   : > { %v1539_v1 = vmul.f32 %v1516_v46, %v3451_v34  ;;  %v1540_v27 = vmul.f32 %v1518_v59, %v3461_v56  ;;  %v1651_v46 = vld [vmem:[#allocation2 + $0x40] sm:$0xff] }
 0x3fa   : > { %1555 = vrot.lane.b32.xlu0 %v1539_v1, %s2648_s0  ;;  %1557 = vrot.lane.b32.xlu1 %v1540_v27, %s2648_s0 }
 0x3fb   : > { %v1520_v28 = vpop.permute.xlu1 %1519  ;;  %v1522_v52 = vpop.permute.xlu0 %1521 }
 0x3fc   : > { %v1541_v31 = vmul.f32 %v1520_v28, %v3467_v47  ;;  %v1542_v5 = vmul.f32 %v1522_v52, %v3479_v18  ;;  %v1654_v28 = vld [vmem:[#allocation2 + $0x58] sm:$0xff] }
 0x3fe   : > { %1559 = vrot.lane.b32.xlu0 %v1541_v31, %s2648_s0  ;;  %1561 = vrot.lane.b32.xlu1 %v1542_v5, %s2648_s0  ;;  %v1653_v31 = vld [vmem:[#allocation2 + $0x50] sm:$0xff] }
 0x3ff   : > { %v1524_v29 = vpop.permute.xlu1 %1523  ;;  %v1526_v32 = vpop.permute.xlu0 %1525 }
 0x400   : > { %v1543_v34 = vmul.f32 %v1524_v29, %v3485_v37  ;;  %v1544_v56 = vmul.f32 %v1526_v32, %v3498_v49 }
 0x402   : > { %1563 = vrot.lane.b32.xlu0 %v1543_v34, %s2648_s0  ;;  %1565 = vrot.lane.b32.xlu1 %v1544_v56, %s2648_s0  ;;  %v1656_v34 = vld [vmem:[#allocation2 + $0x68] sm:$0xff] }
 0x403   : > { %v1528_v12 = vpop.permute.xlu1 %1527  ;;  %v1530_v36 = vpop.permute.xlu0 %1529 }
 0x404   : > { %v1545_v47 = vmul.f32 %v1528_v12, %v3504_v30  ;;  %v1546_v18 = vmul.f32 %v1530_v36, %v3519_v61  ;;  %v1655_v12 = vld [vmem:[#allocation2 + $0x60] sm:$0xff] }
 0x406   : > { %1567 = vrot.lane.b32.xlu0 %v1545_v47, %s2648_s0  ;;  %1569 = vrot.lane.b32.xlu1 %v1546_v18, %s2648_s0 }
 0x407   : > { %v1772_v8 = vpop.permute.xlu1 %1771  ;;  %v1774_v54 = vpop.permute.xlu0 %1773 }
 0x408   : > { %v1795_v37 = vmul.f32 %v3635_v57, %v1772_v8  ;;  %v1796_v49 = vmul.f32 %v3642_v40, %v1774_v54 }
 0x40a   : > { %1811 = vrot.lane.b32.xlu0 %v1795_v37, %s2648_s0  ;;  %1813 = vrot.lane.b32.xlu1 %v1796_v49, %s2648_s0  ;;  %v1657_v37 = vld [vmem:[#allocation2 + $0x70] sm:$0xff] }
 0x40b   : > { %v1776_v14 = vpop.permute.xlu1 %1775  ;;  %v1778_v41 = vpop.permute.xlu0 %1777 }
 0x40c   : > { %v1797_v30 = vmul.f32 %v3645_v4, %v1776_v14  ;;  %v1798_v61 = vmul.f32 %v3654_v16, %v1778_v41  ;;  %v1247_v16 = vld [vmem:[#allocation2 + $0x78] sm:$0xff] }
 0x40e   : > { %1815 = vrot.lane.b32.xlu0 %v1797_v30, %s2648_s0  ;;  %1817 = vrot.lane.b32.xlu1 %v1798_v61, %s2648_s0 }
 0x40f   : > { %v1780_v53 = vpop.permute.xlu1 %1779  ;;  %v1782_v60 = vpop.permute.xlu0 %1781 }
 0x410   : > { %v1799_v57 = vmul.f32 %v3657_v10, %v1780_v53  ;;  %v1800_v40 = vmul.f32 %v3667_v51, %v1782_v60  ;;  %v1626_v10 = vmul.f32 %v2221_v9, %v3522_v63 }
 0x412   : > { %1819 = vrot.lane.b32.xlu0 %v1799_v57, %s2648_s0  ;;  %1821 = vrot.lane.b32.xlu1 %v1800_v40, %s2648_s0 }
 0x413   : > { %v1784_v13 = vpop.permute.xlu1 %1783  ;;  %v1786_v50 = vpop.permute.xlu0 %1785 }
 0x414   : > { %v1801_v4 = vmul.f32 %v3670_v45, %v1784_v13  ;;  %v1802_v20 = vmul.f32 %v2221_v9, %v1786_v50  ;;  %v1394_v45 = vld [vmem:[#allocation2] sm:$0xff] }
 0x416   : > { %1823 = vrot.lane.b32.xlu0 %v1801_v4, %s2648_s0  ;;  %1825 = vrot.lane.b32.xlu1 %v1802_v20, %s2648_s0 }
 0x417   : > { %v1311_v43 = vpop.permute.xlu1 %1310 }
 0x418   : > { %v1327_v33 = vadd.f32 %v1311_v43, %v1247_v16 }
 0x41a   : > { %1335 = vst.msk [vmem:[#allocation2 + $0x78] sm:$0xff] %vm343_vm1, %v1327_v33 }
 0x421   : > { %v1618_v51 = vld [vmem:[#allocation2 + $0x78] sm:$0xff] }
 0x422   : > { %v1634_v62 = vadd.f32 %v1626_v10, %v1618_v51 }
 0x424   : > { %1642 = vst.msk [vmem:[#allocation2 + $0x78] sm:$0xff] %vm343_vm1, %v1634_v62 }
 0x42b   : > { %v1658_v8 = vld [vmem:[#allocation2 + $0x78] sm:$0xff] }
 0x44c   : > { %v1453_v44 = vpop.permute.xlu1 %1452  ;;  %v1451_v48 = vpop.permute.xlu0 %1450 }
 0x44d   : > { %v1475_v38 = vadd.f32 %v1453_v44, %v1395_v55  ;;  %v1474_v39 = vadd.f32 %v1451_v48, %v1394_v45 }
 0x44f   : > { %1483 = vst.msk [vmem:[#allocation2 + $0x8] sm:$0xff] %vm343_vm1, %v1475_v38  ;;  %1482 = vst.msk [vmem:[#allocation2] sm:$0xff] %vm343_vm1, %v1474_v39 }
 0x450   : > { %v1457_v24 = vpop.permute.xlu1 %1456  ;;  %v1455_v23 = vpop.permute.xlu0 %1454 }
 0x451   : > { %v1477_v2 = vadd.f32 %v1457_v24, %v1397_v7  ;;  %v1476_v63 = vadd.f32 %v1455_v23, %v1396_v42 }
 0x453   : > { %1485 = vst.msk [vmem:[#allocation2 + $0x18] sm:$0xff] %vm343_vm1, %v1477_v2  ;;  %1484 = vst.msk [vmem:[#allocation2 + $0x10] sm:$0xff] %vm343_vm1, %v1476_v63 }
 0x454   : > { %v1461_v35 = vpop.permute.xlu1 %1460  ;;  %v1459_v58 = vpop.permute.xlu0 %1458 }
 0x455   : > { %v1479_v11 = vadd.f32 %v1461_v35, %v1399_v3  ;;  %v1478_v0 = vadd.f32 %v1459_v58, %v1398_v6 }
 0x456   : > { %v1500_v30 = vld [vmem:[#allocation2 + $0x8] sm:$0xff]  ;;  %v1499_v60 = vld [vmem:[#allocation2] sm:$0xff] }
 0x457   : > { %1487 = vst.msk [vmem:[#allocation2 + $0x28] sm:$0xff] %vm343_vm1, %v1479_v11  ;;  %1486 = vst.msk [vmem:[#allocation2 + $0x20] sm:$0xff] %vm343_vm1, %v1478_v0 }
 0x458   : > { %v1465_v17 = vpop.permute.xlu1 %1464  ;;  %v1463_v9 = vpop.permute.xlu0 %1462 }
 0x459   : > { %v1481_v25 = vadd.f32 %v1465_v17, %v1401_v15  ;;  %v1480_v19 = vadd.f32 %v1463_v9, %v1400_v22 }
 0x45a   : > { %v1502_v13 = vld [vmem:[#allocation2 + $0x18] sm:$0xff]  ;;  %v1501_v4 = vld [vmem:[#allocation2 + $0x10] sm:$0xff] }
 0x45b   : > { %1489 = vst.msk [vmem:[#allocation2 + $0x38] sm:$0xff] %vm343_vm1, %v1481_v25  ;;  %1488 = vst.msk [vmem:[#allocation2 + $0x30] sm:$0xff] %vm343_vm1, %v1480_v19 }
 0x45c   : > { %v1710_v21 = vpop.permute.xlu1 %1709  ;;  %v1708_v59 = vpop.permute.xlu0 %1707 }
 0x45d   : > { %v1732_v1 = vadd.f32 %v1710_v21, %v1652_v26  ;;  %v1731_v27 = vadd.f32 %v1708_v59, %v1651_v46 }
 0x45e   : > { %v1504_v33 = vld [vmem:[#allocation2 + $0x28] sm:$0xff]  ;;  %v1503_v51 = vld [vmem:[#allocation2 + $0x20] sm:$0xff] }
 0x45f   : > { %1740 = vst.msk [vmem:[#allocation2 + $0x48] sm:$0xff] %vm343_vm1, %v1732_v1  ;;  %1739 = vst.msk [vmem:[#allocation2 + $0x40] sm:$0xff] %vm343_vm1, %v1731_v27 }
 0x460   : > { %v1714_v52 = vpop.permute.xlu1 %1713  ;;  %v1712_v5 = vpop.permute.xlu0 %1711 }
 0x461   : > { %v1734_v29 = vadd.f32 %v1714_v52, %v1654_v28  ;;  %v1733_v32 = vadd.f32 %v1712_v5, %v1653_v31 }
 0x462   : > { %v1506_v48 = vld [vmem:[#allocation2 + $0x38] sm:$0xff]  ;;  %v1505_v38 = vld [vmem:[#allocation2 + $0x30] sm:$0xff] }
 0x463   : > { %1742 = vst.msk [vmem:[#allocation2 + $0x58] sm:$0xff] %vm343_vm1, %v1734_v29  ;;  %1741 = vst.msk [vmem:[#allocation2 + $0x50] sm:$0xff] %vm343_vm1, %v1733_v32 }
 0x464   : > { %v1718_v56 = vpop.permute.xlu1 %1717  ;;  %v1716_v36 = vpop.permute.xlu0 %1715 }
 0x465   : > { %v1736_v47 = vadd.f32 %v1718_v56, %v1656_v34  ;;  %v1735_v18 = vadd.f32 %v1716_v36, %v1655_v12 }
 0x466   : > { %v1756_v42 = vld [vmem:[#allocation2 + $0x48] sm:$0xff]  ;;  %v1755_v2 = vld [vmem:[#allocation2 + $0x40] sm:$0xff] }
 0x467   : > { %1744 = vst.msk [vmem:[#allocation2 + $0x68] sm:$0xff] %vm343_vm1, %v1736_v47  ;;  %1743 = vst.msk [vmem:[#allocation2 + $0x60] sm:$0xff] %vm343_vm1, %v1735_v18 }
 0x468   : > { %v1722_v54 = vpop.permute.xlu1 %1721  ;;  %v1720_v49 = vpop.permute.xlu0 %1719 }
 0x469   : > { %v1738_v14 = vadd.f32 %v1722_v54, %v1658_v8  ;;  %v1737_v41 = vadd.f32 %v1720_v49, %v1657_v37 }
 0x46a   : > { %v1758_v6 = vld [vmem:[#allocation2 + $0x58] sm:$0xff]  ;;  %v1757_v11 = vld [vmem:[#allocation2 + $0x50] sm:$0xff] }
 0x46b   : > { %1746 = vst.msk [vmem:[#allocation2 + $0x78] sm:$0xff] %vm343_vm1, %v1738_v14  ;;  %1745 = vst.msk [vmem:[#allocation2 + $0x70] sm:$0xff] %vm343_vm1, %v1737_v41 }
 0x46c   : > { %v1558_v61 = vpop.permute.xlu1 %1557  ;;  %v1556_v53 = vpop.permute.xlu0 %1555 }
 0x46d   : > { %v1580_v57 = vadd.f32 %v1558_v61, %v1500_v30  ;;  %v1579_v40 = vadd.f32 %v1556_v53, %v1499_v60 }
 0x46e   : > { %v1760_v22 = vld [vmem:[#allocation2 + $0x68] sm:$0xff]  ;;  %v1759_v25 = vld [vmem:[#allocation2 + $0x60] sm:$0xff] }
 0x46f   : > { %1588 = vst.msk [vmem:[#allocation2 + $0x8] sm:$0xff] %vm343_vm1, %v1580_v57  ;;  %1587 = vst.msk [vmem:[#allocation2] sm:$0xff] %vm343_vm1, %v1579_v40 }
 0x470   : > { %v1562_v50 = vpop.permute.xlu1 %1561  ;;  %v1560_v20 = vpop.permute.xlu0 %1559 }
 0x471   : > { %v1582_v16 = vadd.f32 %v1562_v50, %v1502_v13  ;;  %v1581_v43 = vadd.f32 %v1560_v20, %v1501_v4 }
 0x472   : > { %v1762_v46 = vld [vmem:[#allocation2 + $0x78] sm:$0xff]  ;;  %v1761_v1 = vld [vmem:[#allocation2 + $0x70] sm:$0xff] }
 0x473   : > { %1590 = vst.msk [vmem:[#allocation2 + $0x18] sm:$0xff] %vm343_vm1, %v1582_v16  ;;  %1589 = vst.msk [vmem:[#allocation2 + $0x10] sm:$0xff] %vm343_vm1, %v1581_v43 }
 0x474   : > { %v1566_v10 = vpop.permute.xlu1 %1565  ;;  %v1564_v62 = vpop.permute.xlu0 %1563 }
 0x475   : > { %v1584_v55 = vadd.f32 %v1566_v10, %v1504_v33  ;;  %v1583_v44 = vadd.f32 %v1564_v62, %v1503_v51 }
 0x476   : > { %v1855_v31 = vld [vmem:[#allocation2] sm:$0xff] (!%p2246_p2)  ;;  %v1856_v5 = vld [vmem:[#allocation2 + $0x8] sm:$0xff] (!%p2246_p2) }
 0x477   : > { %1592 = vst.msk [vmem:[#allocation2 + $0x28] sm:$0xff] %vm343_vm1, %v1584_v55  ;;  %1591 = vst.msk [vmem:[#allocation2 + $0x20] sm:$0xff] %vm343_vm1, %v1583_v44 }
 0x478   : > { %v1570_v45 = vpop.permute.xlu1 %1569  ;;  %v1568_v39 = vpop.permute.xlu0 %1567  ;;  %1871 = vst.msk [vmem:[%s2936_s6] sm:$0xff] (!%p2246_p2), %vm343_vm1, %v1855_v31  ;;  %1872 = vst.msk [vmem:[%s2936_s6 + $0x8] sm:$0xff] (!%p2246_p2), %vm343_vm1, %v1856_v5 }
 0x479   : > { %v1586_v7 = vadd.f32 %v1570_v45, %v1506_v48  ;;  %v1585_v24 = vadd.f32 %v1568_v39, %v1505_v38 }
 0x47a   : > { %v1857_v29 = vld [vmem:[#allocation2 + $0x10] sm:$0xff] (!%p2246_p2)  ;;  %v1858_v32 = vld [vmem:[#allocation2 + $0x18] sm:$0xff] (!%p2246_p2) }
 0x47b   : > { %1594 = vst.msk [vmem:[#allocation2 + $0x38] sm:$0xff] %vm343_vm1, %v1586_v7  ;;  %1593 = vst.msk [vmem:[#allocation2 + $0x30] sm:$0xff] %vm343_vm1, %v1585_v24 }
 0x47c   : > { %v1814_v23 = vpop.permute.xlu1 %1813  ;;  %v1812_v63 = vpop.permute.xlu0 %1811  ;;  %1873 = vst.msk [vmem:[%s2936_s6 + $0x10] sm:$0xff] (!%p2246_p2), %vm343_vm1, %v1857_v29  ;;  %1874 = vst.msk [vmem:[%s2936_s6 + $0x18] sm:$0xff] (!%p2246_p2), %vm343_vm1, %v1858_v32 }
 0x47d   : > { %v1836_v3 = vadd.f32 %v1814_v23, %v1756_v42  ;;  %v1835_v35 = vadd.f32 %v1812_v63, %v1755_v2 }
 0x47e   : > { %v1859_v34 = vld [vmem:[#allocation2 + $0x20] sm:$0xff] (!%p2246_p2)  ;;  %v1860_v56 = vld [vmem:[#allocation2 + $0x28] sm:$0xff] (!%p2246_p2) }
 0x47f   : > { %1844 = vst.msk [vmem:[#allocation2 + $0x48] sm:$0xff] %vm343_vm1, %v1836_v3  ;;  %1843 = vst.msk [vmem:[#allocation2 + $0x40] sm:$0xff] %vm343_vm1, %v1835_v35 }
 0x480   : > { %v1818_v58 = vpop.permute.xlu1 %1817  ;;  %v1816_v0 = vpop.permute.xlu0 %1815  ;;  %1875 = vst.msk [vmem:[%s2936_s6 + $0x20] sm:$0xff] (!%p2246_p2), %vm343_vm1, %v1859_v34  ;;  %1876 = vst.msk [vmem:[%s2936_s6 + $0x28] sm:$0xff] (!%p2246_p2), %vm343_vm1, %v1860_v56 }
 0x481   : > { %v1838_v15 = vadd.f32 %v1818_v58, %v1758_v6  ;;  %v1837_v17 = vadd.f32 %v1816_v0, %v1757_v11 }
 0x482   : > { %v1861_v12 = vld [vmem:[#allocation2 + $0x30] sm:$0xff] (!%p2246_p2)  ;;  %v1862_v36 = vld [vmem:[#allocation2 + $0x38] sm:$0xff] (!%p2246_p2) }
 0x483   : > { %1846 = vst.msk [vmem:[#allocation2 + $0x58] sm:$0xff] %vm343_vm1, %v1838_v15  ;;  %1845 = vst.msk [vmem:[#allocation2 + $0x50] sm:$0xff] %vm343_vm1, %v1837_v17 }
 0x484   : > { %v1822_v9 = vpop.permute.xlu1 %1821  ;;  %v1820_v19 = vpop.permute.xlu0 %1819  ;;  %1877 = vst.msk [vmem:[%s2936_s6 + $0x30] sm:$0xff] (!%p2246_p2), %vm343_vm1, %v1861_v12  ;;  %1878 = vst.msk [vmem:[%s2936_s6 + $0x38] sm:$0xff] (!%p2246_p2), %vm343_vm1, %v1862_v36 }
 0x485   : > { %v1840_v26 = vadd.f32 %v1822_v9, %v1760_v22  ;;  %v1839_v21 = vadd.f32 %v1820_v19, %v1759_v25  ;;  %1854 = sbr.rel (%p2246_p2) target bundleno = 1172 (0x494), region = 44 }
 0x486   : > { %v1863_v47 = vld [vmem:[#allocation2 + $0x40] sm:$0xff] (!%p2246_p2)  ;;  %v1864_v18 = vld [vmem:[#allocation2 + $0x48] sm:$0xff] (!%p2246_p2) }
 0x487   : > { %1848 = vst.msk [vmem:[#allocation2 + $0x68] sm:$0xff] %vm343_vm1, %v1840_v26  ;;  %1847 = vst.msk [vmem:[#allocation2 + $0x60] sm:$0xff] %vm343_vm1, %v1839_v21 }
 0x488   : > { %v1826_v59 = vpop.permute.xlu1 %1825  ;;  %v1824_v27 = vpop.permute.xlu0 %1823  ;;  %1879 = vst.msk [vmem:[%s2936_s6 + $0x40] sm:$0xff] (!%p2246_p2), %vm343_vm1, %v1863_v47  ;;  %1880 = vst.msk [vmem:[%s2936_s6 + $0x48] sm:$0xff] (!%p2246_p2), %vm343_vm1, %v1864_v18 }
 0x489   : > { %v1842_v28 = vadd.f32 %v1826_v59, %v1762_v46  ;;  %v1841_v52 = vadd.f32 %v1824_v27, %v1761_v1 }
 0x48a   : > { %v1865_v8 = vld [vmem:[#allocation2 + $0x50] sm:$0xff] (!%p2246_p2)  ;;  %v1866_v54 = vld [vmem:[#allocation2 + $0x58] sm:$0xff] (!%p2246_p2) }
 0x48b   : > { %1850 = vst.msk [vmem:[#allocation2 + $0x78] sm:$0xff] %vm343_vm1, %v1842_v28  ;;  %1849 = vst.msk [vmem:[#allocation2 + $0x70] sm:$0xff] %vm343_vm1, %v1841_v52 }
 0x48c   : > { %1881 = vst.msk [vmem:[%s2936_s6 + $0x50] sm:$0xff] %vm343_vm1, %v1865_v8  ;;  %1882 = vst.msk [vmem:[%s2936_s6 + $0x58] sm:$0xff] %vm343_vm1, %v1866_v54 }
 0x48e   : > { %v1867_v37 = vld [vmem:[#allocation2 + $0x60] sm:$0xff]  ;;  %v1868_v49 = vld [vmem:[#allocation2 + $0x68] sm:$0xff] }
 0x48f   : > { %1883 = vst.msk [vmem:[%s2936_s6 + $0x60] sm:$0xff] %vm343_vm1, %v1867_v37  ;;  %1884 = vst.msk [vmem:[%s2936_s6 + $0x68] sm:$0xff] %vm343_vm1, %v1868_v49 }
 0x492   : > { %v1869_v14 = vld [vmem:[#allocation2 + $0x70] sm:$0xff]  ;;  %v1870_v41 = vld [vmem:[#allocation2 + $0x78] sm:$0xff] }
 0x493   : > { %1885 = vst.msk [vmem:[%s2936_s6 + $0x70] sm:$0xff] %vm343_vm1, %v1869_v14  ;;  %1886 = vst.msk [vmem:[%s2936_s6 + $0x78] sm:$0xff] %vm343_vm1, %v1870_v41 }
 0x494 PF: > { %s1888_s3 = scalar_lea.sflag [#allocation5], %s272_s5 }
 0x495   : > { %s3961_s27 = sld [smem:[#allocation20_spill]]  ;;  %s3962_s13 = sld [smem:[#allocation21_spill]] }
 0x496   : > { %s3963_s15 = sld [smem:[#allocation22_spill]]  ;;  %s1922_s28 = sshll.u32 %s2936_s6, 4  ;;  %s1923_s28 = int_to_ptr.vmem [resolvable:$true] %s1922_s28 }
 0x497   : > { %s3964_s29 = sld [smem:[#allocation34_spill]]  ;;  %s2649_s0 = smov 1024  }
 0x498   : > { %p3965_p8 = scmp.ne.s32.totalorder %s3943_s20, 0  ;;  %s2650_s1 = smov 2048  }
 0x499   : > { %s2653_s6 = smov [#allocation11]  }
 0x49a   : > { %2277 = sst [smem:[#allocation12]] (%p3965_p8), %s2649_s0 }
 0x49b   : > { %s2257_s4 = sshll.u32 %s3961_s27, 3  ;;  %s2250_s7 = sshll.u32 %s3962_s13, 5 }
 0x49c   : > { %s1901_s23 = sadd.s32 %s2257_s4, %s2250_s7  ;;  %s2251_s12 = sshll.u32 %s3963_s15, 6 }
 0x49d   : > { %s1903_s8 = sadd.s32 %s2251_s12, %s1901_s23  ;;  %2278 = sst [smem:[#allocation12 + $0x1]] (%p3965_p8), %s2650_s1 }
 0x49e   : > { %s2252_s2 = sshll.u32 %s1903_s8, 7  ;;  %s2651_s27 = smov 8  }
 0x49f   : > { %s1905_s18 = scalar_lea.hbm %s3964_s29, %s2252_s2  ;;  %2279 = sst [smem:[#allocation12 + $0x2]] (%p3965_p8), %s2651_s27 }
 0x4a0   : > { %s2652_s13 = smov 128   ;;  %2282 = sst [smem:[#allocation12 + $0x5]] (%p3965_p8), %s2651_s27 }
 0x4a1   : > { %2280 = sst [smem:[#allocation12 + $0x3]] (%p3965_p8), %s2652_s13  ;;  %s2654_s15 = smov 0  }
 0x4a2   : > { %2281 = sst [smem:[#allocation12 + $0x4]] (%p3965_p8), %s2652_s13 }
 0x4a3   : > { %2283 = dma.general (%p3965_p8), %s1923_s28, 2048, %s1905_s18, %s1888_s3, %s2653_s6, [#allocation12], %s2654_s15, 0  }
 0x4a4 PF: > { %p2289_p9 = scmp.ge.s32.totalorder %s2634_s26, 2  ;;  %s1950_s1 = sand.u32 1, %s2566_s9  }
 0x4a5   : > { %p3966_p12 = scmp.ne.s32.totalorder %s3947_s21, 0  ;;  %s1951_s4 = scalar_lea.sflag [#allocation5], %s1950_s1 }
 0x4a7   : > { %p2286_p13 = pnand %p2289_p9, %p3966_p12 }
 0x4a9   : > { %2561 = dma.done.wait (!%p2286_p13), %s1951_s4, 2048  }
 0x4aa   : > { %2563 = vsyncadd (!%p2286_p13), %s1951_s4, 4294965248  ;;  %s21_s26 = sadd.s32 1, %s2634_s26   ;;  %s3968_s12 = sld [smem:[#allocation17_spill]] }
 0x4ab   : > { %p3841_p1 = scmp.ge.s32.totalorder %s21_s26, 26   ;;  %s3969_s15 = sld [smem:[#allocation18_spill]] }
 0x4ac   : > { %s3970_s20 = sld [smem:[#allocation30_spill]]  ;;  %s3971_s19 = sld [smem:[#allocation23_spill]] }
 0x4ad   : > { %s3972_s3 = sld [smem:[#allocation24_spill]]  ;;  %s3973_s23 = sld [smem:[#allocation25_spill]] }
 0x4ae   : > { %s3974_s8 = sld [smem:[#allocation27_spill]]  ;;  %s3975_s9 = smov %s2570_s10 }
 0x4af   : > { %s3976_s28 = sld [smem:[#allocation28_spill]]  ;;  %s3977_s10 = smov %s2574_s11 }
 0x4b0   : > { %s3978_s11 = smov %s2848_s30  ;;  %s3979_s13 = smov %s2586_s14 }
 0x4b1   : > { %s3980_s14 = smov %s2845_s16  ;;  %s3981_s16 = smov %s2598_s17 }
 0x4b2   : > { %s3982_s17 = smov %s3970_s20  ;;  %s3983_s18 = smov %s2618_s22 }
 0x4b3   : > { %s3984_s20 = smov %s2626_s24  ;;  %s3985_s21 = smov %s2630_s25 }
 0x4b4   : > { %s3986_s22 = smov %s3972_s3  ;;  %s3987_s24 = smov %s3974_s8 }
 0x4b5   : > { %s3988_s25 = smov %s3976_s28  ;;  %20 = sbr.rel (!%p3841_p1) target bundleno = 18 (0x12), region = 115 }
 0x4bc   :  { %1956 = vsyncpa [#allocation4], 1 }
 0x4bd   :  { %1958 = vsyncpa [#allocation4 + $0x1], 1 }
 0x4be   :  { %1959 = vsyncpa [#allocation7], 1 }
 0x4bf   :  { %1961 = vsyncpa [#allocation7 + $0x1], 1 }
 0x4c0   :  { %1962 = vsyncpa [#allocation5], 1 }
 0x4c1   :  { %1964 = vsyncpa [#allocation5 + $0x1], 1 }

</bundles_post_ra>
